<compile_context>
chip_gen: v6e
topology: v6e:2x2x1
jax: 0.10.0
libtpu: 0.0.40
codegen_flags: <defaults>
</compile_context>

<pallas_src>
import functools

import jax
import jax.numpy as jnp
from jax.experimental import pallas as pl
from jax.experimental.pallas import tpu as pltpu


def _round_up(x, m):
    return (x + m - 1) // m * m


def _cdiv(a, b):
    return -(-a // b)


def _vmem_limit_bytes():
    """Per-generation VMEM budget: physical/2, capped at 64 MiB.
    v7x (64 MiB physical) -> 32 MiB; v5e/v6e (128 MiB) -> 64 MiB."""
    try:
        cap = int(pltpu.get_tpu_info().vmem_capacity_bytes)
    except Exception:
        return 48 * 1024 * 1024
    return max(16 * 1024 * 1024, min(64 * 1024 * 1024, cap // 2))


def _pick_m_tile(m128, tm_max):
    """M tile (multiple of 128, <= tm_max) giving >=2 grid steps when M allows
    it, so both v7x TensorCores get work; single block otherwise."""
    if m128 <= 128:
        return m128
    half = _round_up(_cdiv(m128, 2), 128)
    return max(128, min(tm_max, half))


def _const_spec(block_shape, single_buffer):
    """BlockSpec for a grid-invariant (weight/bias) operand; optionally
    single-buffered since its index_map is constant."""
    idx = lambda i: (0,) * len(block_shape)
    if single_buffer:
        return pl.BlockSpec(block_shape, idx, pipeline_mode=pl.Buffered(1))
    return pl.BlockSpec(block_shape, idx)


# ----------------------------------------------------------------------------
# Pallas kernel: out = relu( scale * (W @ P) )
#   W: (Cout, K) bf16, VMEM-resident across the grid.
#   P: (K, TM) uint8 (conv1) or bf16 (conv2/3); cast to bf16 in-kernel.
#   Output (Cout, TM) bf16: lane dim TM is a multiple of 128 -> dense stores.
# ----------------------------------------------------------------------------
def _conv_mm_kernel(w_ref, p_ref, o_ref, *, scale):
    p = p_ref[...].astype(w_ref.dtype)
    acc = jnp.dot(w_ref[...], p, preferred_element_type=jnp.float32)
    if scale != 1.0:
        acc = acc * jnp.float32(scale)
    acc = jnp.maximum(acc, 0.0)
    o_ref[...] = acc.astype(o_ref.dtype)


def conv_matmul(w2d, patches, *, scale=1.0, tm_max=2048,
                vmem_limit=48 * 1024 * 1024, single_buffer=True,
                out_dtype=jnp.bfloat16):
    """relu(scale * (W @ P)): W (Cout, K) bf16, P (K, M) -> (Cout, M_pad)."""
    n, k = w2d.shape
    k2, m = patches.shape
    assert k == k2, (k, k2)
    tm = _pick_m_tile(_round_up(m, 128), tm_max)
    m_pad = _round_up(m, tm)
    if m_pad != m:
        # Zero-pad M: every store is dense and padded columns hold real zeros
        # (relu(W @ 0) == 0), never uninitialized VMEM.
        patches = jnp.pad(patches, ((0, 0), (0, m_pad - m)))
    grid = (m_pad // tm,)
    return pl.pallas_call(
        functools.partial(_conv_mm_kernel, scale=scale),
        out_shape=jax.ShapeDtypeStruct((n, m_pad), out_dtype),
        grid=grid,
        in_specs=[
            _const_spec((n, k), single_buffer),          # weight: VMEM-resident
            pl.BlockSpec((k, tm), lambda i: (0, i)),     # patch tile along M
        ],
        out_specs=pl.BlockSpec((n, tm), lambda i: (0, i)),
        compiler_params=pltpu.CompilerParams(
            dimension_semantics=("parallel",),
            vmem_limit_bytes=vmem_limit),
    )(w2d, patches)


# ----------------------------------------------------------------------------
# Pallas kernel: fused "flatten + fc1(relu) + fc2" head.
#   y3_ref: (C, tb, P) channels-major conv3 output (bf16).
#   w1_ref: (C, P, H) fc1 weight re-laid-out per input channel (bf16).
#   The flatten/transpose is replaced by a per-channel accumulation loop into
#   a VMEM f32 scratch, so no in-kernel reshape/transpose is needed.
# ----------------------------------------------------------------------------
def _head_kernel(y3_ref, w1_ref, b1_ref, w2_ref, b2_ref, o_ref, acc_ref):
    acc_ref[...] = jnp.zeros_like(acc_ref)

    def body(ci, carry):
        acc_ref[...] += jnp.dot(y3_ref[ci], w1_ref[ci],
                                preferred_element_type=jnp.float32)
        return carry

    jax.lax.fori_loop(0, y3_ref.shape[0], body, 0)
    h = jnp.maximum(acc_ref[...] + b1_ref[...], 0.0)
    q = jnp.dot(h, w2_ref[...], preferred_element_type=jnp.float32)
    o_ref[...] = q + b2_ref[...]


def fused_head(y3_cm, w1r, b1_2d, w2t_pad, b2_pad_2d, *, tb_max=256,
               vmem_limit=48 * 1024 * 1024, single_buffer=True):
    c, b, p = y3_cm.shape
    c2, p2, hdim = w1r.shape
    assert c == c2 and p == p2, (c, c2, p, p2)
    npad = w2t_pad.shape[-1]
    b8 = _round_up(b, 8)
    if b8 <= 8:
        tb = b8
    else:
        tb = max(8, min(tb_max, _round_up(_cdiv(b8, 2), 8)))  # >=2 grid steps
    b_pad = _round_up(b, tb)
    if b_pad != b:
        y3_cm = jnp.pad(y3_cm, ((0, 0), (0, b_pad - b), (0, 0)))
    grid = (b_pad // tb,)
    return pl.pallas_call(
        _head_kernel,
        out_shape=jax.ShapeDtypeStruct((b_pad, npad), jnp.float32),
        grid=grid,
        in_specs=[
            pl.BlockSpec((c, tb, p), lambda i: (0, i, 0)),   # activations
            _const_spec((c, p, hdim), single_buffer),        # fc1 weight
            _const_spec((1, hdim), single_buffer),           # fc1 bias
            _const_spec((hdim, npad), single_buffer),        # fc2 weight (pad)
            _const_spec((1, npad), single_buffer),           # fc2 bias (pad)
        ],
        out_specs=pl.BlockSpec((tb, npad), lambda i: (i, 0)),
        scratch_shapes=[pltpu.VMEM((tb, hdim), jnp.float32)],
        compiler_params=pltpu.CompilerParams(
            dimension_semantics=("parallel",),
            vmem_limit_bytes=vmem_limit),
    )(y3_cm, w1r, b1_2d, w2t_pad, b2_pad_2d)


# ----------------------------------------------------------------------------
# im2col in channels-major layout (XLA glue, transpose-free):
#   x: (C, B, H, W) -> (C*k*k, B*OH*OW), rows ordered (c, kh, kw) to match the
#   PyTorch (O, I, kh, kw).reshape(O, I*k*k) weight layout; cols (b, oh, ow).
# ----------------------------------------------------------------------------
def im2col_cm(x, k, s):
    C, B, H, W = x.shape
    OH = (H - k) // s + 1
    OW = (W - k) // s + 1
    cols = []
    for kh in range(k):
        for kw in range(k):
            cols.append(x[:, :, kh:kh + s * OH:s, kw:kw + s * OW:s])  # (C,B,OH,OW)
    p = jnp.stack(cols, axis=1)                       # (C, k*k, B, OH, OW)
    return p.reshape(C * k * k, B * OH * OW), (OH, OW)


# ----------------------------------------------------------------------------
# DQN parameters (deterministic Kaiming-normal, relu gain) in PyTorch layout,
# plus a one-time "offline" re-layout for the kernels.
# ----------------------------------------------------------------------------
def init_dqn_params(key, outputs):
    ks = jax.random.split(key, 5)

    def kaiming(k, shape, fan_in):
        std = (2.0 / fan_in) ** 0.5
        return std * jax.random.normal(k, shape, dtype=jnp.float32)

    return {
        "conv1_w": kaiming(ks[0], (32, 4, 8, 8), 4 * 8 * 8),
        "conv2_w": kaiming(ks[1], (64, 32, 4, 4), 32 * 4 * 4),
        "conv3_w": kaiming(ks[2], (64, 64, 3, 3), 64 * 3 * 3),
        "fc1_w": kaiming(ks[3], (512, 64 * 7 * 7), 64 * 7 * 7),  # (out, in)
        "fc1_b": jnp.zeros((512,), jnp.float32),
        "fc2_w": kaiming(ks[4], (outputs, 512), 512),
        "fc2_b": jnp.zeros((outputs,), jnp.float32),
    }


def prepare_kernel_params(params, outputs):
    """One-time re-layout: conv weights (Cout, Cin*k*k) bf16; fc1 weight to
    channels-major (64, 49, 512) bf16 (so the head kernel never transposes the
    activation); fc2 zero-padded to 128 output lanes (f32, tiny)."""
    npad = _round_up(max(outputs, 1), 128)
    fc2_wt_pad = jnp.zeros((512, npad), jnp.float32).at[:, :outputs].set(
        params["fc2_w"].T)
    fc2_b_pad = jnp.zeros((1, npad), jnp.float32).at[0, :outputs].set(
        params["fc2_b"])
    return {
        "conv1_w2d": params["conv1_w"].reshape(32, 4 * 8 * 8).astype(jnp.bfloat16),
        "conv2_w2d": params["conv2_w"].reshape(64, 32 * 4 * 4).astype(jnp.bfloat16),
        "conv3_w2d": params["conv3_w"].reshape(64, 64 * 3 * 3).astype(jnp.bfloat16),
        # fc1_w column index is ci*49 + oh*7 + ow  ->  (ci, pixel, hidden).
        "fc1_wr": params["fc1_w"].T.reshape(64, 49, 512).astype(jnp.bfloat16),
        "fc1_b": params["fc1_b"].reshape(1, 512),
        "fc2_wt_pad": fc2_wt_pad,                      # (512, npad) f32
        "fc2_b_pad": fc2_b_pad,                        # (1, npad)   f32
    }


# ----------------------------------------------------------------------------
# Forward pass (mirrors DQN.forward)
# ----------------------------------------------------------------------------
@functools.partial(jax.jit, static_argnames=("outputs", "vmem_limit", "tm_max",
                                             "single_buffer"))
def dqn_forward(kp, x_u8, *, outputs, vmem_limit, tm_max, single_buffer=True):
    B = x_u8.shape[0]
    conv = functools.partial(conv_matmul, tm_max=tm_max, vmem_limit=vmem_limit,
                             single_buffer=single_buffer)
    # NCHW -> (C, B, H, W) once on the tiny uint8 input; frames stay uint8
    # through im2col; the u8->bf16 cast + 1/255 scale happen inside conv1.
    x = jnp.transpose(x_u8, (1, 0, 2, 3))                       # (4, B, 84, 84) u8

    # conv1: 4->32, k=8, s=4, relu
    p1, (oh1, ow1) = im2col_cm(x, 8, 4)                         # (256, B*400) u8
    m1 = B * oh1 * ow1
    y1 = conv(kp["conv1_w2d"], p1, scale=1.0 / 255.0)           # (32, M1p) bf16
    y1 = y1[:, :m1].reshape(32, B, oh1, ow1)

    # conv2: 32->64, k=4, s=2, relu
    p2, (oh2, ow2) = im2col_cm(y1, 4, 2)                        # (512, B*81) bf16
    m2 = B * oh2 * ow2
    y2 = conv(kp["conv2_w2d"], p2)[:, :m2].reshape(64, B, oh2, ow2)

    # conv3: 64->64, k=3, s=1, relu
    p3, (oh3, ow3) = im2col_cm(y2, 3, 1)                        # (576, B*49) bf16
    m3 = B * oh3 * ow3
    y3 = conv(kp["conv3_w2d"], p3)[:, :m3].reshape(64, B, oh3 * ow3)

    # fused flatten + fc1(relu) + fc2 on the channels-major conv3 output
    q_pad = fused_head(y3, kp["fc1_wr"], kp["fc1_b"],
                       kp["fc2_wt_pad"], kp["fc2_b_pad"],
                       vmem_limit=vmem_limit, single_buffer=single_buffer)
    return q_pad[:B, :outputs]


if __name__ == "__main__":
    # The module hard-codes fc1 = Linear(64*7*7, 512), which implies 84x84 input.
    B, C, H, W = 2, 4, 84, 84
    outputs = 6

    key = jax.random.PRNGKey(0)
    pkey, xkey = jax.random.split(key)
    params = init_dqn_params(pkey, outputs)
    kparams = prepare_kernel_params(params, outputs)

    x_u8 = jax.random.randint(xkey, (B, C, H, W), 0, 256, dtype=jnp.int32).astype(
        jnp.uint8)

    vlim = _vmem_limit_bytes()
    tmax = 4096 if vlim >= 48 * 1024 * 1024 else 2048

    try:
        q = dqn_forward(kparams, x_u8, outputs=outputs, vmem_limit=vlim,
                        tm_max=tmax, single_buffer=True)
        jax.block_until_ready(q)
    except Exception:
        # Fallback if this Pallas build rejects pipeline_mode=pl.Buffered(1).
        q = dqn_forward(kparams, x_u8, outputs=outputs, vmem_limit=vlim,
                        tm_max=tmax, single_buffer=False)
        jax.block_until_ready(q)

    assert q.shape == (B, outputs) and q.dtype == jnp.float32
    print("KERNEL_OK")
</pallas_src>

<mosaic_0001>
module attributes {stable_mosaic.version = 11 : i64} {
  func.func @_conv_mm_kernel(%arg0: i32, %arg1: memref<32x256xbf16, #tpu.memory_space<vmem>>, %arg2: memref<256x512xi8, #tpu.memory_space<vmem>>, %arg3: memref<32x512xbf16, #tpu.memory_space<vmem>>) attributes {dimension_semantics = [#tpu.dimension_semantics<parallel>], iteration_bounds = array<i64: 2>, scalar_prefetch = 0 : i64, scratch_operands = 0 : i64, tpu.core_type = #tpu.core_type<tc>, window_params = [{pipeline_mode = #tpu.pipeline_mode<synchronous>, transform_indices = @transform_0, window_bounds = array<i64: 32, 256>}, {transform_indices = @transform_1, window_bounds = array<i64: 256, 512>}, {transform_indices = @transform_2, window_bounds = array<i64: 32, 512>}]} {
    %c0 = arith.constant 0 : index
    %c0_0 = arith.constant 0 : index
    %0 = vector.load %arg2[%c0, %c0_0] : memref<256x512xi8, #tpu.memory_space<vmem>>, vector<256x512xi8>
    %1 = arith.uitofp %0 : vector<256x512xi8> to vector<256x512xbf16>
    %c0_1 = arith.constant 0 : index
    %c0_2 = arith.constant 0 : index
    %2 = vector.load %arg1[%c0_1, %c0_2] : memref<32x256xbf16, #tpu.memory_space<vmem>>, vector<32x256xbf16>
    %cst = arith.constant dense<0.000000e+00> : vector<32x512xf32>
    %3 = tpu.matmul %2, %1, %cst {dimension_numbers = #tpu.dot_dimension_numbers<[1], [0], [0], [1], [0, 0, 1, 1], [], []>} : vector<32x256xbf16>, vector<256x512xbf16>, vector<32x512xf32> -> vector<32x512xf32>
    %cst_3 = arith.constant 0.00392156886 : f32
    %4 = vector.broadcast %cst_3 : f32 to vector<32x512xf32>
    %5 = arith.mulf %3, %4 : vector<32x512xf32>
    %cst_4 = arith.constant 0.000000e+00 : f32
    %6 = vector.broadcast %cst_4 : f32 to vector<32x512xf32>
    %7 = arith.maximumf %5, %6 : vector<32x512xf32>
    %8 = arith.truncf %7 : vector<32x512xf32> to vector<32x512xbf16>
    %c0_5 = arith.constant 0 : index
    %c0_6 = arith.constant 0 : index
    %9 = vector.load %arg3[%c0_5, %c0_6] : memref<32x512xbf16, #tpu.memory_space<vmem>>, vector<32x512xbf16>
    tpu.vector_store %arg3[%c0_5, %c0_6], %8 {strides = array<i32>} : memref<32x512xbf16, #tpu.memory_space<vmem>>, vector<32x512xbf16>,
    return
  }
  func.func @transform_0(%arg0: i32) -> (i32, i32) {
    %c0_i32 = arith.constant 0 : i32
    %c0_i32_0 = arith.constant 0 : i32
    %c0_i32_1 = arith.constant 0 : i32
    return %c0_i32, %c0_i32_0 : i32, i32
  }
  func.func @transform_1(%arg0: i32) -> (i32, i32) {
    %c0_i32 = arith.constant 0 : i32
    %c0_i32_0 = arith.constant 0 : i32
    return %c0_i32, %arg0 : i32, i32
  }
  func.func @transform_2(%arg0: i32) -> (i32, i32) {
    %c0_i32 = arith.constant 0 : i32
    %c0_i32_0 = arith.constant 0 : i32
    return %c0_i32, %arg0 : i32, i32
  }
}

module attributes {stable_mosaic.version = 11 : i64} {
  func.func @_conv_mm_kernel(%arg0: i32, %arg1: memref<64x512xbf16, #tpu.memory_space<vmem>>, %arg2: memref<512x128xbf16, #tpu.memory_space<vmem>>, %arg3: memref<64x128xbf16, #tpu.memory_space<vmem>>) attributes {dimension_semantics = [#tpu.dimension_semantics<parallel>], iteration_bounds = array<i64: 2>, scalar_prefetch = 0 : i64, scratch_operands = 0 : i64, tpu.core_type = #tpu.core_type<tc>, window_params = [{pipeline_mode = #tpu.pipeline_mode<synchronous>, transform_indices = @transform_0, window_bounds = array<i64: 64, 512>}, {transform_indices = @transform_1, window_bounds = array<i64: 512, 128>}, {transform_indices = @transform_2, window_bounds = array<i64: 64, 128>}]} {
    %c0 = arith.constant 0 : index
    %c0_0 = arith.constant 0 : index
    %0 = vector.load %arg2[%c0, %c0_0] : memref<512x128xbf16, #tpu.memory_space<vmem>>, vector<512x128xbf16>
    %c0_1 = arith.constant 0 : index
    %c0_2 = arith.constant 0 : index
    %1 = vector.load %arg1[%c0_1, %c0_2] : memref<64x512xbf16, #tpu.memory_space<vmem>>, vector<64x512xbf16>
    %cst = arith.constant dense<0.000000e+00> : vector<64x128xf32>
    %2 = tpu.matmul %1, %0, %cst {dimension_numbers = #tpu.dot_dimension_numbers<[1], [0], [0], [1], [0, 0, 1, 1], [], []>} : vector<64x512xbf16>, vector<512x128xbf16>, vector<64x128xf32> -> vector<64x128xf32>
    %cst_3 = arith.constant 0.000000e+00 : f32
    %3 = vector.broadcast %cst_3 : f32 to vector<64x128xf32>
    %4 = arith.maximumf %2, %3 : vector<64x128xf32>
    %5 = arith.truncf %4 : vector<64x128xf32> to vector<64x128xbf16>
    %c0_4 = arith.constant 0 : index
    %c0_5 = arith.constant 0 : index
    %6 = vector.load %arg3[%c0_4, %c0_5] : memref<64x128xbf16, #tpu.memory_space<vmem>>, vector<64x128xbf16>
    tpu.vector_store %arg3[%c0_4, %c0_5], %5 {strides = array<i32>} : memref<64x128xbf16, #tpu.memory_space<vmem>>, vector<64x128xbf16>,
    return
  }
  func.func @transform_0(%arg0: i32) -> (i32, i32) {
    %c0_i32 = arith.constant 0 : i32
    %c0_i32_0 = arith.constant 0 : i32
    %c0_i32_1 = arith.constant 0 : i32
    return %c0_i32, %c0_i32_0 : i32, i32
  }
  func.func @transform_1(%arg0: i32) -> (i32, i32) {
    %c0_i32 = arith.constant 0 : i32
    %c0_i32_0 = arith.constant 0 : i32
    return %c0_i32, %arg0 : i32, i32
  }
  func.func @transform_2(%arg0: i32) -> (i32, i32) {
    %c0_i32 = arith.constant 0 : i32
    %c0_i32_0 = arith.constant 0 : i32
    return %c0_i32, %arg0 : i32, i32
  }
}

module attributes {stable_mosaic.version = 11 : i64} {
  func.func @_conv_mm_kernel(%arg0: i32, %arg1: memref<64x576xbf16, #tpu.memory_space<vmem>>, %arg2: memref<576x128xbf16, #tpu.memory_space<vmem>>, %arg3: memref<64x128xbf16, #tpu.memory_space<vmem>>) attributes {dimension_semantics = [#tpu.dimension_semantics<parallel>], iteration_bounds = array<i64: 1>, scalar_prefetch = 0 : i64, scratch_operands = 0 : i64, tpu.core_type = #tpu.core_type<tc>, window_params = [{pipeline_mode = #tpu.pipeline_mode<synchronous>, transform_indices = @transform_0, window_bounds = array<i64: 64, 576>}, {transform_indices = @transform_1, window_bounds = array<i64: 576, 128>}, {transform_indices = @transform_2, window_bounds = array<i64: 64, 128>}]} {
    %c0 = arith.constant 0 : index
    %c0_0 = arith.constant 0 : index
    %0 = vector.load %arg2[%c0, %c0_0] : memref<576x128xbf16, #tpu.memory_space<vmem>>, vector<576x128xbf16>
    %c0_1 = arith.constant 0 : index
    %c0_2 = arith.constant 0 : index
    %1 = vector.load %arg1[%c0_1, %c0_2] : memref<64x576xbf16, #tpu.memory_space<vmem>>, vector<64x576xbf16>
    %cst = arith.constant dense<0.000000e+00> : vector<64x128xf32>
    %2 = tpu.matmul %1, %0, %cst {dimension_numbers = #tpu.dot_dimension_numbers<[1], [0], [0], [1], [0, 0, 1, 1], [], []>} : vector<64x576xbf16>, vector<576x128xbf16>, vector<64x128xf32> -> vector<64x128xf32>
    %cst_3 = arith.constant 0.000000e+00 : f32
    %3 = vector.broadcast %cst_3 : f32 to vector<64x128xf32>
    %4 = arith.maximumf %2, %3 : vector<64x128xf32>
    %5 = arith.truncf %4 : vector<64x128xf32> to vector<64x128xbf16>
    %c0_4 = arith.constant 0 : index
    %c0_5 = arith.constant 0 : index
    %6 = vector.load %arg3[%c0_4, %c0_5] : memref<64x128xbf16, #tpu.memory_space<vmem>>, vector<64x128xbf16>
    tpu.vector_store %arg3[%c0_4, %c0_5], %5 {strides = array<i32>} : memref<64x128xbf16, #tpu.memory_space<vmem>>, vector<64x128xbf16>,
    return
  }
  func.func @transform_0(%arg0: i32) -> (i32, i32) {
    %c0_i32 = arith.constant 0 : i32
    %c0_i32_0 = arith.constant 0 : i32
    %c0_i32_1 = arith.constant 0 : i32
    return %c0_i32, %c0_i32_0 : i32, i32
  }
  func.func @transform_1(%arg0: i32) -> (i32, i32) {
    %c0_i32 = arith.constant 0 : i32
    %c0_i32_0 = arith.constant 0 : i32
    return %c0_i32, %arg0 : i32, i32
  }
  func.func @transform_2(%arg0: i32) -> (i32, i32) {
    %c0_i32 = arith.constant 0 : i32
    %c0_i32_0 = arith.constant 0 : i32
    return %c0_i32, %arg0 : i32, i32
  }
}

module attributes {stable_mosaic.version = 11 : i64} {
  func.func @_head_kernel(%arg0: i32, %arg1: memref<64x8x49xbf16, #tpu.memory_space<vmem>>, %arg2: memref<64x49x512xbf16, #tpu.memory_space<vmem>>, %arg3: memref<1x512xf32, #tpu.memory_space<vmem>>, %arg4: memref<512x128xf32, #tpu.memory_space<vmem>>, %arg5: memref<1x128xf32, #tpu.memory_space<vmem>>, %arg6: memref<8x128xf32, #tpu.memory_space<vmem>>, %arg7: memref<8x512xf32, #tpu.memory_space<vmem>>) attributes {dimension_semantics = [#tpu.dimension_semantics<parallel>], iteration_bounds = array<i64: 1>, scalar_prefetch = 0 : i64, scratch_operands = 1 : i64, tpu.core_type = #tpu.core_type<tc>, window_params = [{transform_indices = @transform_0, window_bounds = array<i64: 64, 8, 49>}, {pipeline_mode = #tpu.pipeline_mode<synchronous>, transform_indices = @transform_1, window_bounds = array<i64: 64, 49, 512>}, {pipeline_mode = #tpu.pipeline_mode<synchronous>, transform_indices = @transform_2, window_bounds = array<i64: 1, 512>}, {pipeline_mode = #tpu.pipeline_mode<synchronous>, transform_indices = @transform_3, window_bounds = array<i64: 512, 128>}, {pipeline_mode = #tpu.pipeline_mode<synchronous>, transform_indices = @transform_4, window_bounds = array<i64: 1, 128>}, {transform_indices = @transform_5, window_bounds = array<i64: 8, 128>}]} {
    %cst = arith.constant 0.000000e+00 : f32
    %0 = vector.broadcast %cst : f32 to vector<8x512xf32>
    %c0 = arith.constant 0 : index
    %c0_0 = arith.constant 0 : index
    %1 = vector.load %arg7[%c0, %c0_0] : memref<8x512xf32, #tpu.memory_space<vmem>>, vector<8x512xf32>
    tpu.vector_store %arg7[%c0, %c0_0], %0 {strides = array<i32>} : memref<8x512xf32, #tpu.memory_space<vmem>>, vector<8x512xf32>,
    %c0_i32 = arith.constant 0 : i32
    %c64_i32 = arith.constant 64 : i32
    %2 = arith.addi %c0_i32, %c64_i32 : i32
    %c1_i32 = arith.constant 1 : i32
    scf.for %arg8 = %c0_i32 to %2 step %c1_i32  : i32 {
      %c0_14 = arith.constant 0 : index
      %c0_15 = arith.constant 0 : index
      %15 = vector.load %arg7[%c0_14, %c0_15] : memref<8x512xf32, #tpu.memory_space<vmem>>, vector<8x512xf32>
      %16 = arith.index_cast %arg8 : i32 to index
      %c0_16 = arith.constant 0 : index
      %c0_17 = arith.constant 0 : index
      %17 = vector.load %arg1[%16, %c0_16, %c0_17] : memref<64x8x49xbf16, #tpu.memory_space<vmem>>, vector<1x8x49xbf16>
      %18 = vector.shape_cast %17 : vector<1x8x49xbf16> to vector<8x49xbf16>
      %19 = arith.index_cast %arg8 : i32 to index
      %c0_18 = arith.constant 0 : index
      %c0_19 = arith.constant 0 : index
      %20 = vector.load %arg2[%19, %c0_18, %c0_19] : memref<64x49x512xbf16, #tpu.memory_space<vmem>>, vector<1x49x512xbf16>
      %21 = vector.shape_cast %20 : vector<1x49x512xbf16> to vector<49x512xbf16>
      %cst_20 = arith.constant dense<0.000000e+00> : vector<8x512xf32>
      %22 = tpu.matmul %18, %21, %cst_20 {dimension_numbers = #tpu.dot_dimension_numbers<[1], [0], [0], [1], [0, 0, 1, 1], [], []>} : vector<8x49xbf16>, vector<49x512xbf16>, vector<8x512xf32> -> vector<8x512xf32>
      %23 = arith.addf %15, %22 : vector<8x512xf32>
      %c0_21 = arith.constant 0 : index
      %c0_22 = arith.constant 0 : index
      %24 = vector.load %arg7[%c0_21, %c0_22] : memref<8x512xf32, #tpu.memory_space<vmem>>, vector<8x512xf32>
      tpu.vector_store %arg7[%c0_21, %c0_22], %23 {strides = array<i32>} : memref<8x512xf32, #tpu.memory_space<vmem>>, vector<8x512xf32>,
    }
    %c64_i32_1 = arith.constant 64 : i32
    %c0_2 = arith.constant 0 : index
    %c0_3 = arith.constant 0 : index
    %3 = vector.load %arg7[%c0_2, %c0_3] : memref<8x512xf32, #tpu.memory_space<vmem>>, vector<8x512xf32>
    %c0_4 = arith.constant 0 : index
    %c0_5 = arith.constant 0 : index
    %4 = vector.load %arg3[%c0_4, %c0_5] : memref<1x512xf32, #tpu.memory_space<vmem>>, vector<1x512xf32>
    %5 = vector.broadcast %4 : vector<1x512xf32> to vector<8x512xf32>
    %6 = arith.addf %3, %5 : vector<8x512xf32>
    %cst_6 = arith.constant 0.000000e+00 : f32
    %7 = vector.broadcast %cst_6 : f32 to vector<8x512xf32>
    %8 = arith.maximumf %6, %7 : vector<8x512xf32>
    %c0_7 = arith.constant 0 : index
    %c0_8 = arith.constant 0 : index
    %9 = vector.load %arg4[%c0_7, %c0_8] : memref<512x128xf32, #tpu.memory_space<vmem>>, vector<512x128xf32>
    %cst_9 = arith.constant dense<0.000000e+00> : vector<8x128xf32>
    %10 = tpu.matmul %8, %9, %cst_9 {dimension_numbers = #tpu.dot_dimension_numbers<[1], [0], [0], [1], [0, 0, 1, 1], [], []>} : vector<8x512xf32>, vector<512x128xf32>, vector<8x128xf32> -> vector<8x128xf32>
    %c0_10 = arith.constant 0 : index
    %c0_11 = arith.constant 0 : index
    %11 = vector.load %arg5[%c0_10, %c0_11] : memref<1x128xf32, #tpu.memory_space<vmem>>, vector<1x128xf32>
    %12 = vector.broadcast %11 : vector<1x128xf32> to vector<8x128xf32>
    %13 = arith.addf %10, %12 : vector<8x128xf32>
    %c0_12 = arith.constant 0 : index
    %c0_13 = arith.constant 0 : index
    %14 = vector.load %arg6[%c0_12, %c0_13] : memref<8x128xf32, #tpu.memory_space<vmem>>, vector<8x128xf32>
    tpu.vector_store %arg6[%c0_12, %c0_13], %13 {strides = array<i32>} : memref<8x128xf32, #tpu.memory_space<vmem>>, vector<8x128xf32>,
    return
  }
  func.func @transform_0(%arg0: i32) -> (i32, i32, i32) {
    %c0_i32 = arith.constant 0 : i32
    %c0_i32_0 = arith.constant 0 : i32
    %c0_i32_1 = arith.constant 0 : i32
    return %c0_i32, %arg0, %c0_i32_0 : i32, i32, i32
  }
  func.func @transform_1(%arg0: i32) -> (i32, i32, i32) {
    %c0_i32 = arith.constant 0 : i32
    %c0_i32_0 = arith.constant 0 : i32
    %c0_i32_1 = arith.constant 0 : i32
    %c0_i32_2 = arith.constant 0 : i32
    return %c0_i32, %c0_i32_0, %c0_i32_1 : i32, i32, i32
  }
  func.func @transform_2(%arg0: i32) -> (i32, i32) {
    %c0_i32 = arith.constant 0 : i32
    %c0_i32_0 = arith.constant 0 : i32
    %c0_i32_1 = arith.constant 0 : i32
    return %c0_i32, %c0_i32_0 : i32, i32
  }
  func.func @transform_3(%arg0: i32) -> (i32, i32) {
    %c0_i32 = arith.constant 0 : i32
    %c0_i32_0 = arith.constant 0 : i32
    %c0_i32_1 = arith.constant 0 : i32
    return %c0_i32, %c0_i32_0 : i32, i32
  }
  func.func @transform_4(%arg0: i32) -> (i32, i32) {
    %c0_i32 = arith.constant 0 : i32
    %c0_i32_0 = arith.constant 0 : i32
    %c0_i32_1 = arith.constant 0 : i32
    return %c0_i32, %c0_i32_0 : i32, i32
  }
  func.func @transform_5(%arg0: i32) -> (i32, i32) {
    %c0_i32 = arith.constant 0 : i32
    %c0_i32_0 = arith.constant 0 : i32
    return %arg0, %c0_i32 : i32, i32
  }
}

module attributes {stable_mosaic.version = 11 : i64} {
  func.func @_conv_mm_kernel(%arg0: i32, %arg1: memref<32x256xbf16, #tpu.memory_space<vmem>>, %arg2: memref<256x512xi8, #tpu.memory_space<vmem>>, %arg3: memref<32x512xbf16, #tpu.memory_space<vmem>>) attributes {dimension_semantics = [#tpu.dimension_semantics<parallel>], iteration_bounds = array<i64: 2>, scalar_prefetch = 0 : i64, scratch_operands = 0 : i64, tpu.core_type = #tpu.core_type<tc>, window_params = [{pipeline_mode = #tpu.pipeline_mode<synchronous>, transform_indices = @transform_0, window_bounds = array<i64: 32, 256>}, {transform_indices = @transform_1, window_bounds = array<i64: 256, 512>}, {transform_indices = @transform_2, window_bounds = array<i64: 32, 512>}]} {
    %c0 = arith.constant 0 : index
    %c0_0 = arith.constant 0 : index
    %0 = vector.load %arg2[%c0, %c0_0] : memref<256x512xi8, #tpu.memory_space<vmem>>, vector<256x512xi8>
    %1 = arith.uitofp %0 : vector<256x512xi8> to vector<256x512xbf16>
    %c0_1 = arith.constant 0 : index
    %c0_2 = arith.constant 0 : index
    %2 = vector.load %arg1[%c0_1, %c0_2] : memref<32x256xbf16, #tpu.memory_space<vmem>>, vector<32x256xbf16>
    %cst = arith.constant dense<0.000000e+00> : vector<32x512xf32>
    %3 = tpu.matmul %2, %1, %cst {dimension_numbers = #tpu.dot_dimension_numbers<[1], [0], [0], [1], [0, 0, 1, 1], [], []>} : vector<32x256xbf16>, vector<256x512xbf16>, vector<32x512xf32> -> vector<32x512xf32>
    %cst_3 = arith.constant 0.00392156886 : f32
    %4 = vector.broadcast %cst_3 : f32 to vector<32x512xf32>
    %5 = arith.mulf %3, %4 : vector<32x512xf32>
    %cst_4 = arith.constant 0.000000e+00 : f32
    %6 = vector.broadcast %cst_4 : f32 to vector<32x512xf32>
    %7 = arith.maximumf %5, %6 : vector<32x512xf32>
    %8 = arith.truncf %7 : vector<32x512xf32> to vector<32x512xbf16>
    %c0_5 = arith.constant 0 : index
    %c0_6 = arith.constant 0 : index
    %9 = vector.load %arg3[%c0_5, %c0_6] : memref<32x512xbf16, #tpu.memory_space<vmem>>, vector<32x512xbf16>
    tpu.vector_store %arg3[%c0_5, %c0_6], %8 {strides = array<i32>} : memref<32x512xbf16, #tpu.memory_space<vmem>>, vector<32x512xbf16>,
    return
  }
  func.func @transform_0(%arg0: i32) -> (i32, i32) {
    %c0_i32 = arith.constant 0 : i32
    %c0_i32_0 = arith.constant 0 : i32
    %c0_i32_1 = arith.constant 0 : i32
    return %c0_i32, %c0_i32_0 : i32, i32
  }
  func.func @transform_1(%arg0: i32) -> (i32, i32) {
    %c0_i32 = arith.constant 0 : i32
    %c0_i32_0 = arith.constant 0 : i32
    return %c0_i32, %arg0 : i32, i32
  }
  func.func @transform_2(%arg0: i32) -> (i32, i32) {
    %c0_i32 = arith.constant 0 : i32
    %c0_i32_0 = arith.constant 0 : i32
    return %c0_i32, %arg0 : i32, i32
  }
}

module attributes {stable_mosaic.version = 11 : i64} {
  func.func @_conv_mm_kernel(%arg0: i32, %arg1: memref<64x512xbf16, #tpu.memory_space<vmem>>, %arg2: memref<512x128xbf16, #tpu.memory_space<vmem>>, %arg3: memref<64x128xbf16, #tpu.memory_space<vmem>>) attributes {dimension_semantics = [#tpu.dimension_semantics<parallel>], iteration_bounds = array<i64: 2>, scalar_prefetch = 0 : i64, scratch_operands = 0 : i64, tpu.core_type = #tpu.core_type<tc>, window_params = [{pipeline_mode = #tpu.pipeline_mode<synchronous>, transform_indices = @transform_0, window_bounds = array<i64: 64, 512>}, {transform_indices = @transform_1, window_bounds = array<i64: 512, 128>}, {transform_indices = @transform_2, window_bounds = array<i64: 64, 128>}]} {
    %c0 = arith.constant 0 : index
    %c0_0 = arith.constant 0 : index
    %0 = vector.load %arg2[%c0, %c0_0] : memref<512x128xbf16, #tpu.memory_space<vmem>>, vector<512x128xbf16>
    %c0_1 = arith.constant 0 : index
    %c0_2 = arith.constant 0 : index
    %1 = vector.load %arg1[%c0_1, %c0_2] : memref<64x512xbf16, #tpu.memory_space<vmem>>, vector<64x512xbf16>
    %cst = arith.constant dense<0.000000e+00> : vector<64x128xf32>
    %2 = tpu.matmul %1, %0, %cst {dimension_numbers = #tpu.dot_dimension_numbers<[1], [0], [0], [1], [0, 0, 1, 1], [], []>} : vector<64x512xbf16>, vector<512x128xbf16>, vector<64x128xf32> -> vector<64x128xf32>
    %cst_3 = arith.constant 0.000000e+00 : f32
    %3 = vector.broadcast %cst_3 : f32 to vector<64x128xf32>
    %4 = arith.maximumf %2, %3 : vector<64x128xf32>
    %5 = arith.truncf %4 : vector<64x128xf32> to vector<64x128xbf16>
    %c0_4 = arith.constant 0 : index
    %c0_5 = arith.constant 0 : index
    %6 = vector.load %arg3[%c0_4, %c0_5] : memref<64x128xbf16, #tpu.memory_space<vmem>>, vector<64x128xbf16>
    tpu.vector_store %arg3[%c0_4, %c0_5], %5 {strides = array<i32>} : memref<64x128xbf16, #tpu.memory_space<vmem>>, vector<64x128xbf16>,
    return
  }
  func.func @transform_0(%arg0: i32) -> (i32, i32) {
    %c0_i32 = arith.constant 0 : i32
    %c0_i32_0 = arith.constant 0 : i32
    %c0_i32_1 = arith.constant 0 : i32
    return %c0_i32, %c0_i32_0 : i32, i32
  }
  func.func @transform_1(%arg0: i32) -> (i32, i32) {
    %c0_i32 = arith.constant 0 : i32
    %c0_i32_0 = arith.constant 0 : i32
    return %c0_i32, %arg0 : i32, i32
  }
  func.func @transform_2(%arg0: i32) -> (i32, i32) {
    %c0_i32 = arith.constant 0 : i32
    %c0_i32_0 = arith.constant 0 : i32
    return %c0_i32, %arg0 : i32, i32
  }
}

module attributes {stable_mosaic.version = 11 : i64} {
  func.func @_conv_mm_kernel(%arg0: i32, %arg1: memref<64x576xbf16, #tpu.memory_space<vmem>>, %arg2: memref<576x128xbf16, #tpu.memory_space<vmem>>, %arg3: memref<64x128xbf16, #tpu.memory_space<vmem>>) attributes {dimension_semantics = [#tpu.dimension_semantics<parallel>], iteration_bounds = array<i64: 1>, scalar_prefetch = 0 : i64, scratch_operands = 0 : i64, tpu.core_type = #tpu.core_type<tc>, window_params = [{pipeline_mode = #tpu.pipeline_mode<synchronous>, transform_indices = @transform_0, window_bounds = array<i64: 64, 576>}, {transform_indices = @transform_1, window_bounds = array<i64: 576, 128>}, {transform_indices = @transform_2, window_bounds = array<i64: 64, 128>}]} {
    %c0 = arith.constant 0 : index
    %c0_0 = arith.constant 0 : index
    %0 = vector.load %arg2[%c0, %c0_0] : memref<576x128xbf16, #tpu.memory_space<vmem>>, vector<576x128xbf16>
    %c0_1 = arith.constant 0 : index
    %c0_2 = arith.constant 0 : index
    %1 = vector.load %arg1[%c0_1, %c0_2] : memref<64x576xbf16, #tpu.memory_space<vmem>>, vector<64x576xbf16>
    %cst = arith.constant dense<0.000000e+00> : vector<64x128xf32>
    %2 = tpu.matmul %1, %0, %cst {dimension_numbers = #tpu.dot_dimension_numbers<[1], [0], [0], [1], [0, 0, 1, 1], [], []>} : vector<64x576xbf16>, vector<576x128xbf16>, vector<64x128xf32> -> vector<64x128xf32>
    %cst_3 = arith.constant 0.000000e+00 : f32
    %3 = vector.broadcast %cst_3 : f32 to vector<64x128xf32>
    %4 = arith.maximumf %2, %3 : vector<64x128xf32>
    %5 = arith.truncf %4 : vector<64x128xf32> to vector<64x128xbf16>
    %c0_4 = arith.constant 0 : index
    %c0_5 = arith.constant 0 : index
    %6 = vector.load %arg3[%c0_4, %c0_5] : memref<64x128xbf16, #tpu.memory_space<vmem>>, vector<64x128xbf16>
    tpu.vector_store %arg3[%c0_4, %c0_5], %5 {strides = array<i32>} : memref<64x128xbf16, #tpu.memory_space<vmem>>, vector<64x128xbf16>,
    return
  }
  func.func @transform_0(%arg0: i32) -> (i32, i32) {
    %c0_i32 = arith.constant 0 : i32
    %c0_i32_0 = arith.constant 0 : i32
    %c0_i32_1 = arith.constant 0 : i32
    return %c0_i32, %c0_i32_0 : i32, i32
  }
  func.func @transform_1(%arg0: i32) -> (i32, i32) {
    %c0_i32 = arith.constant 0 : i32
    %c0_i32_0 = arith.constant 0 : i32
    return %c0_i32, %arg0 : i32, i32
  }
  func.func @transform_2(%arg0: i32) -> (i32, i32) {
    %c0_i32 = arith.constant 0 : i32
    %c0_i32_0 = arith.constant 0 : i32
    return %c0_i32, %arg0 : i32, i32
  }
}

module attributes {stable_mosaic.version = 11 : i64} {
  func.func @_head_kernel(%arg0: i32, %arg1: memref<64x8x49xbf16, #tpu.memory_space<vmem>>, %arg2: memref<64x49x512xbf16, #tpu.memory_space<vmem>>, %arg3: memref<1x512xf32, #tpu.memory_space<vmem>>, %arg4: memref<512x128xf32, #tpu.memory_space<vmem>>, %arg5: memref<1x128xf32, #tpu.memory_space<vmem>>, %arg6: memref<8x128xf32, #tpu.memory_space<vmem>>, %arg7: memref<8x512xf32, #tpu.memory_space<vmem>>) attributes {dimension_semantics = [#tpu.dimension_semantics<parallel>], iteration_bounds = array<i64: 1>, scalar_prefetch = 0 : i64, scratch_operands = 1 : i64, tpu.core_type = #tpu.core_type<tc>, window_params = [{transform_indices = @transform_0, window_bounds = array<i64: 64, 8, 49>}, {pipeline_mode = #tpu.pipeline_mode<synchronous>, transform_indices = @transform_1, window_bounds = array<i64: 64, 49, 512>}, {pipeline_mode = #tpu.pipeline_mode<synchronous>, transform_indices = @transform_2, window_bounds = array<i64: 1, 512>}, {pipeline_mode = #tpu.pipeline_mode<synchronous>, transform_indices = @transform_3, window_bounds = array<i64: 512, 128>}, {pipeline_mode = #tpu.pipeline_mode<synchronous>, transform_indices = @transform_4, window_bounds = array<i64: 1, 128>}, {transform_indices = @transform_5, window_bounds = array<i64: 8, 128>}]} {
    %cst = arith.constant 0.000000e+00 : f32
    %0 = vector.broadcast %cst : f32 to vector<8x512xf32>
    %c0 = arith.constant 0 : index
    %c0_0 = arith.constant 0 : index
    %1 = vector.load %arg7[%c0, %c0_0] : memref<8x512xf32, #tpu.memory_space<vmem>>, vector<8x512xf32>
    tpu.vector_store %arg7[%c0, %c0_0], %0 {strides = array<i32>} : memref<8x512xf32, #tpu.memory_space<vmem>>, vector<8x512xf32>,
    %c0_i32 = arith.constant 0 : i32
    %c64_i32 = arith.constant 64 : i32
    %2 = arith.addi %c0_i32, %c64_i32 : i32
    %c1_i32 = arith.constant 1 : i32
    scf.for %arg8 = %c0_i32 to %2 step %c1_i32  : i32 {
      %c0_14 = arith.constant 0 : index
      %c0_15 = arith.constant 0 : index
      %15 = vector.load %arg7[%c0_14, %c0_15] : memref<8x512xf32, #tpu.memory_space<vmem>>, vector<8x512xf32>
      %16 = arith.index_cast %arg8 : i32 to index
      %c0_16 = arith.constant 0 : index
      %c0_17 = arith.constant 0 : index
      %17 = vector.load %arg1[%16, %c0_16, %c0_17] : memref<64x8x49xbf16, #tpu.memory_space<vmem>>, vector<1x8x49xbf16>
      %18 = vector.shape_cast %17 : vector<1x8x49xbf16> to vector<8x49xbf16>
      %19 = arith.index_cast %arg8 : i32 to index
      %c0_18 = arith.constant 0 : index
      %c0_19 = arith.constant 0 : index
      %20 = vector.load %arg2[%19, %c0_18, %c0_19] : memref<64x49x512xbf16, #tpu.memory_space<vmem>>, vector<1x49x512xbf16>
      %21 = vector.shape_cast %20 : vector<1x49x512xbf16> to vector<49x512xbf16>
      %cst_20 = arith.constant dense<0.000000e+00> : vector<8x512xf32>
      %22 = tpu.matmul %18, %21, %cst_20 {dimension_numbers = #tpu.dot_dimension_numbers<[1], [0], [0], [1], [0, 0, 1, 1], [], []>} : vector<8x49xbf16>, vector<49x512xbf16>, vector<8x512xf32> -> vector<8x512xf32>
      %23 = arith.addf %15, %22 : vector<8x512xf32>
      %c0_21 = arith.constant 0 : index
      %c0_22 = arith.constant 0 : index
      %24 = vector.load %arg7[%c0_21, %c0_22] : memref<8x512xf32, #tpu.memory_space<vmem>>, vector<8x512xf32>
      tpu.vector_store %arg7[%c0_21, %c0_22], %23 {strides = array<i32>} : memref<8x512xf32, #tpu.memory_space<vmem>>, vector<8x512xf32>,
    }
    %c64_i32_1 = arith.constant 64 : i32
    %c0_2 = arith.constant 0 : index
    %c0_3 = arith.constant 0 : index
    %3 = vector.load %arg7[%c0_2, %c0_3] : memref<8x512xf32, #tpu.memory_space<vmem>>, vector<8x512xf32>
    %c0_4 = arith.constant 0 : index
    %c0_5 = arith.constant 0 : index
    %4 = vector.load %arg3[%c0_4, %c0_5] : memref<1x512xf32, #tpu.memory_space<vmem>>, vector<1x512xf32>
    %5 = vector.broadcast %4 : vector<1x512xf32> to vector<8x512xf32>
    %6 = arith.addf %3, %5 : vector<8x512xf32>
    %cst_6 = arith.constant 0.000000e+00 : f32
    %7 = vector.broadcast %cst_6 : f32 to vector<8x512xf32>
    %8 = arith.maximumf %6, %7 : vector<8x512xf32>
    %c0_7 = arith.constant 0 : index
    %c0_8 = arith.constant 0 : index
    %9 = vector.load %arg4[%c0_7, %c0_8] : memref<512x128xf32, #tpu.memory_space<vmem>>, vector<512x128xf32>
    %cst_9 = arith.constant dense<0.000000e+00> : vector<8x128xf32>
    %10 = tpu.matmul %8, %9, %cst_9 {dimension_numbers = #tpu.dot_dimension_numbers<[1], [0], [0], [1], [0, 0, 1, 1], [], []>} : vector<8x512xf32>, vector<512x128xf32>, vector<8x128xf32> -> vector<8x128xf32>
    %c0_10 = arith.constant 0 : index
    %c0_11 = arith.constant 0 : index
    %11 = vector.load %arg5[%c0_10, %c0_11] : memref<1x128xf32, #tpu.memory_space<vmem>>, vector<1x128xf32>
    %12 = vector.broadcast %11 : vector<1x128xf32> to vector<8x128xf32>
    %13 = arith.addf %10, %12 : vector<8x128xf32>
    %c0_12 = arith.constant 0 : index
    %c0_13 = arith.constant 0 : index
    %14 = vector.load %arg6[%c0_12, %c0_13] : memref<8x128xf32, #tpu.memory_space<vmem>>, vector<8x128xf32>
    tpu.vector_store %arg6[%c0_12, %c0_13], %13 {strides = array<i32>} : memref<8x128xf32, #tpu.memory_space<vmem>>, vector<8x128xf32>,
    return
  }
  func.func @transform_0(%arg0: i32) -> (i32, i32, i32) {
    %c0_i32 = arith.constant 0 : i32
    %c0_i32_0 = arith.constant 0 : i32
    %c0_i32_1 = arith.constant 0 : i32
    return %c0_i32, %arg0, %c0_i32_0 : i32, i32, i32
  }
  func.func @transform_1(%arg0: i32) -> (i32, i32, i32) {
    %c0_i32 = arith.constant 0 : i32
    %c0_i32_0 = arith.constant 0 : i32
    %c0_i32_1 = arith.constant 0 : i32
    %c0_i32_2 = arith.constant 0 : i32
    return %c0_i32, %c0_i32_0, %c0_i32_1 : i32, i32, i32
  }
  func.func @transform_2(%arg0: i32) -> (i32, i32) {
    %c0_i32 = arith.constant 0 : i32
    %c0_i32_0 = arith.constant 0 : i32
    %c0_i32_1 = arith.constant 0 : i32
    return %c0_i32, %c0_i32_0 : i32, i32
  }
  func.func @transform_3(%arg0: i32) -> (i32, i32) {
    %c0_i32 = arith.constant 0 : i32
    %c0_i32_0 = arith.constant 0 : i32
    %c0_i32_1 = arith.constant 0 : i32
    return %c0_i32, %c0_i32_0 : i32, i32
  }
  func.func @transform_4(%arg0: i32) -> (i32, i32) {
    %c0_i32 = arith.constant 0 : i32
    %c0_i32_0 = arith.constant 0 : i32
    %c0_i32_1 = arith.constant 0 : i32
    return %c0_i32, %c0_i32_0 : i32, i32
  }
  func.func @transform_5(%arg0: i32) -> (i32, i32) {
    %c0_i32 = arith.constant 0 : i32
    %c0_i32_0 = arith.constant 0 : i32
    return %arg0, %c0_i32 : i32, i32
  }
}

</mosaic_0001>

<bundles_post_ra>
// kernel: dqn_forward.4
= control target key start
LH: loop header
LB: loop body
LE: loop exit
PB: predicated region body
PF: predicated region fallthrough
CT: control target
= control target key end

     0   :  { %s739_s9 = smov 0   ;;  %s741_s10 = smov 0   ;;  %s935_s0 = inlined_call_operand.vmem [shape: bf16[32,256], index: 0, kind: input, shape index: {}]   ;;  %s936_s1 = inlined_call_operand.vmem [shape: u8[256,1024], index: 1, kind: input, shape index: {}]   ;;  %s937_s2 = inlined_call_operand.vmem [shape: bf16[32,1024], index: 2, kind: output, shape index: {}]  }
   0x1   :  { %s743_s11 = smov 0  }
   0x2 LB: > { %s633_s12 = sadd.s32 4294967295, %s722_s11   ;;  %s756_s13 = sadd.s32 1, %s722_s11   ;;  %s722_s11 = sphi %s743_s11, %s941_s11   ;;  %s718_s10 = sphi %s741_s10, %s940_s10   ;;  %s714_s9 = sphi %s739_s9, %s939_s9  }
   0x3   : > { %s37_s14 = ssub.s32 %s722_s11, %s756_s13  ;;  %s40_s15 = sadd.s32 1, %s718_s10 }
   0x4   : > { %p38_p0 = scmp.eq.s32.totalorder %s37_s14, 0  ;;  %p47_p1 = scmp.ne.s32.totalorder %s718_s10, %s714_s9 }
   0x5   : > { %p48_p2 = scmp.eq.s32.totalorder %s722_s11, 0  ;;  %p77_p3 = scmp.eq.s32.totalorder %s633_s12, 1 }
   0x6   : > { %s767_s16 = scalar_select %p38_p0, %s718_s10, %s40_s15  }
   0x7   : > { %p49_p4 = por %p48_p2, %p47_p1  ;;  %p769_p5 = por %p77_p3, %p47_p1 }
   0x8   : > { %p636_p6 = scmp.ge.s32.totalorder %s722_s11, 2 }
   0xa   : > { %102 = sbr.rel (%p636_p6) target bundleno = 35 (0x23), region = 20 }
   0xf   : > { %105 = sbr.rel (!%p49_p4) target bundleno = 35 (0x23), region = 24  ;;  %s107_s18 = sand.u32 (%p49_p4), 1, %s718_s10  }
  0x10   : > { %s660_s19 = sshll.u32 (%p49_p4), %s722_s11, 5  ;;  %s637_s20 = sshll.u32 (%p49_p4), %s107_s18, 8 }
  0x11   : > { %s779_s23 = scalar_lea.vmem (%p49_p4), %s936_s1, %s660_s19  ;;  %s784_s24 = scalar_lea.vmem (%p49_p4), [#allocation2], %s637_s20 }
  0x12   : > { %v125_v0 = vld [vmem:[%s779_s23] sm:$0xff] (%p49_p4)  ;;  %v127_v1 = vld [vmem:[%s779_s23 + $0x8] sm:$0xff] (%p49_p4)  ;;  %v129_v2 = vld [vmem:[%s779_s23 + $0x10] sm:$0xff] (%p49_p4) }
  0x13   : > { %126 = vst [vmem:[%s784_s24] sm:$0xff] (%p49_p4), %v125_v0  ;;  %128 = vst [vmem:[%s784_s24 + $0x8] sm:$0xff] (%p49_p4), %v127_v1  ;;  %v131_v3 = vld [vmem:[%s779_s23 + $0x18] sm:$0xff] (%p49_p4)  ;;  %v133_v4 = vld [vmem:[%s779_s23 + $0x40] sm:$0xff] (%p49_p4) }
  0x14   : > { %130 = vst [vmem:[%s784_s24 + $0x10] sm:$0xff] %v129_v2  ;;  %v135_v5 = vld [vmem:[%s779_s23 + $0x48] sm:$0xff]  ;;  %132 = vst [vmem:[%s784_s24 + $0x18] sm:$0xff] %v131_v3  ;;  %v137_v6 = vld [vmem:[%s779_s23 + $0x50] sm:$0xff] }
  0x15   : > { %134 = vst [vmem:[%s784_s24 + $0x20] sm:$0xff] %v133_v4  ;;  %136 = vst [vmem:[%s784_s24 + $0x28] sm:$0xff] %v135_v5  ;;  %v139_v7 = vld [vmem:[%s779_s23 + $0x58] sm:$0xff]  ;;  %v141_v8 = vld [vmem:[%s779_s23 + $0x80] sm:$0xff] }
  0x16   : > { %138 = vst [vmem:[%s784_s24 + $0x30] sm:$0xff] %v137_v6  ;;  %140 = vst [vmem:[%s784_s24 + $0x38] sm:$0xff] %v139_v7  ;;  %v143_v9 = vld [vmem:[%s779_s23 + $0x88] sm:$0xff]  ;;  %v145_v10 = vld [vmem:[%s779_s23 + $0x90] sm:$0xff] }
  0x17   : > { %142 = vst [vmem:[%s784_s24 + $0x40] sm:$0xff] %v141_v8  ;;  %v147_v11 = vld [vmem:[%s779_s23 + $0x98] sm:$0xff]  ;;  %144 = vst [vmem:[%s784_s24 + $0x48] sm:$0xff] %v143_v9  ;;  %v149_v12 = vld [vmem:[%s779_s23 + $0xc0] sm:$0xff] }
  0x18   : > { %146 = vst [vmem:[%s784_s24 + $0x50] sm:$0xff] %v145_v10  ;;  %148 = vst [vmem:[%s784_s24 + $0x58] sm:$0xff] %v147_v11  ;;  %v151_v13 = vld [vmem:[%s779_s23 + $0xc8] sm:$0xff]  ;;  %v153_v14 = vld [vmem:[%s779_s23 + $0xd0] sm:$0xff] }
  0x19   : > { %150 = vst [vmem:[%s784_s24 + $0x60] sm:$0xff] %v149_v12  ;;  %152 = vst [vmem:[%s784_s24 + $0x68] sm:$0xff] %v151_v13  ;;  %v155_v15 = vld [vmem:[%s779_s23 + $0xd8] sm:$0xff]  ;;  %v157_v16 = vld [vmem:[%s779_s23 + $0x100] sm:$0xff] }
  0x1a   : > { %154 = vst [vmem:[%s784_s24 + $0x70] sm:$0xff] %v153_v14  ;;  %v159_v17 = vld [vmem:[%s779_s23 + $0x108] sm:$0xff]  ;;  %156 = vst [vmem:[%s784_s24 + $0x78] sm:$0xff] %v155_v15  ;;  %v161_v18 = vld [vmem:[%s779_s23 + $0x110] sm:$0xff] }
  0x1b   : > { %158 = vst [vmem:[%s784_s24 + $0x80] sm:$0xff] %v157_v16  ;;  %160 = vst [vmem:[%s784_s24 + $0x88] sm:$0xff] %v159_v17  ;;  %v163_v19 = vld [vmem:[%s779_s23 + $0x118] sm:$0xff]  ;;  %v165_v20 = vld [vmem:[%s779_s23 + $0x140] sm:$0xff] }
  0x1c   : > { %162 = vst [vmem:[%s784_s24 + $0x90] sm:$0xff] %v161_v18  ;;  %164 = vst [vmem:[%s784_s24 + $0x98] sm:$0xff] %v163_v19  ;;  %v167_v21 = vld [vmem:[%s779_s23 + $0x148] sm:$0xff]  ;;  %v169_v22 = vld [vmem:[%s779_s23 + $0x150] sm:$0xff] }
  0x1d   : > { %166 = vst [vmem:[%s784_s24 + $0xa0] sm:$0xff] %v165_v20  ;;  %v171_v23 = vld [vmem:[%s779_s23 + $0x158] sm:$0xff]  ;;  %168 = vst [vmem:[%s784_s24 + $0xa8] sm:$0xff] %v167_v21  ;;  %v173_v24 = vld [vmem:[%s779_s23 + $0x180] sm:$0xff] }
  0x1e   : > { %170 = vst [vmem:[%s784_s24 + $0xb0] sm:$0xff] %v169_v22  ;;  %172 = vst [vmem:[%s784_s24 + $0xb8] sm:$0xff] %v171_v23  ;;  %v175_v25 = vld [vmem:[%s779_s23 + $0x188] sm:$0xff]  ;;  %v177_v26 = vld [vmem:[%s779_s23 + $0x190] sm:$0xff] }
  0x1f   : > { %174 = vst [vmem:[%s784_s24 + $0xc0] sm:$0xff] %v173_v24  ;;  %176 = vst [vmem:[%s784_s24 + $0xc8] sm:$0xff] %v175_v25  ;;  %v179_v27 = vld [vmem:[%s779_s23 + $0x198] sm:$0xff]  ;;  %v181_v28 = vld [vmem:[%s779_s23 + $0x1c0] sm:$0xff] }
  0x20   : > { %178 = vst [vmem:[%s784_s24 + $0xd0] sm:$0xff] %v177_v26  ;;  %v183_v29 = vld [vmem:[%s779_s23 + $0x1c8] sm:$0xff]  ;;  %180 = vst [vmem:[%s784_s24 + $0xd8] sm:$0xff] %v179_v27  ;;  %v185_v30 = vld [vmem:[%s779_s23 + $0x1d0] sm:$0xff] }
  0x21   : > { %182 = vst [vmem:[%s784_s24 + $0xe0] sm:$0xff] %v181_v28  ;;  %184 = vst [vmem:[%s784_s24 + $0xe8] sm:$0xff] %v183_v29  ;;  %v187_v31 = vld [vmem:[%s779_s23 + $0x1d8] sm:$0xff] }
  0x22   : > { %186 = vst [vmem:[%s784_s24 + $0xf0] sm:$0xff] %v185_v30  ;;  %188 = vst [vmem:[%s784_s24 + $0xf8] sm:$0xff] %v187_v31 }
  0x23 PF: > { %p640_p7 = scmp.ge.s32.totalorder %s722_s11, 1  ;;  %p193_p8 = scmp.lt.s32.totalorder %s722_s11, 3 }
  0x25   : > { %p194_p9 = pnand %p640_p7, %p193_p8 }
  0x26   : > { %s200_s25 = sand.u32 (!%p194_p9), 1, %s714_s9  }
  0x27   : > { %197 = sbr.rel (%p194_p9) target bundleno = 334 (0x14e), region = 47  ;;  %s641_s26 = sshll.u32 (!%p194_p9), %s200_s25, 8 }
  0x28   : > { %s855_s29 = scalar_lea.vmem (!%p194_p9), [#allocation2], %s641_s26  ;;  %s642_s8 = sshll.u32 (!%p194_p9), %s200_s25, 6 }
  0x29   : > { %s900_s9 = scalar_lea.vmem (!%p194_p9), [#allocation3], %s642_s8 }
  0x2c   : > { %v696_v32 = vld [vmem:[%s935_s0 + $0x4] ss:$8 sps:$4 sm:$0xff]   ;;  %v237_v34 = vld [vmem:[%s855_s29 + $0x78] sm:$0xff]  ;;  %v236_v40 = vld [vmem:[%s855_s29 + $0x70] sm:$0xff]  ;;  %s669_s14 = sshll.u32 (%p769_p5), %s633_s12, 4 }
  0x2d   : > { %v235_v33 = vld [vmem:[%s855_s29 + $0x68] sm:$0xff]  ;;  %v234_v35 = vld [vmem:[%s855_s29 + $0x60] sm:$0xff]  ;;  %374 = vmatprep.mubr.bf16.mxu0 %v696_v32  ;;  %427 = vmatprep.mubr.bf16.mxu1 %v696_v32  ;;  %v281_v38 = vunpack.c.l.u8.bf16 %v237_v34  ;;  %v285_v39 = vunpack.c.h.u8.bf16 %v237_v34  ;;  %v284_v42 = vunpack.c.h.u8.bf16 %v236_v40  ;;  %v233_v44 = vld [vmem:[%s855_s29 + $0x58] sm:$0xff]  ;;  %v280_v46 = vunpack.c.l.u8.bf16 %v236_v40  ;;  %s545_s19 = scalar_lea.vmem (%p769_p5), %s937_s2, %s669_s14 }
  0x2e   : > { %v279_v36 = vunpack.c.l.u8.bf16 %v235_v33  ;;  %v283_v37 = vunpack.c.h.u8.bf16 %v235_v33  ;;  %v282_v41 = vunpack.c.h.u8.bf16 %v234_v35  ;;  %v231_v43 = vld [vmem:[%s855_s29 + $0x48] sm:$0xff]  ;;  %v278_v45 = vunpack.c.l.u8.bf16 %v234_v35  ;;  %v230_v49 = vld [vmem:[%s855_s29 + $0x40] sm:$0xff]  ;;  %v232_v50 = vld [vmem:[%s855_s29 + $0x50] sm:$0xff] }
  0x2f   : > { %395 = vmatprep.subr.bf16.mxu1 %v285_v39  ;;  %v275_v47 = vunpack.c.h.u8.bf16 %v231_v43  ;;  %v277_v48 = vunpack.c.h.u8.bf16 %v233_v44  ;;  %v274_v51 = vunpack.c.h.u8.bf16 %v230_v49  ;;  %v276_v52 = vunpack.c.h.u8.bf16 %v232_v50  ;;  %v227_v55 = vld [vmem:[%s855_s29 + $0x28] sm:$0xff]  ;;  %v229_v56 = vld [vmem:[%s855_s29 + $0x38] sm:$0xff]  ;;  %v226_v61 = vld [vmem:[%s855_s29 + $0x20] sm:$0xff] }
  0x30   : > { %342 = vmatprep.subr.bf16.mxu0 %v283_v37  ;;  %396 = vmatpush1.bf16.msra.mxu1 %v284_v42  ;;  %v271_v53 = vunpack.c.l.u8.bf16 %v231_v43  ;;  %v273_v54 = vunpack.c.l.u8.bf16 %v233_v44  ;;  %v270_v57 = vunpack.c.l.u8.bf16 %v230_v49  ;;  %v272_v58 = vunpack.c.l.u8.bf16 %v232_v50  ;;  %v228_v62 = vld [vmem:[%s855_s29 + $0x30] sm:$0xff]  ;;  %v223_v3 = vld [vmem:[%s855_s29 + $0x8] sm:$0xff]  ;;  %v225_v4 = vld [vmem:[%s855_s29 + $0x18] sm:$0xff] }
  0x31   : > { %343 = vmatpush1.bf16.msra.mxu0 %v282_v41  ;;  %397 = vmatprep.subr.bf16.mxu1 %v281_v38  ;;  %v267_v59 = vunpack.c.h.u8.bf16 %v227_v55  ;;  %v269_v60 = vunpack.c.h.u8.bf16 %v229_v56  ;;  %v266_v63 = vunpack.c.h.u8.bf16 %v226_v61  ;;  %v268_v0 = vunpack.c.h.u8.bf16 %v228_v62  ;;  %v222_v9 = vld [vmem:[%s855_s29] sm:$0xff]  ;;  %v224_v10 = vld [vmem:[%s855_s29 + $0x10] sm:$0xff]  ;;  %v251_v15 = vld [vmem:[%s855_s29 + $0xe8] sm:$0xff] }
  0x32   : > { %344 = vmatprep.subr.bf16.mxu0 %v279_v36  ;;  %v263_v1 = vunpack.c.l.u8.bf16 %v227_v55  ;;  %v265_v2 = vunpack.c.l.u8.bf16 %v229_v56  ;;  %v262_v5 = vunpack.c.l.u8.bf16 %v226_v61  ;;  %v264_v6 = vunpack.c.l.u8.bf16 %v228_v62  ;;  %v253_v16 = vld [vmem:[%s855_s29 + $0xf8] sm:$0xff]  ;;  %v250_v21 = vld [vmem:[%s855_s29 + $0xe0] sm:$0xff]  ;;  %v252_v22 = vld [vmem:[%s855_s29 + $0xf0] sm:$0xff] }
  0x33   : > { %v259_v7 = vunpack.c.h.u8.bf16 %v223_v3  ;;  %v261_v8 = vunpack.c.h.u8.bf16 %v225_v4  ;;  %v258_v11 = vunpack.c.h.u8.bf16 %v222_v9  ;;  %v260_v12 = vunpack.c.h.u8.bf16 %v224_v10  ;;  %v247_v27 = vld [vmem:[%s855_s29 + $0xc8] sm:$0xff]  ;;  %v249_v28 = vld [vmem:[%s855_s29 + $0xd8] sm:$0xff]  ;;  %v246_v33 = vld [vmem:[%s855_s29 + $0xc0] sm:$0xff] }
  0x34   : > { %398 = vmatpush1.bf16.msra.mxu1 %v280_v46  ;;  %v255_v13 = vunpack.c.l.u8.bf16 %v223_v3  ;;  %v257_v14 = vunpack.c.l.u8.bf16 %v225_v4  ;;  %v254_v17 = vunpack.c.l.u8.bf16 %v222_v9  ;;  %v256_v18 = vunpack.c.l.u8.bf16 %v224_v10  ;;  %v248_v34 = vld [vmem:[%s855_s29 + $0xd0] sm:$0xff]  ;;  %v243_v39 = vld [vmem:[%s855_s29 + $0xa8] sm:$0xff]  ;;  %v245_v40 = vld [vmem:[%s855_s29 + $0xb8] sm:$0xff] }
  0x35   : > { %345 = vmatpush1.bf16.msra.mxu0 %v278_v45  ;;  %399 = vmatprep.subr.bf16.mxu1 %v277_v48  ;;  %v315_v19 = vunpack.c.h.u8.bf16 %v251_v15  ;;  %v317_v20 = vunpack.c.h.u8.bf16 %v253_v16  ;;  %v314_v23 = vunpack.c.h.u8.bf16 %v250_v21  ;;  %v316_v24 = vunpack.c.h.u8.bf16 %v252_v22  ;;  %v242_v45 = vld [vmem:[%s855_s29 + $0xa0] sm:$0xff]  ;;  %v244_v46 = vld [vmem:[%s855_s29 + $0xb0] sm:$0xff] }
  0x36   : > { %346 = vmatprep.subr.bf16.mxu0 %v275_v47  ;;  %v311_v25 = vunpack.c.l.u8.bf16 %v251_v15  ;;  %v313_v26 = vunpack.c.l.u8.bf16 %v253_v16  ;;  %v310_v29 = vunpack.c.l.u8.bf16 %v250_v21  ;;  %v312_v30 = vunpack.c.l.u8.bf16 %v252_v22  ;;  %v699_v3 = vld [vmem:[%s935_s0 + $0x10] ss:$8 sps:$4 sm:$0xff]  }
  0x37   : > { %v307_v31 = vunpack.c.h.u8.bf16 %v247_v27  ;;  %v309_v32 = vunpack.c.h.u8.bf16 %v249_v28  ;;  %v306_v35 = vunpack.c.h.u8.bf16 %v246_v33  ;;  %v308_v36 = vunpack.c.h.u8.bf16 %v248_v34 }
  0x38   : > { %400 = vmatpush1.bf16.msra.mxu1 %v276_v52  ;;  %v303_v37 = vunpack.c.l.u8.bf16 %v247_v27  ;;  %v305_v38 = vunpack.c.l.u8.bf16 %v249_v28  ;;  %v302_v41 = vunpack.c.l.u8.bf16 %v246_v33  ;;  %v304_v42 = vunpack.c.l.u8.bf16 %v248_v34  ;;  %v241_v52 = vld [vmem:[%s855_s29 + $0x98] sm:$0xff] }
  0x39   : > { %347 = vmatpush1.bf16.msra.mxu0 %v274_v51  ;;  %401 = vmatprep.subr.bf16.mxu1 %v273_v54  ;;  %v299_v43 = vunpack.c.h.u8.bf16 %v243_v39  ;;  %v301_v44 = vunpack.c.h.u8.bf16 %v245_v40  ;;  %v298_v47 = vunpack.c.h.u8.bf16 %v242_v45  ;;  %v300_v48 = vunpack.c.h.u8.bf16 %v244_v46  ;;  %v239_v51 = vld [vmem:[%s855_s29 + $0x88] sm:$0xff] }
  0x3a   : > { %348 = vmatprep.subr.bf16.mxu0 %v271_v53  ;;  %v295_v49 = vunpack.c.l.u8.bf16 %v243_v39  ;;  %v297_v50 = vunpack.c.l.u8.bf16 %v245_v40  ;;  %v294_v53 = vunpack.c.l.u8.bf16 %v242_v45  ;;  %v296_v54 = vunpack.c.l.u8.bf16 %v244_v46 }
  0x3b   : > { %v291_v55 = vunpack.c.h.u8.bf16 %v239_v51  ;;  %v293_v56 = vunpack.c.h.u8.bf16 %v241_v52  ;;  %v287_v61 = vunpack.c.l.u8.bf16 %v239_v51  ;;  %v289_v62 = vunpack.c.l.u8.bf16 %v241_v52 }
  0x3c   : > { %402 = vmatpush1.bf16.msra.mxu1 %v272_v58  ;;  %v240_v58 = vld [vmem:[%s855_s29 + $0x90] sm:$0xff] }
  0x3d   : > { %349 = vmatpush1.bf16.msra.mxu0 %v270_v57  ;;  %403 = vmatprep.subr.bf16.mxu1 %v269_v60  ;;  %v238_v57 = vld [vmem:[%s855_s29 + $0x80] sm:$0xff]  ;;  %v292_v60 = vunpack.c.h.u8.bf16 %v240_v58 }
  0x3e   : > { %350 = vmatprep.subr.bf16.mxu0 %v267_v59  ;;  %v290_v59 = vunpack.c.h.u8.bf16 %v238_v57 }
  0x40   : > { %404 = vmatpush1.bf16.msra.mxu1 %v268_v0  ;;  %v288_v0 = vunpack.c.l.u8.bf16 %v240_v58 }
  0x41   : > { %351 = vmatpush1.bf16.msra.mxu0 %v266_v63  ;;  %405 = vmatprep.subr.bf16.mxu1 %v265_v2  ;;  %v286_v63 = vunpack.c.l.u8.bf16 %v238_v57  ;;  %v697_v2 = vld [vmem:[%s935_s0 + $0x14] ss:$8 sps:$4 sm:$0xff]  }
  0x42   : > { %352 = vmatprep.subr.bf16.mxu0 %v263_v1  ;;  %v694_v1 = vld [vmem:[%s935_s0] ss:$8 sps:$4 sm:$0xff]  }
  0x44   : > { %406 = vmatpush1.bf16.msra.mxu1 %v264_v6 }
  0x45   : > { %353 = vmatpush1.bf16.msra.mxu0 %v262_v5  ;;  %407 = vmatprep.subr.bf16.mxu1 %v261_v8 }
  0x46   : > { %354 = vmatprep.subr.bf16.mxu0 %v259_v7 }
  0x48   : > { %408 = vmatpush1.bf16.msra.mxu1 %v260_v12 }
  0x49   : > { %355 = vmatpush1.bf16.msra.mxu0 %v258_v11  ;;  %409 = vmatprep.subr.bf16.mxu1 %v257_v14 }
  0x4a   : > { %356 = vmatprep.subr.bf16.mxu0 %v255_v13 }
  0x4c   : > { %410 = vmatpush1.bf16.msra.mxu1 %v256_v18 }
  0x4d   : > { %357 = vmatpush1.bf16.msra.mxu0 %v254_v17  ;;  %411 = vmatprep.subr.bf16.mxu1 %v317_v20 }
  0x4e   : > { %358 = vmatprep.subr.bf16.mxu0 %v315_v19 }
  0x50   : > { %412 = vmatpush2.bf16.msra.mxu1 %v316_v24 }
  0x51   : > { %359 = vmatpush2.bf16.msra.mxu0 %v314_v23  ;;  %413 = vmatprep.subr.bf16.mxu1 %v313_v26 }
  0x52   : > { %360 = vmatprep.subr.bf16.mxu0 %v311_v25 }
  0x54   : > { %414 = vmatpush2.bf16.msra.mxu1 %v312_v30 }
  0x55   : > { %361 = vmatpush2.bf16.msra.mxu0 %v310_v29  ;;  %415 = vmatprep.subr.bf16.mxu1 %v309_v32 }
  0x56   : > { %362 = vmatprep.subr.bf16.mxu0 %v307_v31 }
  0x58   : > { %416 = vmatpush2.bf16.msra.mxu1 %v308_v36 }
  0x59   : > { %363 = vmatpush2.bf16.msra.mxu0 %v306_v35  ;;  %417 = vmatprep.subr.bf16.mxu1 %v305_v38 }
  0x5a   : > { %364 = vmatprep.subr.bf16.mxu0 %v303_v37 }
  0x5c   : > { %418 = vmatpush2.bf16.msra.mxu1 %v304_v42 }
  0x5d   : > { %365 = vmatpush2.bf16.msra.mxu0 %v302_v41  ;;  %419 = vmatprep.subr.bf16.mxu1 %v301_v44 }
  0x5e   : > { %366 = vmatprep.subr.bf16.mxu0 %v299_v43 }
  0x60   : > { %420 = vmatpush2.bf16.msra.mxu1 %v300_v48 }
  0x61   : > { %367 = vmatpush2.bf16.msra.mxu0 %v298_v47  ;;  %421 = vmatprep.subr.bf16.mxu1 %v297_v50 }
  0x62   : > { %368 = vmatprep.subr.bf16.mxu0 %v295_v49 }
  0x64   : > { %422 = vmatpush2.bf16.msra.mxu1 %v296_v54 }
  0x65   : > { %369 = vmatpush2.bf16.msra.mxu0 %v294_v53  ;;  %423 = vmatprep.subr.bf16.mxu1 %v293_v56 }
  0x66   : > { %370 = vmatprep.subr.bf16.mxu0 %v291_v55 }
  0x68   : > { %424 = vmatpush2.bf16.msra.mxu1 %v292_v60 }
  0x69   : > { %371 = vmatpush2.bf16.msra.mxu0 %v290_v59  ;;  %425 = vmatprep.subr.bf16.mxu1 %v289_v62 }
  0x6a   : > { %372 = vmatprep.subr.bf16.mxu0 %v287_v61 }
  0x6c   : > { %426 = vmatpush2.bf16.msra.mxu1 %v288_v0 }
  0x6d   : > { %373 = vmatpush2.bf16.msra.mxu0 %v286_v63 }
  0x6f   : > { %428 = vmatmul.mubr.bf16.vlgmr.msra.gmra.mxu1 %v694_v1 }
  0x70   : > { %375 = vmatmul.mubr.bf16.vlgmr.msra.gmra.mxu0 %v694_v1  ;;  %437 = vmatprep.mubr.bf16.mxu1 %v697_v2 }
  0x71   : > { %384 = vmatprep.mubr.bf16.mxu0 %v697_v2 }
  0x77   : > { %438 = vmatmul.mubr.bf16.gmra.mxu1 %v699_v3 }
  0x78   : > { %385 = vmatmul.mubr.bf16.gmra.mxu0 %v699_v3 }
 0x12f   : > { %v429_v5 = vpop.f32.mrf.mxu1 }
 0x130   : > { %v376_v4 = vpop.f32.mrf.mxu0  ;;  %v450_v7 = vmul.f32 0.003921569, %v429_v5 }
 0x131   : > { %v448_v6 = vmul.f32 0.003921569, %v376_v4  ;;  %v431_v9 = vpop.f32.mrf.mxu1 }
 0x132   : > { %v378_v8 = vpop.f32.mrf.mxu0  ;;  %v451_v11 = vmul.f32 0.003921569, %v431_v9  ;;  %v466_v15 = vmax.f32 %v450_v7, 0.0 }
 0x133   : > { %v449_v10 = vmul.f32 0.003921569, %v378_v8  ;;  %v433_v13 = vpop.f32.mrf.mxu1  ;;  %v464_v14 = vmax.f32 %v448_v6, 0.0 }
 0x134   : > { %v380_v12 = vpop.f32.mrf.mxu0  ;;  %v467_v17 = vmax.f32 %v451_v11, 0.0  ;;  %v454_v19 = vmul.f32 0.003921569, %v433_v13 }
 0x135   : > { %v465_v16 = vmax.f32 %v449_v10, 0.0  ;;  %v452_v18 = vmul.f32 0.003921569, %v380_v12  ;;  %v435_v21 = vpop.f32.mrf.mxu1 }
 0x136   : > { %v382_v20 = vpop.f32.mrf.mxu0  ;;  %v662_v23 = vpack.c.bf16 %v467_v17, %v466_v15  ;;  %v455_v25 = vmul.f32 0.003921569, %v435_v21  ;;  %v470_v31 = vmax.f32 %v454_v19, 0.0 }
 0x137   : > { %v661_v22 = vpack.c.bf16 %v465_v16, %v464_v14  ;;  %v453_v24 = vmul.f32 0.003921569, %v382_v20  ;;  %v439_v27 = vpop.f32.mrf.mxu1  ;;  %v468_v30 = vmax.f32 %v452_v18, 0.0 }
 0x138   : > { %v386_v26 = vpop.f32.mrf.mxu0  ;;  %529 = vst [vmem:[%s900_s9 + $0x8] sm:$0xff] %v662_v23  ;;  %v458_v29 = vmul.f32 0.003921569, %v439_v27  ;;  %v471_v33 = vmax.f32 %v455_v25, 0.0 }
 0x139   : > { %528 = vst [vmem:[%s900_s9] sm:$0xff] %v661_v22  ;;  %v456_v28 = vmul.f32 0.003921569, %v386_v26  ;;  %v469_v32 = vmax.f32 %v453_v24, 0.0  ;;  %v441_v35 = vpop.f32.mrf.mxu1 }
 0x13a   : > { %v388_v34 = vpop.f32.mrf.mxu0  ;;  %v459_v37 = vmul.f32 0.003921569, %v441_v35  ;;  %v664_v39 = vpack.c.bf16 %v471_v33, %v470_v31  ;;  %v474_v43 = vmax.f32 %v458_v29, 0.0 }
 0x13b   : > { %v457_v36 = vmul.f32 0.003921569, %v388_v34  ;;  %v663_v38 = vpack.c.bf16 %v469_v32, %v468_v30  ;;  %v443_v41 = vpop.f32.mrf.mxu1  ;;  %v472_v42 = vmax.f32 %v456_v28, 0.0 }
 0x13c   : > { %v390_v40 = vpop.f32.mrf.mxu0  ;;  %v475_v45 = vmax.f32 %v459_v37, 0.0  ;;  %531 = vst [vmem:[%s900_s9 + $0x18] sm:$0xff] %v664_v39  ;;  %v462_v47 = vmul.f32 0.003921569, %v443_v41 }
 0x13d   : > { %v473_v44 = vmax.f32 %v457_v36, 0.0  ;;  %530 = vst [vmem:[%s900_s9 + $0x10] sm:$0xff] %v663_v38  ;;  %v460_v46 = vmul.f32 0.003921569, %v390_v40  ;;  %v445_v49 = vpop.f32.mrf.mxu1 }
 0x13e   : > { %v392_v48 = vpop.f32.mrf.mxu0  ;;  %v666_v51 = vpack.c.bf16 %v475_v45, %v474_v43  ;;  %v463_v53 = vmul.f32 0.003921569, %v445_v49  ;;  %v478_v55 = vmax.f32 %v462_v47, 0.0 }
 0x13f   : > { %v665_v50 = vpack.c.bf16 %v473_v44, %v472_v42  ;;  %v461_v52 = vmul.f32 0.003921569, %v392_v48  ;;  %v476_v54 = vmax.f32 %v460_v46, 0.0  ;;  %v560_v61 = vld [vmem:[%s900_s9 + $0x8] sm:$0xff] (%p769_p5) }
 0x140   : > { %533 = vst [vmem:[%s900_s9 + $0x28] sm:$0xff] %v666_v51  ;;  %v479_v57 = vmax.f32 %v463_v53, 0.0  ;;  %v558_v60 = vld [vmem:[%s900_s9] sm:$0xff] (%p769_p5)  ;;  %561 = vst [vmem:[%s545_s19 + $0x8] sm:$0xff] (%p769_p5), %v560_v61 }
 0x141   : > { %532 = vst [vmem:[%s900_s9 + $0x20] sm:$0xff] %v665_v50  ;;  %v477_v56 = vmax.f32 %v461_v52, 0.0  ;;  %542 = sbr.rel (!%p769_p5) target bundleno = 334 (0x14e), region = 55  ;;  %559 = vst [vmem:[%s545_s19] sm:$0xff] (%p769_p5), %v558_v60 }
 0x142   : > { %v668_v59 = vpack.c.bf16 %v479_v57, %v478_v55 }
 0x143   : > { %v667_v58 = vpack.c.bf16 %v477_v56, %v476_v54  ;;  %v564_v63 = vld [vmem:[%s900_s9 + $0x18] sm:$0xff] (%p769_p5) }
 0x144   : > { %535 = vst [vmem:[%s900_s9 + $0x38] sm:$0xff] %v668_v59  ;;  %v562_v62 = vld [vmem:[%s900_s9 + $0x10] sm:$0xff] (%p769_p5)  ;;  %565 = vst [vmem:[%s545_s19 + $0x28] sm:$0xff] (%p769_p5), %v564_v63 }
 0x145   : > { %534 = vst [vmem:[%s900_s9 + $0x30] sm:$0xff] %v667_v58  ;;  %563 = vst [vmem:[%s545_s19 + $0x20] sm:$0xff] (%p769_p5), %v562_v62 }
 0x147   : > { %v568_v1 = vld [vmem:[%s900_s9 + $0x28] sm:$0xff] }
 0x148   : > { %v566_v0 = vld [vmem:[%s900_s9 + $0x20] sm:$0xff]  ;;  %569 = vst [vmem:[%s545_s19 + $0x48] sm:$0xff] %v568_v1 }
 0x149   : > { %567 = vst [vmem:[%s545_s19 + $0x40] sm:$0xff] %v566_v0 }
 0x14b   : > { %v572_v3 = vld [vmem:[%s900_s9 + $0x38] sm:$0xff] }
 0x14c   : > { %v570_v2 = vld [vmem:[%s900_s9 + $0x30] sm:$0xff]  ;;  %573 = vst [vmem:[%s545_s19 + $0x68] sm:$0xff] %v572_v3 }
 0x14d   : > { %571 = vst [vmem:[%s545_s19 + $0x60] sm:$0xff] %v570_v2 }
 0x14e PF: > { %p9_p10 = scmp.ge.s32.totalorder %s756_s13, 4   ;;  %s939_s9 = smov %s718_s10 }
 0x14f   : > { %s940_s10 = smov %s767_s16  ;;  %s941_s11 = smov %s756_s13 }
 0x150   :  { %11 = sbr.rel (!%p9_p10) target bundleno = 2 (0x2), region = 109 }

// kernel: dqn_forward.5
= control target key start
LH: loop header
LB: loop body
LE: loop exit
PB: predicated region body
PF: predicated region fallthrough
CT: control target
= control target key end

     0   :  { %s1397_s9 = smov 0   ;;  %s1399_s10 = smov 0   ;;  %s1689_s0 = inlined_call_operand.vmem [shape: bf16[64,512], index: 0, kind: input, shape index: {}]   ;;  %s1690_s1 = inlined_call_operand.vmem [shape: bf16[512,256], index: 1, kind: input, shape index: {}]   ;;  %s1691_s2 = inlined_call_operand.vmem [shape: bf16[64,256], index: 2, kind: output, shape index: {}]  }
   0x1   :  { %s1401_s11 = smov 0  }
   0x2 LB: > { %s1098_s12 = sadd.s32 4294967295, %s1380_s11   ;;  %s1414_s13 = sadd.s32 1, %s1380_s11   ;;  %s1380_s11 = sphi %s1401_s11, %s1695_s11   ;;  %s1376_s10 = sphi %s1399_s10, %s1694_s10   ;;  %s1372_s9 = sphi %s1397_s9, %s1693_s9  }
   0x3   : > { %s37_s14 = ssub.s32 %s1380_s11, %s1414_s13  ;;  %s40_s15 = sadd.s32 1, %s1376_s10 }
   0x4   : > { %p38_p0 = scmp.eq.s32.totalorder %s37_s14, 0  ;;  %p47_p1 = scmp.ne.s32.totalorder %s1376_s10, %s1372_s9 }
   0x5   : > { %p48_p2 = scmp.eq.s32.totalorder %s1380_s11, 0  ;;  %p77_p3 = scmp.eq.s32.totalorder %s1098_s12, 1 }
   0x6   : > { %s1425_s16 = scalar_select %p38_p0, %s1376_s10, %s40_s15  }
   0x7   : > { %p49_p4 = por %p48_p2, %p47_p1  ;;  %p1427_p5 = por %p77_p3, %p47_p1 }
   0x8   : > { %p1101_p6 = scmp.ge.s32.totalorder %s1380_s11, 2 }
   0xa   : > { %102 = sbr.rel (%p1101_p6) target bundleno = 61 (0x3d), region = 20 }
   0xf   : > { %105 = sbr.rel (!%p49_p4) target bundleno = 61 (0x3d), region = 24  ;;  %s107_s18 = sand.u32 (%p49_p4), 1, %s1376_s10  }
  0x10   : > { %s1103_s19 = sshll.u32 (%p49_p4), %s1380_s11, 2  ;;  %s1102_s20 = sshll.u32 (%p49_p4), %s107_s18, 8 }
  0x11   : > { %s1437_s23 = scalar_lea.vmem (%p49_p4), %s1690_s1, %s1103_s19  ;;  %s1441_s24 = scalar_lea.vmem (%p49_p4), [#allocation2], %s1102_s20 }
  0x12   : > { %v128_v0 = vld [vmem:[%s1437_s23] sm:$0xf] (%p49_p4)  ;;  %v130_v1 = vld [vmem:[%s1437_s23 + $0x8] sm:$0xf] (%p49_p4)  ;;  %v132_v2 = vld [vmem:[%s1437_s23 + $0x10] sm:$0xf] (%p49_p4) }
  0x13   : > { %129 = vst [vmem:[%s1441_s24] sm:$0xf] (%p49_p4), %v128_v0  ;;  %131 = vst [vmem:[%s1441_s24 + $0x4] sm:$0xf] (%p49_p4), %v130_v1  ;;  %v134_v3 = vld [vmem:[%s1437_s23 + $0x18] sm:$0xf] (%p49_p4) }
  0x14   : > { %v136_v4 = vld [vmem:[%s1437_s23 + $0x20] sm:$0xf]  ;;  %133 = vst [vmem:[%s1441_s24 + $0x8] sm:$0xf] %v132_v2  ;;  %135 = vst [vmem:[%s1441_s24 + $0xc] sm:$0xf] %v134_v3 }
  0x15   : > { %137 = vst [vmem:[%s1441_s24 + $0x10] sm:$0xf] %v136_v4  ;;  %v138_v5 = vld [vmem:[%s1437_s23 + $0x28] sm:$0xf]  ;;  %v140_v6 = vld [vmem:[%s1437_s23 + $0x30] sm:$0xf] }
  0x16   : > { %v142_v7 = vld [vmem:[%s1437_s23 + $0x38] sm:$0xf]  ;;  %139 = vst [vmem:[%s1441_s24 + $0x14] sm:$0xf] %v138_v5  ;;  %141 = vst [vmem:[%s1441_s24 + $0x18] sm:$0xf] %v140_v6 }
  0x17   : > { %143 = vst [vmem:[%s1441_s24 + $0x1c] sm:$0xf] %v142_v7  ;;  %v144_v8 = vld [vmem:[%s1437_s23 + $0x40] sm:$0xf]  ;;  %v146_v9 = vld [vmem:[%s1437_s23 + $0x48] sm:$0xf] }
  0x18   : > { %v148_v10 = vld [vmem:[%s1437_s23 + $0x50] sm:$0xf]  ;;  %145 = vst [vmem:[%s1441_s24 + $0x20] sm:$0xf] %v144_v8  ;;  %147 = vst [vmem:[%s1441_s24 + $0x24] sm:$0xf] %v146_v9 }
  0x19   : > { %149 = vst [vmem:[%s1441_s24 + $0x28] sm:$0xf] %v148_v10  ;;  %v150_v11 = vld [vmem:[%s1437_s23 + $0x58] sm:$0xf]  ;;  %v152_v12 = vld [vmem:[%s1437_s23 + $0x60] sm:$0xf] }
  0x1a   : > { %v154_v13 = vld [vmem:[%s1437_s23 + $0x68] sm:$0xf]  ;;  %151 = vst [vmem:[%s1441_s24 + $0x2c] sm:$0xf] %v150_v11  ;;  %153 = vst [vmem:[%s1441_s24 + $0x30] sm:$0xf] %v152_v12 }
  0x1b   : > { %155 = vst [vmem:[%s1441_s24 + $0x34] sm:$0xf] %v154_v13  ;;  %v156_v14 = vld [vmem:[%s1437_s23 + $0x70] sm:$0xf]  ;;  %v158_v15 = vld [vmem:[%s1437_s23 + $0x78] sm:$0xf] }
  0x1c   : > { %v160_v16 = vld [vmem:[%s1437_s23 + $0x80] sm:$0xf]  ;;  %157 = vst [vmem:[%s1441_s24 + $0x38] sm:$0xf] %v156_v14  ;;  %159 = vst [vmem:[%s1441_s24 + $0x3c] sm:$0xf] %v158_v15 }
  0x1d   : > { %161 = vst [vmem:[%s1441_s24 + $0x40] sm:$0xf] %v160_v16  ;;  %v162_v17 = vld [vmem:[%s1437_s23 + $0x88] sm:$0xf]  ;;  %v164_v18 = vld [vmem:[%s1437_s23 + $0x90] sm:$0xf] }
  0x1e   : > { %v166_v19 = vld [vmem:[%s1437_s23 + $0x98] sm:$0xf]  ;;  %163 = vst [vmem:[%s1441_s24 + $0x44] sm:$0xf] %v162_v17  ;;  %165 = vst [vmem:[%s1441_s24 + $0x48] sm:$0xf] %v164_v18 }
  0x1f   : > { %167 = vst [vmem:[%s1441_s24 + $0x4c] sm:$0xf] %v166_v19  ;;  %v168_v20 = vld [vmem:[%s1437_s23 + $0xa0] sm:$0xf]  ;;  %v170_v21 = vld [vmem:[%s1437_s23 + $0xa8] sm:$0xf] }
  0x20   : > { %v172_v22 = vld [vmem:[%s1437_s23 + $0xb0] sm:$0xf]  ;;  %169 = vst [vmem:[%s1441_s24 + $0x50] sm:$0xf] %v168_v20  ;;  %171 = vst [vmem:[%s1441_s24 + $0x54] sm:$0xf] %v170_v21 }
  0x21   : > { %173 = vst [vmem:[%s1441_s24 + $0x58] sm:$0xf] %v172_v22  ;;  %v174_v23 = vld [vmem:[%s1437_s23 + $0xb8] sm:$0xf]  ;;  %v176_v24 = vld [vmem:[%s1437_s23 + $0xc0] sm:$0xf] }
  0x22   : > { %v178_v25 = vld [vmem:[%s1437_s23 + $0xc8] sm:$0xf]  ;;  %175 = vst [vmem:[%s1441_s24 + $0x5c] sm:$0xf] %v174_v23  ;;  %177 = vst [vmem:[%s1441_s24 + $0x60] sm:$0xf] %v176_v24 }
  0x23   : > { %179 = vst [vmem:[%s1441_s24 + $0x64] sm:$0xf] %v178_v25  ;;  %v180_v26 = vld [vmem:[%s1437_s23 + $0xd0] sm:$0xf]  ;;  %v182_v27 = vld [vmem:[%s1437_s23 + $0xd8] sm:$0xf] }
  0x24   : > { %v184_v28 = vld [vmem:[%s1437_s23 + $0xe0] sm:$0xf]  ;;  %181 = vst [vmem:[%s1441_s24 + $0x68] sm:$0xf] %v180_v26  ;;  %183 = vst [vmem:[%s1441_s24 + $0x6c] sm:$0xf] %v182_v27 }
  0x25   : > { %185 = vst [vmem:[%s1441_s24 + $0x70] sm:$0xf] %v184_v28  ;;  %v186_v29 = vld [vmem:[%s1437_s23 + $0xe8] sm:$0xf]  ;;  %v188_v30 = vld [vmem:[%s1437_s23 + $0xf0] sm:$0xf] }
  0x26   : > { %v190_v31 = vld [vmem:[%s1437_s23 + $0xf8] sm:$0xf]  ;;  %187 = vst [vmem:[%s1441_s24 + $0x74] sm:$0xf] %v186_v29  ;;  %189 = vst [vmem:[%s1441_s24 + $0x78] sm:$0xf] %v188_v30 }
  0x27   : > { %191 = vst [vmem:[%s1441_s24 + $0x7c] sm:$0xf] %v190_v31  ;;  %v192_v32 = vld [vmem:[%s1437_s23 + $0x100] sm:$0xf]  ;;  %v194_v33 = vld [vmem:[%s1437_s23 + $0x108] sm:$0xf] }
  0x28   : > { %v196_v34 = vld [vmem:[%s1437_s23 + $0x110] sm:$0xf]  ;;  %193 = vst [vmem:[%s1441_s24 + $0x80] sm:$0xf] %v192_v32  ;;  %195 = vst [vmem:[%s1441_s24 + $0x84] sm:$0xf] %v194_v33 }
  0x29   : > { %197 = vst [vmem:[%s1441_s24 + $0x88] sm:$0xf] %v196_v34  ;;  %v198_v35 = vld [vmem:[%s1437_s23 + $0x118] sm:$0xf]  ;;  %v200_v36 = vld [vmem:[%s1437_s23 + $0x120] sm:$0xf] }
  0x2a   : > { %v202_v37 = vld [vmem:[%s1437_s23 + $0x128] sm:$0xf]  ;;  %199 = vst [vmem:[%s1441_s24 + $0x8c] sm:$0xf] %v198_v35  ;;  %201 = vst [vmem:[%s1441_s24 + $0x90] sm:$0xf] %v200_v36 }
  0x2b   : > { %203 = vst [vmem:[%s1441_s24 + $0x94] sm:$0xf] %v202_v37  ;;  %v204_v38 = vld [vmem:[%s1437_s23 + $0x130] sm:$0xf]  ;;  %v206_v39 = vld [vmem:[%s1437_s23 + $0x138] sm:$0xf] }
  0x2c   : > { %v208_v40 = vld [vmem:[%s1437_s23 + $0x140] sm:$0xf]  ;;  %205 = vst [vmem:[%s1441_s24 + $0x98] sm:$0xf] %v204_v38  ;;  %207 = vst [vmem:[%s1441_s24 + $0x9c] sm:$0xf] %v206_v39 }
  0x2d   : > { %209 = vst [vmem:[%s1441_s24 + $0xa0] sm:$0xf] %v208_v40  ;;  %v210_v41 = vld [vmem:[%s1437_s23 + $0x148] sm:$0xf]  ;;  %v212_v42 = vld [vmem:[%s1437_s23 + $0x150] sm:$0xf] }
  0x2e   : > { %v214_v43 = vld [vmem:[%s1437_s23 + $0x158] sm:$0xf]  ;;  %211 = vst [vmem:[%s1441_s24 + $0xa4] sm:$0xf] %v210_v41  ;;  %213 = vst [vmem:[%s1441_s24 + $0xa8] sm:$0xf] %v212_v42 }
  0x2f   : > { %215 = vst [vmem:[%s1441_s24 + $0xac] sm:$0xf] %v214_v43  ;;  %v216_v44 = vld [vmem:[%s1437_s23 + $0x160] sm:$0xf]  ;;  %v218_v45 = vld [vmem:[%s1437_s23 + $0x168] sm:$0xf] }
  0x30   : > { %v220_v46 = vld [vmem:[%s1437_s23 + $0x170] sm:$0xf]  ;;  %217 = vst [vmem:[%s1441_s24 + $0xb0] sm:$0xf] %v216_v44  ;;  %219 = vst [vmem:[%s1441_s24 + $0xb4] sm:$0xf] %v218_v45 }
  0x31   : > { %221 = vst [vmem:[%s1441_s24 + $0xb8] sm:$0xf] %v220_v46  ;;  %v222_v47 = vld [vmem:[%s1437_s23 + $0x178] sm:$0xf]  ;;  %v224_v48 = vld [vmem:[%s1437_s23 + $0x180] sm:$0xf] }
  0x32   : > { %v226_v49 = vld [vmem:[%s1437_s23 + $0x188] sm:$0xf]  ;;  %223 = vst [vmem:[%s1441_s24 + $0xbc] sm:$0xf] %v222_v47  ;;  %225 = vst [vmem:[%s1441_s24 + $0xc0] sm:$0xf] %v224_v48 }
  0x33   : > { %227 = vst [vmem:[%s1441_s24 + $0xc4] sm:$0xf] %v226_v49  ;;  %v228_v50 = vld [vmem:[%s1437_s23 + $0x190] sm:$0xf]  ;;  %v230_v51 = vld [vmem:[%s1437_s23 + $0x198] sm:$0xf] }
  0x34   : > { %v232_v52 = vld [vmem:[%s1437_s23 + $0x1a0] sm:$0xf]  ;;  %229 = vst [vmem:[%s1441_s24 + $0xc8] sm:$0xf] %v228_v50  ;;  %231 = vst [vmem:[%s1441_s24 + $0xcc] sm:$0xf] %v230_v51 }
  0x35   : > { %233 = vst [vmem:[%s1441_s24 + $0xd0] sm:$0xf] %v232_v52  ;;  %v234_v53 = vld [vmem:[%s1437_s23 + $0x1a8] sm:$0xf]  ;;  %v236_v54 = vld [vmem:[%s1437_s23 + $0x1b0] sm:$0xf] }
  0x36   : > { %v238_v55 = vld [vmem:[%s1437_s23 + $0x1b8] sm:$0xf]  ;;  %235 = vst [vmem:[%s1441_s24 + $0xd4] sm:$0xf] %v234_v53  ;;  %237 = vst [vmem:[%s1441_s24 + $0xd8] sm:$0xf] %v236_v54 }
  0x37   : > { %239 = vst [vmem:[%s1441_s24 + $0xdc] sm:$0xf] %v238_v55  ;;  %v240_v56 = vld [vmem:[%s1437_s23 + $0x1c0] sm:$0xf]  ;;  %v242_v57 = vld [vmem:[%s1437_s23 + $0x1c8] sm:$0xf] }
  0x38   : > { %v244_v58 = vld [vmem:[%s1437_s23 + $0x1d0] sm:$0xf]  ;;  %241 = vst [vmem:[%s1441_s24 + $0xe0] sm:$0xf] %v240_v56  ;;  %243 = vst [vmem:[%s1441_s24 + $0xe4] sm:$0xf] %v242_v57 }
  0x39   : > { %245 = vst [vmem:[%s1441_s24 + $0xe8] sm:$0xf] %v244_v58  ;;  %v246_v59 = vld [vmem:[%s1437_s23 + $0x1d8] sm:$0xf]  ;;  %v248_v60 = vld [vmem:[%s1437_s23 + $0x1e0] sm:$0xf] }
  0x3a   : > { %v250_v61 = vld [vmem:[%s1437_s23 + $0x1e8] sm:$0xf]  ;;  %247 = vst [vmem:[%s1441_s24 + $0xec] sm:$0xf] %v246_v59  ;;  %249 = vst [vmem:[%s1441_s24 + $0xf0] sm:$0xf] %v248_v60 }
  0x3b   : > { %251 = vst [vmem:[%s1441_s24 + $0xf4] sm:$0xf] %v250_v61  ;;  %v252_v62 = vld [vmem:[%s1437_s23 + $0x1f0] sm:$0xf]  ;;  %v254_v63 = vld [vmem:[%s1437_s23 + $0x1f8] sm:$0xf] }
  0x3c   : > { %253 = vst [vmem:[%s1441_s24 + $0xf8] sm:$0xf] %v252_v62  ;;  %255 = vst [vmem:[%s1441_s24 + $0xfc] sm:$0xf] %v254_v63 }
  0x3d PF: > { %p1104_p7 = scmp.ge.s32.totalorder %s1380_s11, 1  ;;  %p406_p8 = scmp.lt.s32.totalorder %s1380_s11, 3 }
  0x3f   : > { %p407_p9 = pnand %p1104_p7, %p406_p8 }
  0x40   : > { %s413_s25 = sand.u32 (!%p407_p9), 1, %s1372_s9  }
  0x41   : > { %410 = sbr.rel (%p407_p9) target bundleno = 346 (0x15a), region = 65  ;;  %s1105_s26 = sshll.u32 (!%p407_p9), %s413_s25, 8 }
  0x42   : > { %s1580_s3 = scalar_lea.vmem (!%p407_p9), [#allocation2], %s1105_s26  ;;  %s1106_s19 = sshll.u32 (!%p407_p9), %s413_s25, 5 }
  0x43   : > { %s1658_s20 = scalar_lea.vmem (!%p407_p9), [#allocation3], %s1106_s19 }
  0x46   : > { %v1336_v0 = vld [vmem:[%s1689_s0 + $0x4] ss:$16 sps:$4 sm:$0xff]   ;;  %v1339_v1 = vld [vmem:[%s1689_s0 + $0xc] ss:$16 sps:$4 sm:$0xff]   ;;  %v1334_v32 = vld [vmem:[%s1689_s0] ss:$16 sps:$4 sm:$0xff]  }
  0x47   : > { %v1302_v2 = vld [vmem:[%s1580_s3 + $0x78] sm:$0xff]   ;;  %818 = vmatprep.mubr.bf16.mxu0 %v1336_v0  ;;  %883 = vmatprep.mubr.bf16.mxu1 %v1339_v1  ;;  %v1306_v6 = vld [vmem:[%s1580_s3 + $0x70] sm:$0xff]   ;;  %v1310_v10 = vld [vmem:[%s1580_s3 + $0x68] sm:$0xff]   ;;  %s1164_s9 = sshll.u32 (%p1427_p5), %s1098_s12, 2 }
  0x48   : > { %v1303_v3 = vld [vmem:[%s1580_s3 + $0xf8] sm:$0xff]   ;;  %1198 = vmatprep.subr.bf16.mxu0 %v1302_v2  ;;  %v1307_v7 = vld [vmem:[%s1580_s3 + $0xf0] sm:$0xff]   ;;  %v1311_v11 = vld [vmem:[%s1580_s3 + $0xe8] sm:$0xff]   ;;  %s972_s22 = scalar_lea.vmem (%p1427_p5), %s1691_s2, %s1164_s9 }
  0x49   : > { %v1304_v4 = vld [vmem:[%s1580_s3 + $0x38] sm:$0xff]   ;;  %1238 = vmatprep.subr.bf16.mxu1 %v1303_v3  ;;  %v1308_v8 = vld [vmem:[%s1580_s3 + $0x30] sm:$0xff]   ;;  %v1312_v12 = vld [vmem:[%s1580_s3 + $0x28] sm:$0xff]  }
  0x4a   : > { %v1305_v5 = vld [vmem:[%s1580_s3 + $0xb8] sm:$0xff]   ;;  %1199 = vmatpush3.bf16.msra.mxu0 %v1304_v4  ;;  %v1309_v9 = vld [vmem:[%s1580_s3 + $0xb0] sm:$0xff]   ;;  %v1313_v13 = vld [vmem:[%s1580_s3 + $0xa8] sm:$0xff]  }
  0x4b   : > { %1239 = vmatpush3.bf16.msra.mxu1 %v1305_v5  ;;  %1200 = vmatprep.subr.bf16.mxu0 %v1306_v6  ;;  %v1314_v14 = vld [vmem:[%s1580_s3 + $0x60] sm:$0xff]   ;;  %v1318_v18 = vld [vmem:[%s1580_s3 + $0x58] sm:$0xff]   ;;  %v1322_v22 = vld [vmem:[%s1580_s3 + $0x50] sm:$0xff]  }
  0x4c   : > { %1240 = vmatprep.subr.bf16.mxu1 %v1307_v7  ;;  %v1315_v15 = vld [vmem:[%s1580_s3 + $0xe0] sm:$0xff]   ;;  %v1319_v19 = vld [vmem:[%s1580_s3 + $0xd8] sm:$0xff]   ;;  %v1323_v23 = vld [vmem:[%s1580_s3 + $0xd0] sm:$0xff]  }
  0x4d   : > { %v1316_v16 = vld [vmem:[%s1580_s3 + $0x20] sm:$0xff]   ;;  %v1320_v20 = vld [vmem:[%s1580_s3 + $0x18] sm:$0xff]   ;;  %v1324_v24 = vld [vmem:[%s1580_s3 + $0x10] sm:$0xff]  }
  0x4e   : > { %1201 = vmatpush3.bf16.msra.mxu0 %v1308_v8  ;;  %v1317_v17 = vld [vmem:[%s1580_s3 + $0xa0] sm:$0xff]   ;;  %v1321_v21 = vld [vmem:[%s1580_s3 + $0x98] sm:$0xff]   ;;  %v1325_v25 = vld [vmem:[%s1580_s3 + $0x90] sm:$0xff]  }
  0x4f   : > { %1241 = vmatpush3.bf16.msra.mxu1 %v1309_v9  ;;  %1202 = vmatprep.subr.bf16.mxu0 %v1310_v10  ;;  %v1326_v26 = vld [vmem:[%s1580_s3 + $0x48] sm:$0xff]   ;;  %v1330_v30 = vld [vmem:[%s1580_s3 + $0x40] sm:$0xff]  }
  0x50   : > { %1242 = vmatprep.subr.bf16.mxu1 %v1311_v11  ;;  %v1327_v27 = vld [vmem:[%s1580_s3 + $0xc8] sm:$0xff]   ;;  %v1331_v31 = vld [vmem:[%s1580_s3 + $0xc0] sm:$0xff]  }
  0x51   : > { %v1328_v28 = vld [vmem:[%s1580_s3 + $0x8] sm:$0xff]   ;;  %v1332_v33 = vld [vmem:[%s1580_s3] sm:$0xff]  }
  0x52   : > { %1203 = vmatpush3.bf16.msra.mxu0 %v1312_v12  ;;  %v1329_v29 = vld [vmem:[%s1580_s3 + $0x88] sm:$0xff]   ;;  %v1333_v35 = vld [vmem:[%s1580_s3 + $0x80] sm:$0xff]  }
  0x53   : > { %1243 = vmatpush3.bf16.msra.mxu1 %v1313_v13  ;;  %1204 = vmatprep.subr.bf16.mxu0 %v1314_v14  ;;  %v1337_v34 = vld [vmem:[%s1689_s0 + $0x8] ss:$16 sps:$4 sm:$0xff]   ;;  %v1340_v36 = vld [vmem:[%s1689_s0 + $0x24] ss:$16 sps:$4 sm:$0xff]   ;;  %v1342_v37 = vld [vmem:[%s1689_s0 + $0x2c] ss:$16 sps:$4 sm:$0xff]  }
  0x54   : > { %1244 = vmatprep.subr.bf16.mxu1 %v1315_v15  ;;  %v1344_v38 = vld [vmem:[%s1689_s0 + $0x20] ss:$16 sps:$4 sm:$0xff]   ;;  %v1345_v39 = vld [vmem:[%s1689_s0 + $0x28] ss:$16 sps:$4 sm:$0xff]   ;;  %v1346_v40 = vld [vmem:[%s1689_s0 + $0x44] ss:$16 sps:$4 sm:$0xff]  }
  0x55   : > { %v1348_v41 = vld [vmem:[%s1689_s0 + $0x4c] ss:$16 sps:$4 sm:$0xff]   ;;  %v1350_v42 = vld [vmem:[%s1689_s0 + $0x40] ss:$16 sps:$4 sm:$0xff]   ;;  %v1351_v43 = vld [vmem:[%s1689_s0 + $0x48] ss:$16 sps:$4 sm:$0xff]  }
  0x56   : > { %1205 = vmatpush3.bf16.msra.mxu0 %v1316_v16  ;;  %v1352_v44 = vld [vmem:[%s1689_s0 + $0x64] ss:$16 sps:$4 sm:$0xff]   ;;  %v1354_v45 = vld [vmem:[%s1689_s0 + $0x6c] ss:$16 sps:$4 sm:$0xff]   ;;  %v1356_v46 = vld [vmem:[%s1689_s0 + $0x60] ss:$16 sps:$4 sm:$0xff]  }
  0x57   : > { %1245 = vmatpush3.bf16.msra.mxu1 %v1317_v17  ;;  %1206 = vmatprep.subr.bf16.mxu0 %v1318_v18  ;;  %v1357_v47 = vld [vmem:[%s1689_s0 + $0x68] ss:$16 sps:$4 sm:$0xff]  }
  0x58   : > { %1246 = vmatprep.subr.bf16.mxu1 %v1319_v19 }
  0x5a   : > { %1207 = vmatpush3.bf16.msra.mxu0 %v1320_v20 }
  0x5b   : > { %1247 = vmatpush3.bf16.msra.mxu1 %v1321_v21  ;;  %1208 = vmatprep.subr.bf16.mxu0 %v1322_v22 }
  0x5c   : > { %1248 = vmatprep.subr.bf16.mxu1 %v1323_v23 }
  0x5e   : > { %1209 = vmatpush3.bf16.msra.mxu0 %v1324_v24 }
  0x5f   : > { %1249 = vmatpush3.bf16.msra.mxu1 %v1325_v25  ;;  %1210 = vmatprep.subr.bf16.mxu0 %v1326_v26 }
  0x60   : > { %1250 = vmatprep.subr.bf16.mxu1 %v1327_v27 }
  0x62   : > { %1211 = vmatpush3.bf16.msra.mxu0 %v1328_v28 }
  0x63   : > { %1251 = vmatpush3.bf16.msra.mxu1 %v1329_v29  ;;  %1212 = vmatprep.subr.bf16.mxu0 %v1330_v30 }
  0x64   : > { %1252 = vmatprep.subr.bf16.mxu1 %v1331_v31 }
  0x66   : > { %1213 = vmatpush3.bf16.msra.mxu0 %v1332_v33 }
  0x67   : > { %1253 = vmatpush3.bf16.msra.mxu1 %v1333_v35 }
  0x69   : > { %819 = vmatmul.mubr.bf16.vlgmr.msra.gmra.mxu0 %v1334_v32 }
  0x6a   : > { %884 = vmatmul.mubr.bf16.vlgmr.msra.gmra.mxu1 %v1337_v34  ;;  %826 = vmatprep.mubr.bf16.mxu0 %v1340_v36 }
  0x6b   : > { %891 = vmatprep.mubr.bf16.mxu1 %v1342_v37 }
  0x71   : > { %827 = vmatmul.mubr.bf16.gmra.mxu0 %v1344_v38 }
  0x72   : > { %892 = vmatmul.mubr.bf16.gmra.mxu1 %v1345_v39  ;;  %834 = vmatprep.mubr.bf16.mxu0 %v1346_v40 }
  0x73   : > { %899 = vmatprep.mubr.bf16.mxu1 %v1348_v41 }
  0x79   : > { %835 = vmatmul.mubr.bf16.gmra.mxu0 %v1350_v42 }
  0x7a   : > { %900 = vmatmul.mubr.bf16.gmra.mxu1 %v1351_v43  ;;  %842 = vmatprep.mubr.bf16.mxu0 %v1352_v44 }
  0x7b   : > { %907 = vmatprep.mubr.bf16.mxu1 %v1354_v45 }
  0x81   : > { %843 = vmatmul.mubr.bf16.gmra.mxu0 %v1356_v46 }
  0x82   : > { %908 = vmatmul.mubr.bf16.gmra.mxu1 %v1357_v47 }
 0x129   : > { %v1214_v48 = vpop.f32.mrf.mxu0 }
 0x12a   : > { %v1254_v49 = vpop.f32.mrf.mxu1 }
 0x12b   : > { %v1215_v50 = vpop.f32.mrf.mxu0 }
 0x12c   : > { %v1255_v51 = vpop.f32.mrf.mxu1  ;;  %v1216_v52 = vadd.f32 %v1215_v50, %v1214_v48 }
 0x12d   : > { %v1256_v53 = vadd.f32 %v1255_v51, %v1254_v49  ;;  %v1217_v54 = vpop.f32.mrf.mxu0 }
 0x12e   : > { %v1257_v55 = vpop.f32.mrf.mxu1 }
 0x12f   : > { %v1218_v56 = vpop.f32.mrf.mxu0  ;;  %v886_v59 = vadd.f32 %v1256_v53, %v1216_v52 }
 0x130   : > { %v1219_v57 = vadd.f32 %v1218_v56, %v1217_v54  ;;  %v1258_v58 = vpop.f32.mrf.mxu1 }
 0x131   : > { %v1259_v60 = vadd.f32 %v1258_v58, %v1257_v55  ;;  %v1220_v61 = vpop.f32.mrf.mxu0  ;;  %v916_v2 = vmax.f32 %v886_v59, 0.0 }
 0x132   : > { %v1260_v62 = vpop.f32.mrf.mxu1 }
 0x133   : > { %v889_v63 = vadd.f32 %v1259_v60, %v1219_v57  ;;  %v1221_v0 = vpop.f32.mrf.mxu0 }
 0x134   : > { %v1261_v1 = vpop.f32.mrf.mxu1  ;;  %v1222_v4 = vadd.f32 %v1221_v0, %v1220_v61 }
 0x135   : > { %v917_v3 = vmax.f32 %v889_v63, 0.0  ;;  %v1262_v5 = vadd.f32 %v1261_v1, %v1260_v62  ;;  %v1223_v6 = vpop.f32.mrf.mxu0 }
 0x136   : > { %v1263_v7 = vpop.f32.mrf.mxu1 }
 0x137   : > { %v1178_v8 = vpack.c.bf16 %v917_v3, %v916_v2  ;;  %v1224_v9 = vpop.f32.mrf.mxu0  ;;  %v894_v12 = vadd.f32 %v1262_v5, %v1222_v4 }
 0x138   : > { %v1225_v10 = vadd.f32 %v1224_v9, %v1223_v6  ;;  %v1264_v11 = vpop.f32.mrf.mxu1 }
 0x139   : > { %1179 = vst [vmem:[%s1658_s20] sm:$0xff] %v1178_v8   ;;  %v1265_v13 = vadd.f32 %v1264_v11, %v1263_v7  ;;  %v1226_v14 = vpop.f32.mrf.mxu0  ;;  %v918_v19 = vmax.f32 %v894_v12, 0.0 }
 0x13a   : > { %v1266_v15 = vpop.f32.mrf.mxu1 }
 0x13b   : > { %v897_v16 = vadd.f32 %v1265_v13, %v1225_v10  ;;  %v1227_v17 = vpop.f32.mrf.mxu0 }
 0x13c   : > { %v1267_v18 = vpop.f32.mrf.mxu1  ;;  %v1228_v21 = vadd.f32 %v1227_v17, %v1226_v14 }
 0x13d   : > { %v919_v20 = vmax.f32 %v897_v16, 0.0  ;;  %v1268_v22 = vadd.f32 %v1267_v18, %v1266_v15  ;;  %v1229_v23 = vpop.f32.mrf.mxu0 }
 0x13e   : > { %v1269_v24 = vpop.f32.mrf.mxu1 }
 0x13f   : > { %v1183_v25 = vpack.c.bf16 %v919_v20, %v918_v19  ;;  %v1230_v26 = vpop.f32.mrf.mxu0  ;;  %v902_v29 = vadd.f32 %v1268_v22, %v1228_v21 }
 0x140   : > { %v1231_v27 = vadd.f32 %v1230_v26, %v1229_v23  ;;  %v1270_v28 = vpop.f32.mrf.mxu1  ;;  %v989_v52 = vld [vmem:[%s1658_s20] sm:$0xf] (%p1427_p5)  ;;  %v991_v53 = vld [vmem:[%s1658_s20 + $0x4] sm:$0xf] (%p1427_p5) }
 0x141   : > { %1195 = vst [vmem:[%s1658_s20 + $0x8] sm:$0xff] %v1183_v25   ;;  %v1271_v30 = vadd.f32 %v1270_v28, %v1269_v24  ;;  %v1232_v31 = vpop.f32.mrf.mxu0  ;;  %v920_v36 = vmax.f32 %v902_v29, 0.0  ;;  %990 = vst [vmem:[%s972_s22] sm:$0xf] (%p1427_p5), %v989_v52 }
 0x142   : > { %v1272_v32 = vpop.f32.mrf.mxu1  ;;  %992 = vst [vmem:[%s972_s22 + $0x8] sm:$0xf] (%p1427_p5), %v991_v53 }
 0x143   : > { %v905_v33 = vadd.f32 %v1271_v30, %v1231_v27  ;;  %v1233_v34 = vpop.f32.mrf.mxu0 }
 0x144   : > { %v1273_v35 = vpop.f32.mrf.mxu1  ;;  %v1234_v38 = vadd.f32 %v1233_v34, %v1232_v31 }
 0x145   : > { %v921_v37 = vmax.f32 %v905_v33, 0.0  ;;  %v1274_v39 = vadd.f32 %v1273_v35, %v1272_v32  ;;  %v1235_v40 = vpop.f32.mrf.mxu0 }
 0x146   : > { %v1275_v41 = vpop.f32.mrf.mxu1 }
 0x147   : > { %v1188_v42 = vpack.c.bf16 %v921_v37, %v920_v36  ;;  %v1236_v43 = vpop.f32.mrf.mxu0  ;;  %v910_v46 = vadd.f32 %v1274_v39, %v1234_v38 }
 0x148   : > { %v1237_v44 = vadd.f32 %v1236_v43, %v1235_v40  ;;  %v1276_v45 = vpop.f32.mrf.mxu1  ;;  %v993_v54 = vld [vmem:[%s1658_s20 + $0x8] sm:$0xf] (%p1427_p5)  ;;  %v995_v55 = vld [vmem:[%s1658_s20 + $0xc] sm:$0xf] (%p1427_p5) }
 0x149   : > { %1196 = vst [vmem:[%s1658_s20 + $0x10] sm:$0xff] %v1188_v42   ;;  %v1277_v47 = vadd.f32 %v1276_v45, %v1275_v41  ;;  %v922_v49 = vmax.f32 %v910_v46, 0.0  ;;  %994 = vst [vmem:[%s972_s22 + $0x10] sm:$0xf] (%p1427_p5), %v993_v54 }
 0x14a   : > { %996 = vst [vmem:[%s972_s22 + $0x18] sm:$0xf] (%p1427_p5), %v995_v55 }
 0x14b   : > { %v913_v48 = vadd.f32 %v1277_v47, %v1237_v44 }
 0x14d   : > { %v923_v50 = vmax.f32 %v913_v48, 0.0  ;;  %970 = sbr.rel (!%p1427_p5) target bundleno = 346 (0x15a), region = 73 }
 0x14f   : > { %v1193_v51 = vpack.c.bf16 %v923_v50, %v922_v49 }
 0x150   : > { %v997_v56 = vld [vmem:[%s1658_s20 + $0x10] sm:$0xf] (%p1427_p5)  ;;  %v999_v57 = vld [vmem:[%s1658_s20 + $0x14] sm:$0xf] (%p1427_p5) }
 0x151   : > { %1197 = vst [vmem:[%s1658_s20 + $0x18] sm:$0xff] %v1193_v51   ;;  %998 = vst [vmem:[%s972_s22 + $0x20] sm:$0xf] (%p1427_p5), %v997_v56 }
 0x152   : > { %1000 = vst [vmem:[%s972_s22 + $0x28] sm:$0xf] %v999_v57 }
 0x158   : > { %v1001_v58 = vld [vmem:[%s1658_s20 + $0x18] sm:$0xf]  ;;  %v1003_v59 = vld [vmem:[%s1658_s20 + $0x1c] sm:$0xf] }
 0x159   : > { %1002 = vst [vmem:[%s972_s22 + $0x30] sm:$0xf] %v1001_v58  ;;  %1004 = vst [vmem:[%s972_s22 + $0x38] sm:$0xf] %v1003_v59 }
 0x15a PF: > { %p9_p10 = scmp.ge.s32.totalorder %s1414_s13, 4   ;;  %s1693_s9 = smov %s1376_s10 }
 0x15b   : > { %s1694_s10 = smov %s1425_s16  ;;  %s1695_s11 = smov %s1414_s13 }
 0x15c   :  { %11 = sbr.rel (!%p9_p10) target bundleno = 2 (0x2), region = 145 }

// kernel: dqn_forward.6
= control target key start
LH: loop header
LB: loop body
LE: loop exit
PB: predicated region body
PF: predicated region fallthrough
CT: control target
= control target key end

     0   :  { %vm424_vm0 = vcmask 523264   ;;  %s1154_s1 = inlined_call_operand.vmem [shape: bf16[576,128], index: 1, kind: input, shape index: {}]   ;;  %s1155_s0 = inlined_call_operand.vmem [shape: bf16[64,576], index: 0, kind: input, shape index: {}]   ;;  %s1156_s2 = inlined_call_operand.vmem [shape: bf16[64,128], index: 2, kind: output, shape index: {}]  }
   0x1   :  { %v895_v0 = vld [vmem:[%s1154_s1 + $0x78] sm:$0xff]   ;;  %v899_v4 = vld [vmem:[%s1154_s1 + $0x70] sm:$0xff]   ;;  %v903_v8 = vld [vmem:[%s1154_s1 + $0x68] sm:$0xff]  }
   0x2   :  { %v896_v1 = vld [vmem:[%s1154_s1 + $0xf8] sm:$0xff]   ;;  %783 = vmatprep.subr.bf16.mxu0 %v895_v0  ;;  %v900_v5 = vld [vmem:[%s1154_s1 + $0xf0] sm:$0xff]   ;;  %v904_v9 = vld [vmem:[%s1154_s1 + $0xe8] sm:$0xff]  }
   0x3   :  { %v897_v2 = vld [vmem:[%s1154_s1 + $0x38] sm:$0xff]   ;;  %823 = vmatprep.subr.bf16.mxu1 %v896_v1  ;;  %v901_v6 = vld [vmem:[%s1154_s1 + $0x30] sm:$0xff]   ;;  %v905_v10 = vld [vmem:[%s1154_s1 + $0x28] sm:$0xff]  }
   0x4   :  { %v898_v3 = vld [vmem:[%s1154_s1 + $0xb8] sm:$0xff]   ;;  %784 = vmatpush3.bf16.msra.mxu0 %v897_v2  ;;  %v902_v7 = vld [vmem:[%s1154_s1 + $0xb0] sm:$0xff]   ;;  %v906_v11 = vld [vmem:[%s1154_s1 + $0xa8] sm:$0xff]  }
   0x5   :  { %824 = vmatpush3.bf16.msra.mxu1 %v898_v3  ;;  %785 = vmatprep.subr.bf16.mxu0 %v899_v4  ;;  %v907_v12 = vld [vmem:[%s1154_s1 + $0x60] sm:$0xff]   ;;  %v911_v16 = vld [vmem:[%s1154_s1 + $0x58] sm:$0xff]   ;;  %v915_v20 = vld [vmem:[%s1154_s1 + $0x50] sm:$0xff]  }
   0x6   :  { %825 = vmatprep.subr.bf16.mxu1 %v900_v5  ;;  %v908_v13 = vld [vmem:[%s1154_s1 + $0xe0] sm:$0xff]   ;;  %v912_v17 = vld [vmem:[%s1154_s1 + $0xd8] sm:$0xff]   ;;  %v916_v21 = vld [vmem:[%s1154_s1 + $0xd0] sm:$0xff]  }
   0x7   :  { %v909_v14 = vld [vmem:[%s1154_s1 + $0x20] sm:$0xff]   ;;  %v913_v18 = vld [vmem:[%s1154_s1 + $0x18] sm:$0xff]   ;;  %v917_v22 = vld [vmem:[%s1154_s1 + $0x10] sm:$0xff]  }
   0x8   :  { %786 = vmatpush3.bf16.msra.mxu0 %v901_v6  ;;  %v910_v15 = vld [vmem:[%s1154_s1 + $0xa0] sm:$0xff]   ;;  %v914_v19 = vld [vmem:[%s1154_s1 + $0x98] sm:$0xff]   ;;  %v918_v23 = vld [vmem:[%s1154_s1 + $0x90] sm:$0xff]  }
   0x9   :  { %826 = vmatpush3.bf16.msra.mxu1 %v902_v7  ;;  %787 = vmatprep.subr.bf16.mxu0 %v903_v8  ;;  %v919_v24 = vld [vmem:[%s1154_s1 + $0x48] sm:$0xff]   ;;  %v923_v28 = vld [vmem:[%s1154_s1 + $0x40] sm:$0xff]   ;;  %v933_v36 = vld [vmem:[%s1154_s1 + $0x118] sm:$0xff]  }
   0xa   :  { %827 = vmatprep.subr.bf16.mxu1 %v904_v9  ;;  %v920_v25 = vld [vmem:[%s1154_s1 + $0xc8] sm:$0xff]   ;;  %v924_v29 = vld [vmem:[%s1154_s1 + $0xc0] sm:$0xff]   ;;  %v940_v39 = vld [vmem:[%s1154_s1 + $0x110] sm:$0xff]  }
   0xb   :  { %v921_v26 = vld [vmem:[%s1154_s1 + $0x8] sm:$0xff]   ;;  %v925_v30 = vld [vmem:[%s1154_s1] sm:$0xff]   ;;  %v943_v43 = vld [vmem:[%s1155_s0 + $0x5c] ss:$20 sps:$4 sm:$0xff]  }
   0xc   :  { %788 = vmatpush3.bf16.msra.mxu0 %v905_v10  ;;  %v922_v27 = vld [vmem:[%s1154_s1 + $0x88] sm:$0xff]   ;;  %v926_v31 = vld [vmem:[%s1154_s1 + $0x80] sm:$0xff]   ;;  %v948_v48 = vld [vmem:[%s1155_s0 + $0x7c] ss:$20 sps:$4 sm:$0xff]  }
   0xd   :  { %828 = vmatpush3.bf16.msra.mxu1 %v906_v11  ;;  %789 = vmatprep.subr.bf16.mxu0 %v907_v12  ;;  %v927_v32 = vld [vmem:[%s1155_s0] ss:$20 sps:$4 sm:$0xff]   ;;  %v929_v33 = vld [vmem:[%s1155_s0 + $0x4] ss:$20 sps:$4 sm:$0xff]   ;;  %v930_v34 = vld [vmem:[%s1155_s0 + $0x8] ss:$20 sps:$4 sm:$0xff]  }
   0xe   :  { %829 = vmatprep.subr.bf16.mxu1 %v908_v13  ;;  %v932_v35 = vld [vmem:[%s1155_s0 + $0xc] ss:$20 sps:$4 sm:$0xff]   ;;  %469 = vmatprep.mubr.bf16.mxu0 %v929_v33  ;;  %v936_v38 = vld [vmem:[%s1155_s0 + $0x34] ss:$20 sps:$4 sm:$0xff]   ;;  %v939_v41 = vld [vmem:[%s1155_s0 + $0x30] ss:$20 sps:$4 sm:$0xff]  }
   0xf   :  { %534 = vmatprep.mubr.bf16.mxu1 %v932_v35  ;;  %v934_v37 = vld [vmem:[%s1155_s0 + $0x2c] ss:$20 sps:$4 sm:$0xff]   ;;  %v938_v40 = vld [vmem:[%s1155_s0 + $0x28] ss:$20 sps:$4 sm:$0xff]   ;;  %v945_v46 = vld [vmem:[%s1155_s0 + $0x50] ss:$20 sps:$4 sm:$0xff]  }
  0x10   :  { %790 = vmatpush3.bf16.msra.mxu0 %v909_v14  ;;  %v941_v42 = vld [vmem:[%s1155_s0 + $0x54] ss:$20 sps:$4 sm:$0xff]   ;;  %v954_v45 = vld [vmem:[%s1154_s1 + $0x100] sm:$0xff]   ;;  %v946_v47 = vld [vmem:[%s1155_s0 + $0x58] ss:$20 sps:$4 sm:$0xff]  }
  0x11   :  { %830 = vmatpush3.bf16.msra.mxu1 %v910_v15  ;;  %791 = vmatprep.subr.bf16.mxu0 %v911_v16  ;;  %v947_v44 = vld [vmem:[%s1154_s1 + $0x108] sm:$0xff]   ;;  %v950_v49 = vld [vmem:[%s1155_s0 + $0x84] ss:$20 sps:$4 sm:$0xff]   ;;  %v953_v51 = vld [vmem:[%s1155_s0 + $0x80] ss:$20 sps:$4 sm:$0xff]  }
  0x12   :  { %831 = vmatprep.subr.bf16.mxu1 %v912_v17  ;;  %v952_v50 = vld [vmem:[%s1155_s0 + $0x78] ss:$20 sps:$4 sm:$0xff]   ;;  %v955_v52 = vld [vmem:[%s1155_s0 + $0x10] ss:$20 sps:$4 sm:$0xff]   ;;  %v956_v53 = vld [vmem:[%s1155_s0 + $0x60] ss:$20 sps:$4 sm:$0xff]  }
  0x13   :  { %v957_v54 = vld [vmem:[%s1155_s0 + $0x38] ss:$20 sps:$4 sm:$0xff]   ;;  %v958_v55 = vld [vmem:[%s1155_s0 + $0x88] ss:$20 sps:$4 sm:$0xff]  }
  0x14   :  { %792 = vmatpush3.bf16.msra.mxu0 %v913_v18 }
  0x15   :  { %832 = vmatpush3.bf16.msra.mxu1 %v914_v19  ;;  %793 = vmatprep.subr.bf16.mxu0 %v915_v20 }
  0x16   :  { %833 = vmatprep.subr.bf16.mxu1 %v916_v21 }
  0x18   :  { %794 = vmatpush3.bf16.msra.mxu0 %v917_v22 }
  0x19   :  { %834 = vmatpush3.bf16.msra.mxu1 %v918_v23  ;;  %795 = vmatprep.subr.bf16.mxu0 %v919_v24 }
  0x1a   :  { %835 = vmatprep.subr.bf16.mxu1 %v920_v25 }
  0x1c   :  { %796 = vmatpush3.bf16.msra.mxu0 %v921_v26 }
  0x1d   :  { %836 = vmatpush3.bf16.msra.mxu1 %v922_v27  ;;  %797 = vmatprep.subr.bf16.mxu0 %v923_v28 }
  0x1e   :  { %837 = vmatprep.subr.bf16.mxu1 %v924_v29 }
  0x20   :  { %798 = vmatpush3.bf16.msra.mxu0 %v925_v30 }
  0x21   :  { %838 = vmatpush3.bf16.msra.mxu1 %v926_v31  ;;  %871 = vmatprep.subr.bf16.mxu0 %v933_v36 }
  0x22   :  { %887 = vmatprep.subr.bf16.mxu1 %v933_v36 }
  0x23   :  { %470 = vmatmul.mubr.bf16.vlgmr.msra.gmra.mxu0 %v927_v32 }
  0x24   :  { %535 = vmatmul.mubr.bf16.vlgmr.msra.gmra.mxu1 %v930_v34  ;;  %872 = vmatpush3.bf16.msra.mxu0 %v933_v36 }
  0x25   :  { %891 = vmatpush3.bf16.msra.mxu1 %v933_v36  ;;  %477 = vmatprep.mubr.bf16.mxu0 %v934_v37 }
  0x26   :  { %542 = vmatprep.mubr.bf16.mxu1 %v936_v38  ;;  %873 = vmatprep.subr.bf16.mxu0 %v940_v39 }
  0x27   :  { %888 = vmatprep.subr.bf16.mxu1 %v940_v39 }
  0x28   :  { %874 = vmatpush3.bf16.msra.mxu0 %v940_v39 }
  0x29   :  { %892 = vmatpush3.bf16.msra.mxu1 %v940_v39  ;;  %875 = vmatprep.subr.bf16.mxu0 %v947_v44 }
  0x2a   :  { %889 = vmatprep.subr.bf16.mxu1 %v947_v44 }
  0x2b   :  { %478 = vmatmul.mubr.bf16.gmra.mxu0 %v938_v40 }
  0x2c   :  { %543 = vmatmul.mubr.bf16.gmra.mxu1 %v939_v41  ;;  %485 = vmatprep.mubr.bf16.mxu0 %v941_v42 }
  0x2d   :  { %550 = vmatprep.mubr.bf16.mxu1 %v943_v43  ;;  %876 = vmatpush3.bf16.msra.mxu0 %v947_v44 }
  0x2e   :  { %893 = vmatpush3.bf16.msra.mxu1 %v947_v44  ;;  %877 = vmatprep.subr.bf16.mxu0 %v954_v45 }
  0x2f   :  { %890 = vmatprep.subr.bf16.mxu1 %v954_v45 }
  0x31   :  { %878 = vmatpush3.bf16.msra.mxu0 %v954_v45 }
  0x32   :  { %894 = vmatpush3.bf16.msra.mxu1 %v954_v45 }
  0x33   :  { %486 = vmatmul.mubr.bf16.gmra.mxu0 %v945_v46 }
  0x34   :  { %551 = vmatmul.mubr.bf16.gmra.mxu1 %v946_v47  ;;  %493 = vmatprep.mubr.bf16.mxu0 %v948_v48 }
  0x35   :  { %558 = vmatprep.mubr.bf16.mxu1 %v950_v49 }
  0x3b   :  { %494 = vmatmul.mubr.bf16.gmra.mxu0 %v952_v50 }
  0x3c   :  { %559 = vmatmul.mubr.bf16.gmra.mxu1 %v953_v51  ;;  %879 = vmatprep.mubr.msk.bf16.mxu0 %vm424_vm0, %v955_v52 }
  0x3d   :  { %883 = vmatprep.mubr.msk.bf16.mxu1 %vm424_vm0, %v956_v53 }
  0x43   :  { %880 = vmatmul.mubr.msk.bf16.vlgmr.msra.gmra.mxu0 %vm424_vm0, %v957_v54 }
  0x44   :  { %884 = vmatmul.mubr.msk.bf16.vlgmr.msra.gmra.mxu1 %vm424_vm0, %v958_v55 }
  0xe3   :  { %v799_v56 = vpop.f32.mrf.mxu0 }
  0xe4   :  { %v839_v57 = vpop.f32.mrf.mxu1 }
  0xe5   :  { %v800_v58 = vpop.f32.mrf.mxu0 }
  0xe6   :  { %v840_v59 = vpop.f32.mrf.mxu1  ;;  %v801_v27 = vadd.f32 %v800_v58, %v799_v56 }
  0xe7   :  { %v802_v60 = vpop.f32.mrf.mxu0  ;;  %v841_v28 = vadd.f32 %v840_v59, %v839_v57 }
  0xe8   :  { %v842_v61 = vpop.f32.mrf.mxu1 }
  0xe9   :  { %v803_v62 = vpop.f32.mrf.mxu0  ;;  %v537_v46 = vadd.f32 %v841_v28, %v801_v27 }
  0xea   :  { %v843_v63 = vpop.f32.mrf.mxu1  ;;  %v804_v37 = vadd.f32 %v803_v62, %v802_v60 }
  0xeb   :  { %v805_v0 = vpop.f32.mrf.mxu0  ;;  %v844_v38 = vadd.f32 %v843_v63, %v842_v61 }
  0xec   :  { %v845_v1 = vpop.f32.mrf.mxu1 }
  0xed   :  { %v806_v2 = vpop.f32.mrf.mxu0  ;;  %v540_v56 = vadd.f32 %v844_v38, %v804_v37 }
  0xee   :  { %v846_v3 = vpop.f32.mrf.mxu1  ;;  %v807_v21 = vadd.f32 %v806_v2, %v805_v0 }
  0xef   :  { %v808_v4 = vpop.f32.mrf.mxu0  ;;  %v847_v22 = vadd.f32 %v846_v3, %v845_v1 }
  0xf0   :  { %v848_v5 = vpop.f32.mrf.mxu1 }
  0xf1   :  { %v809_v6 = vpop.f32.mrf.mxu0  ;;  %v545_v39 = vadd.f32 %v847_v22, %v807_v21 }
  0xf2   :  { %v849_v7 = vpop.f32.mrf.mxu1  ;;  %v810_v29 = vadd.f32 %v809_v6, %v808_v4 }
  0xf3   :  { %v811_v8 = vpop.f32.mrf.mxu0  ;;  %v850_v30 = vadd.f32 %v849_v7, %v848_v5 }
  0xf4   :  { %v851_v9 = vpop.f32.mrf.mxu1 }
  0xf5   :  { %v812_v10 = vpop.f32.mrf.mxu0  ;;  %v548_v48 = vadd.f32 %v850_v30, %v810_v29 }
  0xf6   :  { %v852_v11 = vpop.f32.mrf.mxu1  ;;  %v813_v32 = vadd.f32 %v812_v10, %v811_v8 }
  0xf7   :  { %v814_v12 = vpop.f32.mrf.mxu0  ;;  %v853_v33 = vadd.f32 %v852_v11, %v851_v9 }
  0xf8   :  { %v854_v13 = vpop.f32.mrf.mxu1 }
  0xf9   :  { %v815_v14 = vpop.f32.mrf.mxu0  ;;  %v553_v50 = vadd.f32 %v853_v33, %v813_v32 }
  0xfa   :  { %v855_v15 = vpop.f32.mrf.mxu1  ;;  %v816_v41 = vadd.f32 %v815_v14, %v814_v12 }
  0xfb   :  { %v817_v16 = vpop.f32.mrf.mxu0  ;;  %v856_v42 = vadd.f32 %v855_v15, %v854_v13 }
  0xfc   :  { %v857_v17 = vpop.f32.mrf.mxu1 }
  0xfd   :  { %v818_v18 = vpop.f32.mrf.mxu0  ;;  %v556_v60 = vadd.f32 %v856_v42, %v816_v41 }
  0xfe   :  { %v858_v19 = vpop.f32.mrf.mxu1  ;;  %v819_v24 = vadd.f32 %v818_v18, %v817_v16 }
  0xff   :  { %v820_v20 = vpop.f32.mrf.mxu0  ;;  %v859_v25 = vadd.f32 %v858_v19, %v857_v17 }
 0x100   :  { %v860_v23 = vpop.f32.mrf.mxu1 }
 0x101   :  { %v821_v26 = vpop.f32.mrf.mxu0  ;;  %v561_v43 = vadd.f32 %v859_v25, %v819_v24 }
 0x102   :  { %v861_v31 = vpop.f32.mrf.mxu1  ;;  %v822_v34 = vadd.f32 %v821_v26, %v820_v20 }
 0x103   :  { %v862_v35 = vadd.f32 %v861_v31, %v860_v23  ;;  %v881_v36 = vpop.f32.mrf.mxu0 }
 0x104   :  { %v885_v40 = vpop.f32.mrf.mxu1  ;;  %v610_v45 = vadd.f32 %v881_v36, %v545_v39 }
 0x105   :  { %v601_v44 = vpop.f32.mrf.mxu0  ;;  %v626_v49 = vadd.f32 %v885_v40, %v561_v43  ;;  %v564_v52 = vadd.f32 %v862_v35, %v822_v34 }
 0x106   :  { %v617_v47 = vpop.f32.mrf.mxu1  ;;  %v602_v53 = vadd.f32 %v601_v44, %v537_v46  ;;  %v634_v61 = vmax.f32 %v610_v45, 0.0 }
 0x107   :  { %v882_v51 = vpop.f32.mrf.mxu0  ;;  %v618_v57 = vadd.f32 %v617_v47, %v553_v50  ;;  %v638_v1 = vmax.f32 %v626_v49, 0.0 }
 0x108   :  { %v613_v54 = vadd.f32 %v882_v51, %v548_v48  ;;  %v886_v55 = vpop.f32.mrf.mxu1  ;;  %v632_v4 = vmax.f32 %v602_v53, 0.0 }
 0x109   :  { %v629_v58 = vadd.f32 %v886_v55, %v564_v52  ;;  %v604_v59 = vpop.f32.mrf.mxu0  ;;  %v636_v7 = vmax.f32 %v618_v57, 0.0 }
 0x10a   :  { %v635_v62 = vmax.f32 %v613_v54, 0.0  ;;  %v605_v63 = vadd.f32 %v604_v59, %v540_v56  ;;  %v620_v0 = vpop.f32.mrf.mxu1 }
 0x10b   :  { %v639_v2 = vmax.f32 %v629_v58, 0.0  ;;  %v621_v3 = vadd.f32 %v620_v0, %v556_v60 }
 0x10c   :  { %v768_v5 = vpack.c.bf16 %v635_v62, %v634_v61  ;;  %v633_v6 = vmax.f32 %v605_v63, 0.0 }
 0x10d   :  { %v778_v8 = vpack.c.bf16 %v639_v2, %v638_v1  ;;  %v637_v9 = vmax.f32 %v621_v3, 0.0 }
 0x10e   :  { %780 = vst [vmem:[%s1156_s2 + $0x8] sm:$0xff] %v768_v5   ;;  %v763_v10 = vpack.c.bf16 %v633_v6, %v632_v4 }
 0x10f   :  { %782 = vst [vmem:[%s1156_s2 + $0x18] sm:$0xff] %v778_v8   ;;  %v773_v11 = vpack.c.bf16 %v637_v9, %v636_v7 }
 0x110   :  { %764 = vst [vmem:[%s1156_s2] sm:$0xff] %v763_v10  }
 0x111   :  { %781 = vst [vmem:[%s1156_s2 + $0x10] sm:$0xff] %v773_v11  }

// kernel: dqn_forward.7
= control target key start
LH: loop header
LB: loop body
LE: loop exit
PB: predicated region body
PF: predicated region fallthrough
CT: control target
= control target key end

     0   :  { %v625_v0 = vmov 0.0   ;;  %s657_s18 = smov 0   ;;  %s890_s0 = inlined_call_operand.vmem [shape: bf16[64,8,49], index: 0, kind: input, shape index: {}]   ;;  %s891_s1 = inlined_call_operand.vmem [shape: bf16[64,49,512], index: 1, kind: input, shape index: {}]   ;;  %s892_s2 = inlined_call_operand.vmem [shape: f32[1,512], index: 2, kind: input, shape index: {}]   ;;  %s893_s3 = inlined_call_operand.vmem [shape: f32[512,128], index: 3, kind: input, shape index: {}]   ;;  %s894_s4 = inlined_call_operand.vmem [shape: f32[1,128], index: 4, kind: input, shape index: {}]   ;;  %s895_s5 = inlined_call_operand.vmem [shape: f32[8,128], index: 5, kind: output, shape index: {}]  }
   0x1   :  { %21 = vst [vmem:[#allocation2 + $0x10] sm:$0xff] %v625_v0  ;;  %22 = vst [vmem:[#allocation2] sm:$0xff] %v625_v0 }
   0x2   :  { %23 = vst [vmem:[#allocation2 + $0x18] sm:$0xff] %v625_v0  ;;  %24 = vst [vmem:[#allocation2 + $0x8] sm:$0xff] %v625_v0 }
   0x3 LB: > { %v626_v1 = vmov 0   ;;  %s514_s19 = smul.u32 112, %s623_s18  ;;  %vm129_vm0 = vcmask 1040384   ;;  %s493_s23 = sshll.u32 %s623_s18, 2  ;;  %vm125_vm1 = vcmask 400384   ;;  %s623_s18 = sphi %s657_s18, %s30_s18  }
   0x4   : > { %176 = vmatprep.mubr.bf16.mxu0 %v626_v1  ;;  %217 = vmatprep.mubr.bf16.mxu1 %v626_v1  ;;  %v131_v3 = vsel %vm129_vm0, 65535, %v626_v1  ;;  %s36_s26 = scalar_lea.vmem %s890_s0, %s493_s23  ;;  %s30_s18 = sadd.s32 1, %s623_s18  }
   0x5   : > { %s666_s22 = scalar_lea.vmem %s891_s1, %s514_s19  ;;  %v37_v25 = vld [vmem:[%s36_s26] sm:$0xf]  ;;  %p27_p0 = scmp.ge.s32.totalorder %s30_s18, 64  }
   0x6   : > { %v53_v2 = vld [vmem:[%s666_s22 + $0x60] sm:$0x11]  ;;  %v54_v4 = vld [vmem:[%s666_s22 + $0x68] sm:$0x11]  ;;  %v299_v42 = vld [vmem:[%s893_s3 + $0xf8] sm:$0xff] (%p27_p0) }
   0x7   : > { %v508_v5 = vcombine.high %v53_v2, %v53_v2  ;;  %v510_v6 = vcombine.high %v54_v4, %v54_v4  ;;  %v507_v7 = vcombine.low %v53_v2, %v53_v2  ;;  %v509_v8 = vcombine.low %v54_v4, %v54_v4  ;;  %v599_v9 = vld [vmem:[%s666_s22 + $0x44] ss:$16 sps:$4 sm:$0xff]   ;;  %v601_v14 = vld [vmem:[%s666_s22 + $0x4c] ss:$16 sps:$4 sm:$0xff]   ;;  %v603_v15 = vld [vmem:[%s666_s22 + $0x40] ss:$16 sps:$4 sm:$0xff]  }
   0x8   : > { %v604_v16 = vld [vmem:[%s666_s22 + $0x48] ss:$16 sps:$4 sm:$0xff]   ;;  %v605_v17 = vld [vmem:[%s666_s22 + $0x24] ss:$16 sps:$4 sm:$0xff]   ;;  %v607_v18 = vld [vmem:[%s666_s22 + $0x2c] ss:$16 sps:$4 sm:$0xff]   ;;  %v240_v4 = vlaneseq (%p27_p0) }
   0x9   : > { %v136_v10 = vand.u32 %v508_v5, %v131_v3  ;;  %v142_v11 = vand.u32 %v510_v6, %v131_v3  ;;  %v133_v12 = vand.u32 %v507_v7, %v131_v3  ;;  %v139_v13 = vand.u32 %v509_v8, %v131_v3  ;;  %v609_v19 = vld [vmem:[%s666_s22 + $0x20] ss:$16 sps:$4 sm:$0xff]   ;;  %v610_v20 = vld [vmem:[%s666_s22 + $0x28] ss:$16 sps:$4 sm:$0xff]   ;;  %v611_v21 = vld [vmem:[%s666_s22 + $0x4] ss:$16 sps:$4 sm:$0xff]  }
   0xa   : > { %v613_v22 = vld [vmem:[%s666_s22 + $0xc] ss:$16 sps:$4 sm:$0xff]   ;;  %v615_v23 = vld [vmem:[%s666_s22] ss:$16 sps:$4 sm:$0xff]   ;;  %v616_v24 = vld [vmem:[%s666_s22 + $0x8] ss:$16 sps:$4 sm:$0xff]  }
   0xb   : > { %152 = vmatprep.subr.bf16.mxu0 %v136_v10  ;;  %193 = vmatprep.subr.bf16.mxu1 %v142_v11  ;;  %v31_v26 = vld [vmem:[#allocation2 + $0x10] sm:$0xff]  ;;  %v33_v27 = vld [vmem:[#allocation2 + $0x18] sm:$0xff]  ;;  %v32_v30 = vld [vmem:[#allocation2] sm:$0xff] }
   0xc   : > { %153 = vmatpush1.bf16.msra.mxu0 %v133_v12  ;;  %194 = vmatpush1.bf16.msra.mxu1 %v139_v13  ;;  %v34_v31 = vld [vmem:[#allocation2 + $0x8] sm:$0xff]  ;;  %v331_v43 = vld [vmem:[%s893_s3 + $0x1f8] sm:$0xff] (%p27_p0)  ;;  %v298_v46 = vld [vmem:[%s893_s3 + $0xf0] sm:$0xff] (%p27_p0)  ;;  %v241_v13 = vshrl.u32 (%p27_p0), %v240_v4, 7 }
   0xd   : > { %154 = vmatprep.subr.bf16.mxu0 %v599_v9  ;;  %195 = vmatprep.subr.bf16.mxu1 %v601_v14  ;;  %v283_v44 = vld [vmem:[%s893_s3 + $0x78] sm:$0xff] (%p27_p0)  ;;  %v330_v47 = vld [vmem:[%s893_s3 + $0x1f0] sm:$0xff] (%p27_p0)  ;;  %v297_v50 = vld [vmem:[%s893_s3 + $0xe8] sm:$0xff] (%p27_p0) }
   0xe   :  { %v315_v45 = vld [vmem:[%s893_s3 + $0x178] sm:$0xff] (%p27_p0)  ;;  %v282_v48 = vld [vmem:[%s893_s3 + $0x70] sm:$0xff] (%p27_p0)  ;;  %v329_v51 = vld [vmem:[%s893_s3 + $0x1e8] sm:$0xff] (%p27_p0) }
   0xf   :  { %v314_v49 = vld [vmem:[%s893_s3 + $0x170] sm:$0xff] (%p27_p0)  ;;  %v281_v52 = vld [vmem:[%s893_s3 + $0x68] sm:$0xff] (%p27_p0)  ;;  %v296_v54 = vld [vmem:[%s893_s3 + $0xe0] sm:$0xff] (%p27_p0) }
  0x10   : > { %155 = vmatpush1.bf16.msra.mxu0 %v603_v15  ;;  %196 = vmatpush1.bf16.msra.mxu1 %v604_v16  ;;  %v313_v53 = vld [vmem:[%s893_s3 + $0x168] sm:$0xff] (%p27_p0)  ;;  %v328_v55 = vld [vmem:[%s893_s3 + $0x1e0] sm:$0xff] (%p27_p0)  ;;  %v295_v58 = vld [vmem:[%s893_s3 + $0xd8] sm:$0xff] (%p27_p0) }
  0x11   : > { %156 = vmatprep.subr.bf16.mxu0 %v605_v17  ;;  %197 = vmatprep.subr.bf16.mxu1 %v607_v18  ;;  %v280_v56 = vld [vmem:[%s893_s3 + $0x60] sm:$0xff] (%p27_p0)  ;;  %v327_v59 = vld [vmem:[%s893_s3 + $0x1d8] sm:$0xff] (%p27_p0)  ;;  %v294_v62 = vld [vmem:[%s893_s3 + $0xd0] sm:$0xff] (%p27_p0) }
  0x12   :  { %v312_v57 = vld [vmem:[%s893_s3 + $0x160] sm:$0xff] (%p27_p0)  ;;  %v279_v60 = vld [vmem:[%s893_s3 + $0x58] sm:$0xff] (%p27_p0)  ;;  %v326_v63 = vld [vmem:[%s893_s3 + $0x1d0] sm:$0xff] (%p27_p0) }
  0x13   :  { %v311_v61 = vld [vmem:[%s893_s3 + $0x158] sm:$0xff] (%p27_p0)  ;;  %v278_v0 = vld [vmem:[%s893_s3 + $0x50] sm:$0xff] (%p27_p0)  ;;  %v293_v2 = vld [vmem:[%s893_s3 + $0xc8] sm:$0xff] (%p27_p0) }
  0x14   : > { %157 = vmatpush1.bf16.msra.mxu0 %v609_v19  ;;  %198 = vmatpush1.bf16.msra.mxu1 %v610_v20  ;;  %v310_v1 = vld [vmem:[%s893_s3 + $0x150] sm:$0xff] (%p27_p0)  ;;  %v325_v3 = vld [vmem:[%s893_s3 + $0x1c8] sm:$0xff] (%p27_p0)  ;;  %v292_v7 = vld [vmem:[%s893_s3 + $0xc0] sm:$0xff] (%p27_p0) }
  0x15   : > { %158 = vmatprep.subr.bf16.mxu0 %v611_v21  ;;  %199 = vmatprep.subr.bf16.mxu1 %v613_v22  ;;  %v277_v5 = vld [vmem:[%s893_s3 + $0x48] sm:$0xff] (%p27_p0)  ;;  %v324_v8 = vld [vmem:[%s893_s3 + $0x1c0] sm:$0xff] (%p27_p0)  ;;  %v291_v11 = vld [vmem:[%s893_s3 + $0xb8] sm:$0xff] (%p27_p0)  ;;  %v246_v22 = vsub.s32 (%p27_p0), 1, %v241_v13 }
  0x16   :  { %v309_v6 = vld [vmem:[%s893_s3 + $0x148] sm:$0xff] (%p27_p0)  ;;  %v276_v9 = vld [vmem:[%s893_s3 + $0x40] sm:$0xff] (%p27_p0)  ;;  %v323_v12 = vld [vmem:[%s893_s3 + $0x1b8] sm:$0xff] (%p27_p0) }
  0x17   :  { %v308_v10 = vld [vmem:[%s893_s3 + $0x140] sm:$0xff] (%p27_p0)  ;;  %v275_v14 = vld [vmem:[%s893_s3 + $0x38] sm:$0xff] (%p27_p0)  ;;  %v290_v16 = vld [vmem:[%s893_s3 + $0xb0] sm:$0xff] (%p27_p0) }
  0x18   : > { %159 = vmatpush1.bf16.msra.mxu0 %v615_v23  ;;  %200 = vmatpush1.bf16.msra.mxu1 %v616_v24  ;;  %v307_v15 = vld [vmem:[%s893_s3 + $0x138] sm:$0xff] (%p27_p0)  ;;  %v322_v17 = vld [vmem:[%s893_s3 + $0x1b0] sm:$0xff] (%p27_p0)  ;;  %v289_v20 = vld [vmem:[%s893_s3 + $0xa8] sm:$0xff] (%p27_p0)  ;;  %v254_v23 = vsub.s32 (%p27_p0), 3, %v241_v13  ;;  %v242_v24 = vsub.s32 (%p27_p0), 0, %v241_v13 }
  0x19   :  { %515 = vmatprep.subr.mxu0 (%p27_p0), %v299_v42  ;;  %550 = vmatprep.subr.mxu1 (%p27_p0), %v331_v43  ;;  %v274_v18 = vld [vmem:[%s893_s3 + $0x30] sm:$0xff] (%p27_p0)  ;;  %v321_v21 = vld [vmem:[%s893_s3 + $0x1a8] sm:$0xff] (%p27_p0) }
  0x1a   :  { %v306_v19 = vld [vmem:[%s893_s3 + $0x130] sm:$0xff] (%p27_p0) }
  0x1b   : > { %511 = vmatmul.mubr.msk.bf16.vlgmr.msra.gmra.mxu0 %vm125_vm1, %v37_v25  ;;  %512 = vmatmul.mubr.msk.bf16.vlgmr.msra.gmra.mxu1 %vm125_vm1, %v37_v25  ;;  %v273_v25 = vld [vmem:[%s893_s3 + $0x28] sm:$0xff] (%p27_p0) }
  0x1c   :  { %516 = vmatpush3.msra.mxu0 (%p27_p0), %v283_v44  ;;  %551 = vmatpush3.msra.mxu1 (%p27_p0), %v315_v45  ;;  %v286_v45 = vld [vmem:[%s893_s3 + $0x90] sm:$0xff] (%p27_p0) }
  0x1d   :  { %517 = vmatprep.subr.mxu0 (%p27_p0), %v298_v46  ;;  %552 = vmatprep.subr.mxu1 (%p27_p0), %v330_v47  ;;  %v318_v46 = vld [vmem:[%s893_s3 + $0x190] sm:$0xff] (%p27_p0) }
  0x1e   :  { %518 = vmatpush3.msra.mxu0 (%p27_p0), %v282_v48  ;;  %553 = vmatpush3.msra.mxu1 (%p27_p0), %v314_v49  ;;  %v270_v48 = vld [vmem:[%s893_s3 + $0x10] sm:$0xff] (%p27_p0) }
  0x1f   :  { %519 = vmatprep.subr.mxu0 (%p27_p0), %v297_v50  ;;  %554 = vmatprep.subr.mxu1 (%p27_p0), %v329_v51  ;;  %v302_v49 = vld [vmem:[%s893_s3 + $0x110] sm:$0xff] (%p27_p0)  ;;  %v285_v51 = vld [vmem:[%s893_s3 + $0x88] sm:$0xff] (%p27_p0) }
  0x20   :  { %520 = vmatpush3.msra.mxu0 (%p27_p0), %v281_v52  ;;  %555 = vmatpush3.msra.mxu1 (%p27_p0), %v313_v53  ;;  %v317_v52 = vld [vmem:[%s893_s3 + $0x188] sm:$0xff] (%p27_p0) }
  0x21   :  { %521 = vmatprep.subr.mxu0 (%p27_p0), %v296_v54  ;;  %556 = vmatprep.subr.mxu1 (%p27_p0), %v328_v55  ;;  %v269_v55 = vld [vmem:[%s893_s3 + $0x8] sm:$0xff] (%p27_p0) }
  0x22   :  { %522 = vmatpush3.msra.mxu0 (%p27_p0), %v280_v56  ;;  %557 = vmatpush3.msra.mxu1 (%p27_p0), %v312_v57  ;;  %v301_v56 = vld [vmem:[%s893_s3 + $0x108] sm:$0xff] (%p27_p0)  ;;  %v284_v57 = vld [vmem:[%s893_s3 + $0x80] sm:$0xff] (%p27_p0) }
  0x23   :  { %523 = vmatprep.subr.mxu0 (%p27_p0), %v295_v58  ;;  %558 = vmatprep.subr.mxu1 (%p27_p0), %v327_v59  ;;  %v316_v58 = vld [vmem:[%s893_s3 + $0x180] sm:$0xff] (%p27_p0) }
  0x24   :  { %524 = vmatpush3.msra.mxu0 (%p27_p0), %v279_v60  ;;  %559 = vmatpush3.msra.mxu1 (%p27_p0), %v311_v61  ;;  %v268_v60 = vld [vmem:[%s893_s3] sm:$0xff] (%p27_p0) }
  0x25   :  { %525 = vmatprep.subr.mxu0 (%p27_p0), %v294_v62  ;;  %560 = vmatprep.subr.mxu1 (%p27_p0), %v326_v63  ;;  %v300_v62 = vld [vmem:[%s893_s3 + $0x100] sm:$0xff] (%p27_p0) }
  0x26   :  { %526 = vmatpush3.msra.mxu0 (%p27_p0), %v278_v0  ;;  %561 = vmatpush3.msra.mxu1 (%p27_p0), %v310_v1 }
  0x27   :  { %527 = vmatprep.subr.mxu0 (%p27_p0), %v293_v2  ;;  %562 = vmatprep.subr.mxu1 (%p27_p0), %v325_v3  ;;  %v513_v3 = vld [vmem:[%s894_s4] ss:$0 sm:$0xff] (%p27_p0) }
  0x28   :  { %528 = vmatpush3.msra.mxu0 (%p27_p0), %v277_v5  ;;  %563 = vmatpush3.msra.mxu1 (%p27_p0), %v309_v6 }
  0x29   :  { %529 = vmatprep.subr.mxu0 (%p27_p0), %v292_v7  ;;  %564 = vmatprep.subr.mxu1 (%p27_p0), %v324_v8 }
  0x2a   :  { %530 = vmatpush3.msra.mxu0 (%p27_p0), %v276_v9  ;;  %565 = vmatpush3.msra.mxu1 (%p27_p0), %v308_v10 }
  0x2b   :  { %531 = vmatprep.subr.mxu0 (%p27_p0), %v291_v11  ;;  %566 = vmatprep.subr.mxu1 (%p27_p0), %v323_v12 }
  0x2c   :  { %532 = vmatpush3.msra.mxu0 (%p27_p0), %v275_v14  ;;  %567 = vmatpush3.msra.mxu1 (%p27_p0), %v307_v15 }
  0x2d   :  { %533 = vmatprep.subr.mxu0 (%p27_p0), %v290_v16  ;;  %568 = vmatprep.subr.mxu1 (%p27_p0), %v322_v17 }
  0x2e   :  { %534 = vmatpush3.msra.mxu0 (%p27_p0), %v274_v18  ;;  %569 = vmatpush3.msra.mxu1 (%p27_p0), %v306_v19 }
  0x2f   :  { %535 = vmatprep.subr.mxu0 (%p27_p0), %v289_v20  ;;  %570 = vmatprep.subr.mxu1 (%p27_p0), %v321_v21 }
  0x30   :  { %536 = vmatpush3.msra.mxu0 (%p27_p0), %v273_v25 }
  0xdb   : > { %v178_v28 = vpop.f32.mrf.mxu0  ;;  %v219_v29 = vpop.f32.mrf.mxu1 }
  0xdc   : > { %v226_v32 = vadd.f32 %v178_v28, %v31_v26  ;;  %v228_v33 = vadd.f32 %v219_v29, %v33_v27  ;;  %v305_v26 = vld [vmem:[%s893_s3 + $0x128] sm:$0xff] (%p27_p0)  ;;  %v288_v27 = vld [vmem:[%s893_s3 + $0xa0] sm:$0xff] (%p27_p0)  ;;  %v250_v28 = vsub.s32 (%p27_p0), 2, %v241_v13 }
  0xdd   : > { %v180_v34 = vpop.f32.mrf.mxu0  ;;  %v221_v35 = vpop.f32.mrf.mxu1  ;;  %29 = sbr.rel (!%p27_p0) target bundleno = 3 (0x3), region = 49  ;;  %v320_v29 = vld [vmem:[%s893_s3 + $0x1a0] sm:$0xff] (%p27_p0)  ;;  %571 = vmatpush3.msra.mxu1 (%p27_p0), %v305_v26  ;;  %537 = vmatprep.subr.mxu0 (%p27_p0), %v288_v27 }
  0xde   : > { %230 = vst [vmem:[#allocation2 + $0x10] sm:$0xff] %v226_v32  ;;  %232 = vst [vmem:[#allocation2 + $0x18] sm:$0xff] %v228_v33  ;;  %v227_v36 = vadd.f32 %v180_v34, %v32_v30  ;;  %v229_v37 = vadd.f32 %v221_v35, %v34_v31  ;;  %v272_v30 = vld [vmem:[%s893_s3 + $0x20] sm:$0xff] (%p27_p0)  ;;  %v287_v32 = vld [vmem:[%s893_s3 + $0x98] sm:$0xff] (%p27_p0)  ;;  %572 = vmatprep.subr.mxu1 (%p27_p0), %v320_v29 }
  0xdf   : > { %v182_v38 = vpop.f32.mrf.mxu0  ;;  %v223_v39 = vpop.f32.mrf.mxu1  ;;  %v304_v31 = vld [vmem:[%s893_s3 + $0x120] sm:$0xff] (%p27_p0)  ;;  %v319_v35 = vld [vmem:[%s893_s3 + $0x198] sm:$0xff] (%p27_p0)  ;;  %538 = vmatpush3.msra.mxu0 (%p27_p0), %v272_v30 }
  0xe0   : > { %231 = vst [vmem:[#allocation2] sm:$0xff] %v227_v36  ;;  %233 = vst [vmem:[#allocation2 + $0x8] sm:$0xff] %v229_v37  ;;  %v238_v34 = vld [vmem:[%s892_s2] sm:$0xf] (%p27_p0)  ;;  %v271_v36 = vld [vmem:[%s893_s3 + $0x18] sm:$0xff] (%p27_p0)  ;;  %573 = vmatpush3.msra.mxu1 (%p27_p0), %v304_v31  ;;  %539 = vmatprep.subr.mxu0 (%p27_p0), %v287_v32 }
  0xe1   : > { %v183_v40 = vpop.f32.mrf.mxu0  ;;  %v224_v41 = vpop.f32.mrf.mxu1  ;;  %v247_v37 = vrot.slane (%p27_p0), %v238_v34, %v246_v22  ;;  %v255_v39 = vrot.slane (%p27_p0), %v238_v34, %v254_v23  ;;  %v251_v44 = vrot.slane (%p27_p0), %v238_v34, %v250_v28  ;;  %574 = vmatprep.subr.mxu1 (%p27_p0), %v319_v35  ;;  %540 = vmatpush3.msra.mxu0 (%p27_p0), %v271_v36 }
  0xe2   :  { %v243_v40 = vrot.slane %v238_v34, %v242_v24  ;;  %v303_v41 = vld [vmem:[%s893_s3 + $0x118] sm:$0xff]  ;;  %541 = vmatprep.subr.mxu0 %v286_v45 }
  0xe3   :  { %575 = vmatpush3.msra.mxu1 %v303_v41  ;;  %542 = vmatpush3.msra.mxu0 %v270_v48 }
  0xe4   :  { %576 = vmatprep.subr.mxu1 %v318_v46  ;;  %543 = vmatprep.subr.mxu0 %v285_v51 }
  0xe5   :  { %v234_v42 = vld [vmem:[#allocation2 + $0x10] sm:$0xff]  ;;  %v236_v43 = vld [vmem:[#allocation2 + $0x18] sm:$0xff]  ;;  %577 = vmatpush3.msra.mxu1 %v302_v49  ;;  %544 = vmatpush3.msra.mxu0 %v269_v55 }
  0xe6   :  { %v260_v53 = vadd.f32 %v243_v40, %v234_v42  ;;  %v262_v54 = vadd.f32 %v251_v44, %v236_v43  ;;  %578 = vmatprep.subr.mxu1 %v317_v52  ;;  %545 = vmatprep.subr.mxu0 %v284_v57 }
  0xe7   :  { %v235_v33 = vld [vmem:[#allocation2] sm:$0xff]  ;;  %v237_v38 = vld [vmem:[#allocation2 + $0x8] sm:$0xff]  ;;  %579 = vmatpush3.msra.mxu1 %v301_v56  ;;  %546 = vmatpush3.msra.mxu0 %v268_v60 }
  0xe8   :  { %v261_v47 = vadd.f32 %v247_v37, %v235_v33  ;;  %v263_v50 = vadd.f32 %v255_v39, %v237_v38  ;;  %v264_v63 = vmax.f32 %v260_v53, 0.0  ;;  %v266_v0 = vmax.f32 %v262_v54, 0.0  ;;  %580 = vmatprep.subr.mxu1 %v316_v58 }
  0xe9   :  { %581 = vmatpush3.msra.mxu1 %v300_v62 }
  0xea   :  { %v265_v59 = vmax.f32 %v261_v47, 0.0  ;;  %v267_v61 = vmax.f32 %v263_v50, 0.0 }
  0xec   :  { %403 = vmatprep.mubr.f32.mxu0 %v265_v59  ;;  %473 = vmatprep.mubr.f32.mxu1 %v267_v61 }
  0xed   :  { %404 = vmatmul.mubr.f32.vlgmr.msra.gmra.mxu0 %v264_v63  ;;  %474 = vmatmul.mubr.f32.vlgmr.msra.gmra.mxu1 %v266_v0 }
 0x1ad   :  { %v547_v1 = vpop.f32.mrf.mxu0  ;;  %v582_v2 = vpop.f32.mrf.mxu1 }
 0x1af   :  { %v548_v4 = vpop.f32.mrf.mxu0  ;;  %v583_v5 = vpop.f32.mrf.mxu1 }
 0x1b0   :  { %v549_v6 = vadd.f32 %v548_v4, %v547_v1  ;;  %v584_v8 = vadd.f32 %v583_v5, %v582_v2 }
 0x1b2   :  { %v406_v7 = vadd.f32 %v549_v6, %v513_v3 }
 0x1b4   :  { %v476_v9 = vadd.f32 %v584_v8, %v406_v7 }
 0x1b6   :  { %479 = vst [vmem:[%s895_s5] sm:$0xff] %v476_v9 }

// kernel: dqn_forward.4
= control target key start
LH: loop header
LB: loop body
LE: loop exit
PB: predicated region body
PF: predicated region fallthrough
CT: control target
= control target key end

     0   :  { %s739_s9 = smov 0   ;;  %s741_s10 = smov 0   ;;  %s935_s0 = inlined_call_operand.vmem [shape: bf16[32,256], index: 0, kind: input, shape index: {}]   ;;  %s936_s1 = inlined_call_operand.vmem [shape: u8[256,1024], index: 1, kind: input, shape index: {}]   ;;  %s937_s2 = inlined_call_operand.vmem [shape: bf16[32,1024], index: 2, kind: output, shape index: {}]  }
   0x1   :  { %s743_s11 = smov 0  }
   0x2 LB: > { %s633_s12 = sadd.s32 4294967295, %s722_s11   ;;  %s756_s13 = sadd.s32 1, %s722_s11   ;;  %s722_s11 = sphi %s743_s11, %s941_s11   ;;  %s718_s10 = sphi %s741_s10, %s940_s10   ;;  %s714_s9 = sphi %s739_s9, %s939_s9  }
   0x3   : > { %s37_s14 = ssub.s32 %s722_s11, %s756_s13  ;;  %s40_s15 = sadd.s32 1, %s718_s10 }
   0x4   : > { %p38_p0 = scmp.eq.s32.totalorder %s37_s14, 0  ;;  %p47_p1 = scmp.ne.s32.totalorder %s718_s10, %s714_s9 }
   0x5   : > { %p48_p2 = scmp.eq.s32.totalorder %s722_s11, 0  ;;  %p77_p3 = scmp.eq.s32.totalorder %s633_s12, 1 }
   0x6   : > { %s767_s16 = scalar_select %p38_p0, %s718_s10, %s40_s15  }
   0x7   : > { %p49_p4 = por %p48_p2, %p47_p1  ;;  %p769_p5 = por %p77_p3, %p47_p1 }
   0x8   : > { %p636_p6 = scmp.ge.s32.totalorder %s722_s11, 2 }
   0xa   : > { %102 = sbr.rel (%p636_p6) target bundleno = 35 (0x23), region = 20 }
   0xf   : > { %105 = sbr.rel (!%p49_p4) target bundleno = 35 (0x23), region = 24  ;;  %s107_s18 = sand.u32 (%p49_p4), 1, %s718_s10  }
  0x10   : > { %s660_s19 = sshll.u32 (%p49_p4), %s722_s11, 5  ;;  %s637_s20 = sshll.u32 (%p49_p4), %s107_s18, 8 }
  0x11   : > { %s779_s23 = scalar_lea.vmem (%p49_p4), %s936_s1, %s660_s19  ;;  %s784_s24 = scalar_lea.vmem (%p49_p4), [#allocation2], %s637_s20 }
  0x12   : > { %v125_v0 = vld [vmem:[%s779_s23] sm:$0xff] (%p49_p4)  ;;  %v127_v1 = vld [vmem:[%s779_s23 + $0x8] sm:$0xff] (%p49_p4)  ;;  %v129_v2 = vld [vmem:[%s779_s23 + $0x10] sm:$0xff] (%p49_p4) }
  0x13   : > { %126 = vst [vmem:[%s784_s24] sm:$0xff] (%p49_p4), %v125_v0  ;;  %128 = vst [vmem:[%s784_s24 + $0x8] sm:$0xff] (%p49_p4), %v127_v1  ;;  %v131_v3 = vld [vmem:[%s779_s23 + $0x18] sm:$0xff] (%p49_p4)  ;;  %v133_v4 = vld [vmem:[%s779_s23 + $0x40] sm:$0xff] (%p49_p4) }
  0x14   : > { %130 = vst [vmem:[%s784_s24 + $0x10] sm:$0xff] %v129_v2  ;;  %v135_v5 = vld [vmem:[%s779_s23 + $0x48] sm:$0xff]  ;;  %132 = vst [vmem:[%s784_s24 + $0x18] sm:$0xff] %v131_v3  ;;  %v137_v6 = vld [vmem:[%s779_s23 + $0x50] sm:$0xff] }
  0x15   : > { %134 = vst [vmem:[%s784_s24 + $0x20] sm:$0xff] %v133_v4  ;;  %136 = vst [vmem:[%s784_s24 + $0x28] sm:$0xff] %v135_v5  ;;  %v139_v7 = vld [vmem:[%s779_s23 + $0x58] sm:$0xff]  ;;  %v141_v8 = vld [vmem:[%s779_s23 + $0x80] sm:$0xff] }
  0x16   : > { %138 = vst [vmem:[%s784_s24 + $0x30] sm:$0xff] %v137_v6  ;;  %140 = vst [vmem:[%s784_s24 + $0x38] sm:$0xff] %v139_v7  ;;  %v143_v9 = vld [vmem:[%s779_s23 + $0x88] sm:$0xff]  ;;  %v145_v10 = vld [vmem:[%s779_s23 + $0x90] sm:$0xff] }
  0x17   : > { %142 = vst [vmem:[%s784_s24 + $0x40] sm:$0xff] %v141_v8  ;;  %v147_v11 = vld [vmem:[%s779_s23 + $0x98] sm:$0xff]  ;;  %144 = vst [vmem:[%s784_s24 + $0x48] sm:$0xff] %v143_v9  ;;  %v149_v12 = vld [vmem:[%s779_s23 + $0xc0] sm:$0xff] }
  0x18   : > { %146 = vst [vmem:[%s784_s24 + $0x50] sm:$0xff] %v145_v10  ;;  %148 = vst [vmem:[%s784_s24 + $0x58] sm:$0xff] %v147_v11  ;;  %v151_v13 = vld [vmem:[%s779_s23 + $0xc8] sm:$0xff]  ;;  %v153_v14 = vld [vmem:[%s779_s23 + $0xd0] sm:$0xff] }
  0x19   : > { %150 = vst [vmem:[%s784_s24 + $0x60] sm:$0xff] %v149_v12  ;;  %152 = vst [vmem:[%s784_s24 + $0x68] sm:$0xff] %v151_v13  ;;  %v155_v15 = vld [vmem:[%s779_s23 + $0xd8] sm:$0xff]  ;;  %v157_v16 = vld [vmem:[%s779_s23 + $0x100] sm:$0xff] }
  0x1a   : > { %154 = vst [vmem:[%s784_s24 + $0x70] sm:$0xff] %v153_v14  ;;  %v159_v17 = vld [vmem:[%s779_s23 + $0x108] sm:$0xff]  ;;  %156 = vst [vmem:[%s784_s24 + $0x78] sm:$0xff] %v155_v15  ;;  %v161_v18 = vld [vmem:[%s779_s23 + $0x110] sm:$0xff] }
  0x1b   : > { %158 = vst [vmem:[%s784_s24 + $0x80] sm:$0xff] %v157_v16  ;;  %160 = vst [vmem:[%s784_s24 + $0x88] sm:$0xff] %v159_v17  ;;  %v163_v19 = vld [vmem:[%s779_s23 + $0x118] sm:$0xff]  ;;  %v165_v20 = vld [vmem:[%s779_s23 + $0x140] sm:$0xff] }
  0x1c   : > { %162 = vst [vmem:[%s784_s24 + $0x90] sm:$0xff] %v161_v18  ;;  %164 = vst [vmem:[%s784_s24 + $0x98] sm:$0xff] %v163_v19  ;;  %v167_v21 = vld [vmem:[%s779_s23 + $0x148] sm:$0xff]  ;;  %v169_v22 = vld [vmem:[%s779_s23 + $0x150] sm:$0xff] }
  0x1d   : > { %166 = vst [vmem:[%s784_s24 + $0xa0] sm:$0xff] %v165_v20  ;;  %v171_v23 = vld [vmem:[%s779_s23 + $0x158] sm:$0xff]  ;;  %168 = vst [vmem:[%s784_s24 + $0xa8] sm:$0xff] %v167_v21  ;;  %v173_v24 = vld [vmem:[%s779_s23 + $0x180] sm:$0xff] }
  0x1e   : > { %170 = vst [vmem:[%s784_s24 + $0xb0] sm:$0xff] %v169_v22  ;;  %172 = vst [vmem:[%s784_s24 + $0xb8] sm:$0xff] %v171_v23  ;;  %v175_v25 = vld [vmem:[%s779_s23 + $0x188] sm:$0xff]  ;;  %v177_v26 = vld [vmem:[%s779_s23 + $0x190] sm:$0xff] }
  0x1f   : > { %174 = vst [vmem:[%s784_s24 + $0xc0] sm:$0xff] %v173_v24  ;;  %176 = vst [vmem:[%s784_s24 + $0xc8] sm:$0xff] %v175_v25  ;;  %v179_v27 = vld [vmem:[%s779_s23 + $0x198] sm:$0xff]  ;;  %v181_v28 = vld [vmem:[%s779_s23 + $0x1c0] sm:$0xff] }
  0x20   : > { %178 = vst [vmem:[%s784_s24 + $0xd0] sm:$0xff] %v177_v26  ;;  %v183_v29 = vld [vmem:[%s779_s23 + $0x1c8] sm:$0xff]  ;;  %180 = vst [vmem:[%s784_s24 + $0xd8] sm:$0xff] %v179_v27  ;;  %v185_v30 = vld [vmem:[%s779_s23 + $0x1d0] sm:$0xff] }
  0x21   : > { %182 = vst [vmem:[%s784_s24 + $0xe0] sm:$0xff] %v181_v28  ;;  %184 = vst [vmem:[%s784_s24 + $0xe8] sm:$0xff] %v183_v29  ;;  %v187_v31 = vld [vmem:[%s779_s23 + $0x1d8] sm:$0xff] }
  0x22   : > { %186 = vst [vmem:[%s784_s24 + $0xf0] sm:$0xff] %v185_v30  ;;  %188 = vst [vmem:[%s784_s24 + $0xf8] sm:$0xff] %v187_v31 }
  0x23 PF: > { %p640_p7 = scmp.ge.s32.totalorder %s722_s11, 1  ;;  %p193_p8 = scmp.lt.s32.totalorder %s722_s11, 3 }
  0x25   : > { %p194_p9 = pnand %p640_p7, %p193_p8 }
  0x26   : > { %s200_s25 = sand.u32 (!%p194_p9), 1, %s714_s9  }
  0x27   : > { %197 = sbr.rel (%p194_p9) target bundleno = 334 (0x14e), region = 47  ;;  %s641_s26 = sshll.u32 (!%p194_p9), %s200_s25, 8 }
  0x28   : > { %s855_s29 = scalar_lea.vmem (!%p194_p9), [#allocation2], %s641_s26  ;;  %s642_s8 = sshll.u32 (!%p194_p9), %s200_s25, 6 }
  0x29   : > { %s900_s9 = scalar_lea.vmem (!%p194_p9), [#allocation3], %s642_s8 }
  0x2c   : > { %v696_v32 = vld [vmem:[%s935_s0 + $0x4] ss:$8 sps:$4 sm:$0xff]   ;;  %v237_v34 = vld [vmem:[%s855_s29 + $0x78] sm:$0xff]  ;;  %v236_v40 = vld [vmem:[%s855_s29 + $0x70] sm:$0xff]  ;;  %s669_s14 = sshll.u32 (%p769_p5), %s633_s12, 4 }
  0x2d   : > { %v235_v33 = vld [vmem:[%s855_s29 + $0x68] sm:$0xff]  ;;  %v234_v35 = vld [vmem:[%s855_s29 + $0x60] sm:$0xff]  ;;  %374 = vmatprep.mubr.bf16.mxu0 %v696_v32  ;;  %427 = vmatprep.mubr.bf16.mxu1 %v696_v32  ;;  %v281_v38 = vunpack.c.l.u8.bf16 %v237_v34  ;;  %v285_v39 = vunpack.c.h.u8.bf16 %v237_v34  ;;  %v284_v42 = vunpack.c.h.u8.bf16 %v236_v40  ;;  %v233_v44 = vld [vmem:[%s855_s29 + $0x58] sm:$0xff]  ;;  %v280_v46 = vunpack.c.l.u8.bf16 %v236_v40  ;;  %s545_s19 = scalar_lea.vmem (%p769_p5), %s937_s2, %s669_s14 }
  0x2e   : > { %v279_v36 = vunpack.c.l.u8.bf16 %v235_v33  ;;  %v283_v37 = vunpack.c.h.u8.bf16 %v235_v33  ;;  %v282_v41 = vunpack.c.h.u8.bf16 %v234_v35  ;;  %v231_v43 = vld [vmem:[%s855_s29 + $0x48] sm:$0xff]  ;;  %v278_v45 = vunpack.c.l.u8.bf16 %v234_v35  ;;  %v230_v49 = vld [vmem:[%s855_s29 + $0x40] sm:$0xff]  ;;  %v232_v50 = vld [vmem:[%s855_s29 + $0x50] sm:$0xff] }
  0x2f   : > { %395 = vmatprep.subr.bf16.mxu1 %v285_v39  ;;  %v275_v47 = vunpack.c.h.u8.bf16 %v231_v43  ;;  %v277_v48 = vunpack.c.h.u8.bf16 %v233_v44  ;;  %v274_v51 = vunpack.c.h.u8.bf16 %v230_v49  ;;  %v276_v52 = vunpack.c.h.u8.bf16 %v232_v50  ;;  %v227_v55 = vld [vmem:[%s855_s29 + $0x28] sm:$0xff]  ;;  %v229_v56 = vld [vmem:[%s855_s29 + $0x38] sm:$0xff]  ;;  %v226_v61 = vld [vmem:[%s855_s29 + $0x20] sm:$0xff] }
  0x30   : > { %342 = vmatprep.subr.bf16.mxu0 %v283_v37  ;;  %396 = vmatpush1.bf16.msra.mxu1 %v284_v42  ;;  %v271_v53 = vunpack.c.l.u8.bf16 %v231_v43  ;;  %v273_v54 = vunpack.c.l.u8.bf16 %v233_v44  ;;  %v270_v57 = vunpack.c.l.u8.bf16 %v230_v49  ;;  %v272_v58 = vunpack.c.l.u8.bf16 %v232_v50  ;;  %v228_v62 = vld [vmem:[%s855_s29 + $0x30] sm:$0xff]  ;;  %v223_v3 = vld [vmem:[%s855_s29 + $0x8] sm:$0xff]  ;;  %v225_v4 = vld [vmem:[%s855_s29 + $0x18] sm:$0xff] }
  0x31   : > { %343 = vmatpush1.bf16.msra.mxu0 %v282_v41  ;;  %397 = vmatprep.subr.bf16.mxu1 %v281_v38  ;;  %v267_v59 = vunpack.c.h.u8.bf16 %v227_v55  ;;  %v269_v60 = vunpack.c.h.u8.bf16 %v229_v56  ;;  %v266_v63 = vunpack.c.h.u8.bf16 %v226_v61  ;;  %v268_v0 = vunpack.c.h.u8.bf16 %v228_v62  ;;  %v222_v9 = vld [vmem:[%s855_s29] sm:$0xff]  ;;  %v224_v10 = vld [vmem:[%s855_s29 + $0x10] sm:$0xff]  ;;  %v251_v15 = vld [vmem:[%s855_s29 + $0xe8] sm:$0xff] }
  0x32   : > { %344 = vmatprep.subr.bf16.mxu0 %v279_v36  ;;  %v263_v1 = vunpack.c.l.u8.bf16 %v227_v55  ;;  %v265_v2 = vunpack.c.l.u8.bf16 %v229_v56  ;;  %v262_v5 = vunpack.c.l.u8.bf16 %v226_v61  ;;  %v264_v6 = vunpack.c.l.u8.bf16 %v228_v62  ;;  %v253_v16 = vld [vmem:[%s855_s29 + $0xf8] sm:$0xff]  ;;  %v250_v21 = vld [vmem:[%s855_s29 + $0xe0] sm:$0xff]  ;;  %v252_v22 = vld [vmem:[%s855_s29 + $0xf0] sm:$0xff] }
  0x33   : > { %v259_v7 = vunpack.c.h.u8.bf16 %v223_v3  ;;  %v261_v8 = vunpack.c.h.u8.bf16 %v225_v4  ;;  %v258_v11 = vunpack.c.h.u8.bf16 %v222_v9  ;;  %v260_v12 = vunpack.c.h.u8.bf16 %v224_v10  ;;  %v247_v27 = vld [vmem:[%s855_s29 + $0xc8] sm:$0xff]  ;;  %v249_v28 = vld [vmem:[%s855_s29 + $0xd8] sm:$0xff]  ;;  %v246_v33 = vld [vmem:[%s855_s29 + $0xc0] sm:$0xff] }
  0x34   : > { %398 = vmatpush1.bf16.msra.mxu1 %v280_v46  ;;  %v255_v13 = vunpack.c.l.u8.bf16 %v223_v3  ;;  %v257_v14 = vunpack.c.l.u8.bf16 %v225_v4  ;;  %v254_v17 = vunpack.c.l.u8.bf16 %v222_v9  ;;  %v256_v18 = vunpack.c.l.u8.bf16 %v224_v10  ;;  %v248_v34 = vld [vmem:[%s855_s29 + $0xd0] sm:$0xff]  ;;  %v243_v39 = vld [vmem:[%s855_s29 + $0xa8] sm:$0xff]  ;;  %v245_v40 = vld [vmem:[%s855_s29 + $0xb8] sm:$0xff] }
  0x35   : > { %345 = vmatpush1.bf16.msra.mxu0 %v278_v45  ;;  %399 = vmatprep.subr.bf16.mxu1 %v277_v48  ;;  %v315_v19 = vunpack.c.h.u8.bf16 %v251_v15  ;;  %v317_v20 = vunpack.c.h.u8.bf16 %v253_v16  ;;  %v314_v23 = vunpack.c.h.u8.bf16 %v250_v21  ;;  %v316_v24 = vunpack.c.h.u8.bf16 %v252_v22  ;;  %v242_v45 = vld [vmem:[%s855_s29 + $0xa0] sm:$0xff]  ;;  %v244_v46 = vld [vmem:[%s855_s29 + $0xb0] sm:$0xff] }
  0x36   : > { %346 = vmatprep.subr.bf16.mxu0 %v275_v47  ;;  %v311_v25 = vunpack.c.l.u8.bf16 %v251_v15  ;;  %v313_v26 = vunpack.c.l.u8.bf16 %v253_v16  ;;  %v310_v29 = vunpack.c.l.u8.bf16 %v250_v21  ;;  %v312_v30 = vunpack.c.l.u8.bf16 %v252_v22  ;;  %v699_v3 = vld [vmem:[%s935_s0 + $0x10] ss:$8 sps:$4 sm:$0xff]  }
  0x37   : > { %v307_v31 = vunpack.c.h.u8.bf16 %v247_v27  ;;  %v309_v32 = vunpack.c.h.u8.bf16 %v249_v28  ;;  %v306_v35 = vunpack.c.h.u8.bf16 %v246_v33  ;;  %v308_v36 = vunpack.c.h.u8.bf16 %v248_v34 }
  0x38   : > { %400 = vmatpush1.bf16.msra.mxu1 %v276_v52  ;;  %v303_v37 = vunpack.c.l.u8.bf16 %v247_v27  ;;  %v305_v38 = vunpack.c.l.u8.bf16 %v249_v28  ;;  %v302_v41 = vunpack.c.l.u8.bf16 %v246_v33  ;;  %v304_v42 = vunpack.c.l.u8.bf16 %v248_v34  ;;  %v241_v52 = vld [vmem:[%s855_s29 + $0x98] sm:$0xff] }
  0x39   : > { %347 = vmatpush1.bf16.msra.mxu0 %v274_v51  ;;  %401 = vmatprep.subr.bf16.mxu1 %v273_v54  ;;  %v299_v43 = vunpack.c.h.u8.bf16 %v243_v39  ;;  %v301_v44 = vunpack.c.h.u8.bf16 %v245_v40  ;;  %v298_v47 = vunpack.c.h.u8.bf16 %v242_v45  ;;  %v300_v48 = vunpack.c.h.u8.bf16 %v244_v46  ;;  %v239_v51 = vld [vmem:[%s855_s29 + $0x88] sm:$0xff] }
  0x3a   : > { %348 = vmatprep.subr.bf16.mxu0 %v271_v53  ;;  %v295_v49 = vunpack.c.l.u8.bf16 %v243_v39  ;;  %v297_v50 = vunpack.c.l.u8.bf16 %v245_v40  ;;  %v294_v53 = vunpack.c.l.u8.bf16 %v242_v45  ;;  %v296_v54 = vunpack.c.l.u8.bf16 %v244_v46 }
  0x3b   : > { %v291_v55 = vunpack.c.h.u8.bf16 %v239_v51  ;;  %v293_v56 = vunpack.c.h.u8.bf16 %v241_v52  ;;  %v287_v61 = vunpack.c.l.u8.bf16 %v239_v51  ;;  %v289_v62 = vunpack.c.l.u8.bf16 %v241_v52 }
  0x3c   : > { %402 = vmatpush1.bf16.msra.mxu1 %v272_v58  ;;  %v240_v58 = vld [vmem:[%s855_s29 + $0x90] sm:$0xff] }
  0x3d   : > { %349 = vmatpush1.bf16.msra.mxu0 %v270_v57  ;;  %403 = vmatprep.subr.bf16.mxu1 %v269_v60  ;;  %v238_v57 = vld [vmem:[%s855_s29 + $0x80] sm:$0xff]  ;;  %v292_v60 = vunpack.c.h.u8.bf16 %v240_v58 }
  0x3e   : > { %350 = vmatprep.subr.bf16.mxu0 %v267_v59  ;;  %v290_v59 = vunpack.c.h.u8.bf16 %v238_v57 }
  0x40   : > { %404 = vmatpush1.bf16.msra.mxu1 %v268_v0  ;;  %v288_v0 = vunpack.c.l.u8.bf16 %v240_v58 }
  0x41   : > { %351 = vmatpush1.bf16.msra.mxu0 %v266_v63  ;;  %405 = vmatprep.subr.bf16.mxu1 %v265_v2  ;;  %v286_v63 = vunpack.c.l.u8.bf16 %v238_v57  ;;  %v697_v2 = vld [vmem:[%s935_s0 + $0x14] ss:$8 sps:$4 sm:$0xff]  }
  0x42   : > { %352 = vmatprep.subr.bf16.mxu0 %v263_v1  ;;  %v694_v1 = vld [vmem:[%s935_s0] ss:$8 sps:$4 sm:$0xff]  }
  0x44   : > { %406 = vmatpush1.bf16.msra.mxu1 %v264_v6 }
  0x45   : > { %353 = vmatpush1.bf16.msra.mxu0 %v262_v5  ;;  %407 = vmatprep.subr.bf16.mxu1 %v261_v8 }
  0x46   : > { %354 = vmatprep.subr.bf16.mxu0 %v259_v7 }
  0x48   : > { %408 = vmatpush1.bf16.msra.mxu1 %v260_v12 }
  0x49   : > { %355 = vmatpush1.bf16.msra.mxu0 %v258_v11  ;;  %409 = vmatprep.subr.bf16.mxu1 %v257_v14 }
  0x4a   : > { %356 = vmatprep.subr.bf16.mxu0 %v255_v13 }
  0x4c   : > { %410 = vmatpush1.bf16.msra.mxu1 %v256_v18 }
  0x4d   : > { %357 = vmatpush1.bf16.msra.mxu0 %v254_v17  ;;  %411 = vmatprep.subr.bf16.mxu1 %v317_v20 }
  0x4e   : > { %358 = vmatprep.subr.bf16.mxu0 %v315_v19 }
  0x50   : > { %412 = vmatpush2.bf16.msra.mxu1 %v316_v24 }
  0x51   : > { %359 = vmatpush2.bf16.msra.mxu0 %v314_v23  ;;  %413 = vmatprep.subr.bf16.mxu1 %v313_v26 }
  0x52   : > { %360 = vmatprep.subr.bf16.mxu0 %v311_v25 }
  0x54   : > { %414 = vmatpush2.bf16.msra.mxu1 %v312_v30 }
  0x55   : > { %361 = vmatpush2.bf16.msra.mxu0 %v310_v29  ;;  %415 = vmatprep.subr.bf16.mxu1 %v309_v32 }
  0x56   : > { %362 = vmatprep.subr.bf16.mxu0 %v307_v31 }
  0x58   : > { %416 = vmatpush2.bf16.msra.mxu1 %v308_v36 }
  0x59   : > { %363 = vmatpush2.bf16.msra.mxu0 %v306_v35  ;;  %417 = vmatprep.subr.bf16.mxu1 %v305_v38 }
  0x5a   : > { %364 = vmatprep.subr.bf16.mxu0 %v303_v37 }
  0x5c   : > { %418 = vmatpush2.bf16.msra.mxu1 %v304_v42 }
  0x5d   : > { %365 = vmatpush2.bf16.msra.mxu0 %v302_v41  ;;  %419 = vmatprep.subr.bf16.mxu1 %v301_v44 }
  0x5e   : > { %366 = vmatprep.subr.bf16.mxu0 %v299_v43 }
  0x60   : > { %420 = vmatpush2.bf16.msra.mxu1 %v300_v48 }
  0x61   : > { %367 = vmatpush2.bf16.msra.mxu0 %v298_v47  ;;  %421 = vmatprep.subr.bf16.mxu1 %v297_v50 }
  0x62   : > { %368 = vmatprep.subr.bf16.mxu0 %v295_v49 }
  0x64   : > { %422 = vmatpush2.bf16.msra.mxu1 %v296_v54 }
  0x65   : > { %369 = vmatpush2.bf16.msra.mxu0 %v294_v53  ;;  %423 = vmatprep.subr.bf16.mxu1 %v293_v56 }
  0x66   : > { %370 = vmatprep.subr.bf16.mxu0 %v291_v55 }
  0x68   : > { %424 = vmatpush2.bf16.msra.mxu1 %v292_v60 }
  0x69   : > { %371 = vmatpush2.bf16.msra.mxu0 %v290_v59  ;;  %425 = vmatprep.subr.bf16.mxu1 %v289_v62 }
  0x6a   : > { %372 = vmatprep.subr.bf16.mxu0 %v287_v61 }
  0x6c   : > { %426 = vmatpush2.bf16.msra.mxu1 %v288_v0 }
  0x6d   : > { %373 = vmatpush2.bf16.msra.mxu0 %v286_v63 }
  0x6f   : > { %428 = vmatmul.mubr.bf16.vlgmr.msra.gmra.mxu1 %v694_v1 }
  0x70   : > { %375 = vmatmul.mubr.bf16.vlgmr.msra.gmra.mxu0 %v694_v1  ;;  %437 = vmatprep.mubr.bf16.mxu1 %v697_v2 }
  0x71   : > { %384 = vmatprep.mubr.bf16.mxu0 %v697_v2 }
  0x77   : > { %438 = vmatmul.mubr.bf16.gmra.mxu1 %v699_v3 }
  0x78   : > { %385 = vmatmul.mubr.bf16.gmra.mxu0 %v699_v3 }
 0x12f   : > { %v429_v5 = vpop.f32.mrf.mxu1 }
 0x130   : > { %v376_v4 = vpop.f32.mrf.mxu0  ;;  %v450_v7 = vmul.f32 0.003921569, %v429_v5 }
 0x131   : > { %v448_v6 = vmul.f32 0.003921569, %v376_v4  ;;  %v431_v9 = vpop.f32.mrf.mxu1 }
 0x132   : > { %v378_v8 = vpop.f32.mrf.mxu0  ;;  %v451_v11 = vmul.f32 0.003921569, %v431_v9  ;;  %v466_v15 = vmax.f32 %v450_v7, 0.0 }
 0x133   : > { %v449_v10 = vmul.f32 0.003921569, %v378_v8  ;;  %v433_v13 = vpop.f32.mrf.mxu1  ;;  %v464_v14 = vmax.f32 %v448_v6, 0.0 }
 0x134   : > { %v380_v12 = vpop.f32.mrf.mxu0  ;;  %v467_v17 = vmax.f32 %v451_v11, 0.0  ;;  %v454_v19 = vmul.f32 0.003921569, %v433_v13 }
 0x135   : > { %v465_v16 = vmax.f32 %v449_v10, 0.0  ;;  %v452_v18 = vmul.f32 0.003921569, %v380_v12  ;;  %v435_v21 = vpop.f32.mrf.mxu1 }
 0x136   : > { %v382_v20 = vpop.f32.mrf.mxu0  ;;  %v662_v23 = vpack.c.bf16 %v467_v17, %v466_v15  ;;  %v455_v25 = vmul.f32 0.003921569, %v435_v21  ;;  %v470_v31 = vmax.f32 %v454_v19, 0.0 }
 0x137   : > { %v661_v22 = vpack.c.bf16 %v465_v16, %v464_v14  ;;  %v453_v24 = vmul.f32 0.003921569, %v382_v20  ;;  %v439_v27 = vpop.f32.mrf.mxu1  ;;  %v468_v30 = vmax.f32 %v452_v18, 0.0 }
 0x138   : > { %v386_v26 = vpop.f32.mrf.mxu0  ;;  %529 = vst [vmem:[%s900_s9 + $0x8] sm:$0xff] %v662_v23  ;;  %v458_v29 = vmul.f32 0.003921569, %v439_v27  ;;  %v471_v33 = vmax.f32 %v455_v25, 0.0 }
 0x139   : > { %528 = vst [vmem:[%s900_s9] sm:$0xff] %v661_v22  ;;  %v456_v28 = vmul.f32 0.003921569, %v386_v26  ;;  %v469_v32 = vmax.f32 %v453_v24, 0.0  ;;  %v441_v35 = vpop.f32.mrf.mxu1 }
 0x13a   : > { %v388_v34 = vpop.f32.mrf.mxu0  ;;  %v459_v37 = vmul.f32 0.003921569, %v441_v35  ;;  %v664_v39 = vpack.c.bf16 %v471_v33, %v470_v31  ;;  %v474_v43 = vmax.f32 %v458_v29, 0.0 }
 0x13b   : > { %v457_v36 = vmul.f32 0.003921569, %v388_v34  ;;  %v663_v38 = vpack.c.bf16 %v469_v32, %v468_v30  ;;  %v443_v41 = vpop.f32.mrf.mxu1  ;;  %v472_v42 = vmax.f32 %v456_v28, 0.0 }
 0x13c   : > { %v390_v40 = vpop.f32.mrf.mxu0  ;;  %v475_v45 = vmax.f32 %v459_v37, 0.0  ;;  %531 = vst [vmem:[%s900_s9 + $0x18] sm:$0xff] %v664_v39  ;;  %v462_v47 = vmul.f32 0.003921569, %v443_v41 }
 0x13d   : > { %v473_v44 = vmax.f32 %v457_v36, 0.0  ;;  %530 = vst [vmem:[%s900_s9 + $0x10] sm:$0xff] %v663_v38  ;;  %v460_v46 = vmul.f32 0.003921569, %v390_v40  ;;  %v445_v49 = vpop.f32.mrf.mxu1 }
 0x13e   : > { %v392_v48 = vpop.f32.mrf.mxu0  ;;  %v666_v51 = vpack.c.bf16 %v475_v45, %v474_v43  ;;  %v463_v53 = vmul.f32 0.003921569, %v445_v49  ;;  %v478_v55 = vmax.f32 %v462_v47, 0.0 }
 0x13f   : > { %v665_v50 = vpack.c.bf16 %v473_v44, %v472_v42  ;;  %v461_v52 = vmul.f32 0.003921569, %v392_v48  ;;  %v476_v54 = vmax.f32 %v460_v46, 0.0  ;;  %v560_v61 = vld [vmem:[%s900_s9 + $0x8] sm:$0xff] (%p769_p5) }
 0x140   : > { %533 = vst [vmem:[%s900_s9 + $0x28] sm:$0xff] %v666_v51  ;;  %v479_v57 = vmax.f32 %v463_v53, 0.0  ;;  %v558_v60 = vld [vmem:[%s900_s9] sm:$0xff] (%p769_p5)  ;;  %561 = vst [vmem:[%s545_s19 + $0x8] sm:$0xff] (%p769_p5), %v560_v61 }
 0x141   : > { %532 = vst [vmem:[%s900_s9 + $0x20] sm:$0xff] %v665_v50  ;;  %v477_v56 = vmax.f32 %v461_v52, 0.0  ;;  %542 = sbr.rel (!%p769_p5) target bundleno = 334 (0x14e), region = 55  ;;  %559 = vst [vmem:[%s545_s19] sm:$0xff] (%p769_p5), %v558_v60 }
 0x142   : > { %v668_v59 = vpack.c.bf16 %v479_v57, %v478_v55 }
 0x143   : > { %v667_v58 = vpack.c.bf16 %v477_v56, %v476_v54  ;;  %v564_v63 = vld [vmem:[%s900_s9 + $0x18] sm:$0xff] (%p769_p5) }
 0x144   : > { %535 = vst [vmem:[%s900_s9 + $0x38] sm:$0xff] %v668_v59  ;;  %v562_v62 = vld [vmem:[%s900_s9 + $0x10] sm:$0xff] (%p769_p5)  ;;  %565 = vst [vmem:[%s545_s19 + $0x28] sm:$0xff] (%p769_p5), %v564_v63 }
 0x145   : > { %534 = vst [vmem:[%s900_s9 + $0x30] sm:$0xff] %v667_v58  ;;  %563 = vst [vmem:[%s545_s19 + $0x20] sm:$0xff] (%p769_p5), %v562_v62 }
 0x147   : > { %v568_v1 = vld [vmem:[%s900_s9 + $0x28] sm:$0xff] }
 0x148   : > { %v566_v0 = vld [vmem:[%s900_s9 + $0x20] sm:$0xff]  ;;  %569 = vst [vmem:[%s545_s19 + $0x48] sm:$0xff] %v568_v1 }
 0x149   : > { %567 = vst [vmem:[%s545_s19 + $0x40] sm:$0xff] %v566_v0 }
 0x14b   : > { %v572_v3 = vld [vmem:[%s900_s9 + $0x38] sm:$0xff] }
 0x14c   : > { %v570_v2 = vld [vmem:[%s900_s9 + $0x30] sm:$0xff]  ;;  %573 = vst [vmem:[%s545_s19 + $0x68] sm:$0xff] %v572_v3 }
 0x14d   : > { %571 = vst [vmem:[%s545_s19 + $0x60] sm:$0xff] %v570_v2 }
 0x14e PF: > { %p9_p10 = scmp.ge.s32.totalorder %s756_s13, 4   ;;  %s939_s9 = smov %s718_s10 }
 0x14f   : > { %s940_s10 = smov %s767_s16  ;;  %s941_s11 = smov %s756_s13 }
 0x150   :  { %11 = sbr.rel (!%p9_p10) target bundleno = 2 (0x2), region = 109 }

// kernel: dqn_forward.5
= control target key start
LH: loop header
LB: loop body
LE: loop exit
PB: predicated region body
PF: predicated region fallthrough
CT: control target
= control target key end

     0   :  { %s1397_s9 = smov 0   ;;  %s1399_s10 = smov 0   ;;  %s1689_s0 = inlined_call_operand.vmem [shape: bf16[64,512], index: 0, kind: input, shape index: {}]   ;;  %s1690_s1 = inlined_call_operand.vmem [shape: bf16[512,256], index: 1, kind: input, shape index: {}]   ;;  %s1691_s2 = inlined_call_operand.vmem [shape: bf16[64,256], index: 2, kind: output, shape index: {}]  }
   0x1   :  { %s1401_s11 = smov 0  }
   0x2 LB: > { %s1098_s12 = sadd.s32 4294967295, %s1380_s11   ;;  %s1414_s13 = sadd.s32 1, %s1380_s11   ;;  %s1380_s11 = sphi %s1401_s11, %s1695_s11   ;;  %s1376_s10 = sphi %s1399_s10, %s1694_s10   ;;  %s1372_s9 = sphi %s1397_s9, %s1693_s9  }
   0x3   : > { %s37_s14 = ssub.s32 %s1380_s11, %s1414_s13  ;;  %s40_s15 = sadd.s32 1, %s1376_s10 }
   0x4   : > { %p38_p0 = scmp.eq.s32.totalorder %s37_s14, 0  ;;  %p47_p1 = scmp.ne.s32.totalorder %s1376_s10, %s1372_s9 }
   0x5   : > { %p48_p2 = scmp.eq.s32.totalorder %s1380_s11, 0  ;;  %p77_p3 = scmp.eq.s32.totalorder %s1098_s12, 1 }
   0x6   : > { %s1425_s16 = scalar_select %p38_p0, %s1376_s10, %s40_s15  }
   0x7   : > { %p49_p4 = por %p48_p2, %p47_p1  ;;  %p1427_p5 = por %p77_p3, %p47_p1 }
   0x8   : > { %p1101_p6 = scmp.ge.s32.totalorder %s1380_s11, 2 }
   0xa   : > { %102 = sbr.rel (%p1101_p6) target bundleno = 61 (0x3d), region = 20 }
   0xf   : > { %105 = sbr.rel (!%p49_p4) target bundleno = 61 (0x3d), region = 24  ;;  %s107_s18 = sand.u32 (%p49_p4), 1, %s1376_s10  }
  0x10   : > { %s1103_s19 = sshll.u32 (%p49_p4), %s1380_s11, 2  ;;  %s1102_s20 = sshll.u32 (%p49_p4), %s107_s18, 8 }
  0x11   : > { %s1437_s23 = scalar_lea.vmem (%p49_p4), %s1690_s1, %s1103_s19  ;;  %s1441_s24 = scalar_lea.vmem (%p49_p4), [#allocation2], %s1102_s20 }
  0x12   : > { %v128_v0 = vld [vmem:[%s1437_s23] sm:$0xf] (%p49_p4)  ;;  %v130_v1 = vld [vmem:[%s1437_s23 + $0x8] sm:$0xf] (%p49_p4)  ;;  %v132_v2 = vld [vmem:[%s1437_s23 + $0x10] sm:$0xf] (%p49_p4) }
  0x13   : > { %129 = vst [vmem:[%s1441_s24] sm:$0xf] (%p49_p4), %v128_v0  ;;  %131 = vst [vmem:[%s1441_s24 + $0x4] sm:$0xf] (%p49_p4), %v130_v1  ;;  %v134_v3 = vld [vmem:[%s1437_s23 + $0x18] sm:$0xf] (%p49_p4) }
  0x14   : > { %v136_v4 = vld [vmem:[%s1437_s23 + $0x20] sm:$0xf]  ;;  %133 = vst [vmem:[%s1441_s24 + $0x8] sm:$0xf] %v132_v2  ;;  %135 = vst [vmem:[%s1441_s24 + $0xc] sm:$0xf] %v134_v3 }
  0x15   : > { %137 = vst [vmem:[%s1441_s24 + $0x10] sm:$0xf] %v136_v4  ;;  %v138_v5 = vld [vmem:[%s1437_s23 + $0x28] sm:$0xf]  ;;  %v140_v6 = vld [vmem:[%s1437_s23 + $0x30] sm:$0xf] }
  0x16   : > { %v142_v7 = vld [vmem:[%s1437_s23 + $0x38] sm:$0xf]  ;;  %139 = vst [vmem:[%s1441_s24 + $0x14] sm:$0xf] %v138_v5  ;;  %141 = vst [vmem:[%s1441_s24 + $0x18] sm:$0xf] %v140_v6 }
  0x17   : > { %143 = vst [vmem:[%s1441_s24 + $0x1c] sm:$0xf] %v142_v7  ;;  %v144_v8 = vld [vmem:[%s1437_s23 + $0x40] sm:$0xf]  ;;  %v146_v9 = vld [vmem:[%s1437_s23 + $0x48] sm:$0xf] }
  0x18   : > { %v148_v10 = vld [vmem:[%s1437_s23 + $0x50] sm:$0xf]  ;;  %145 = vst [vmem:[%s1441_s24 + $0x20] sm:$0xf] %v144_v8  ;;  %147 = vst [vmem:[%s1441_s24 + $0x24] sm:$0xf] %v146_v9 }
  0x19   : > { %149 = vst [vmem:[%s1441_s24 + $0x28] sm:$0xf] %v148_v10  ;;  %v150_v11 = vld [vmem:[%s1437_s23 + $0x58] sm:$0xf]  ;;  %v152_v12 = vld [vmem:[%s1437_s23 + $0x60] sm:$0xf] }
  0x1a   : > { %v154_v13 = vld [vmem:[%s1437_s23 + $0x68] sm:$0xf]  ;;  %151 = vst [vmem:[%s1441_s24 + $0x2c] sm:$0xf] %v150_v11  ;;  %153 = vst [vmem:[%s1441_s24 + $0x30] sm:$0xf] %v152_v12 }
  0x1b   : > { %155 = vst [vmem:[%s1441_s24 + $0x34] sm:$0xf] %v154_v13  ;;  %v156_v14 = vld [vmem:[%s1437_s23 + $0x70] sm:$0xf]  ;;  %v158_v15 = vld [vmem:[%s1437_s23 + $0x78] sm:$0xf] }
  0x1c   : > { %v160_v16 = vld [vmem:[%s1437_s23 + $0x80] sm:$0xf]  ;;  %157 = vst [vmem:[%s1441_s24 + $0x38] sm:$0xf] %v156_v14  ;;  %159 = vst [vmem:[%s1441_s24 + $0x3c] sm:$0xf] %v158_v15 }
  0x1d   : > { %161 = vst [vmem:[%s1441_s24 + $0x40] sm:$0xf] %v160_v16  ;;  %v162_v17 = vld [vmem:[%s1437_s23 + $0x88] sm:$0xf]  ;;  %v164_v18 = vld [vmem:[%s1437_s23 + $0x90] sm:$0xf] }
  0x1e   : > { %v166_v19 = vld [vmem:[%s1437_s23 + $0x98] sm:$0xf]  ;;  %163 = vst [vmem:[%s1441_s24 + $0x44] sm:$0xf] %v162_v17  ;;  %165 = vst [vmem:[%s1441_s24 + $0x48] sm:$0xf] %v164_v18 }
  0x1f   : > { %167 = vst [vmem:[%s1441_s24 + $0x4c] sm:$0xf] %v166_v19  ;;  %v168_v20 = vld [vmem:[%s1437_s23 + $0xa0] sm:$0xf]  ;;  %v170_v21 = vld [vmem:[%s1437_s23 + $0xa8] sm:$0xf] }
  0x20   : > { %v172_v22 = vld [vmem:[%s1437_s23 + $0xb0] sm:$0xf]  ;;  %169 = vst [vmem:[%s1441_s24 + $0x50] sm:$0xf] %v168_v20  ;;  %171 = vst [vmem:[%s1441_s24 + $0x54] sm:$0xf] %v170_v21 }
  0x21   : > { %173 = vst [vmem:[%s1441_s24 + $0x58] sm:$0xf] %v172_v22  ;;  %v174_v23 = vld [vmem:[%s1437_s23 + $0xb8] sm:$0xf]  ;;  %v176_v24 = vld [vmem:[%s1437_s23 + $0xc0] sm:$0xf] }
  0x22   : > { %v178_v25 = vld [vmem:[%s1437_s23 + $0xc8] sm:$0xf]  ;;  %175 = vst [vmem:[%s1441_s24 + $0x5c] sm:$0xf] %v174_v23  ;;  %177 = vst [vmem:[%s1441_s24 + $0x60] sm:$0xf] %v176_v24 }
  0x23   : > { %179 = vst [vmem:[%s1441_s24 + $0x64] sm:$0xf] %v178_v25  ;;  %v180_v26 = vld [vmem:[%s1437_s23 + $0xd0] sm:$0xf]  ;;  %v182_v27 = vld [vmem:[%s1437_s23 + $0xd8] sm:$0xf] }
  0x24   : > { %v184_v28 = vld [vmem:[%s1437_s23 + $0xe0] sm:$0xf]  ;;  %181 = vst [vmem:[%s1441_s24 + $0x68] sm:$0xf] %v180_v26  ;;  %183 = vst [vmem:[%s1441_s24 + $0x6c] sm:$0xf] %v182_v27 }
  0x25   : > { %185 = vst [vmem:[%s1441_s24 + $0x70] sm:$0xf] %v184_v28  ;;  %v186_v29 = vld [vmem:[%s1437_s23 + $0xe8] sm:$0xf]  ;;  %v188_v30 = vld [vmem:[%s1437_s23 + $0xf0] sm:$0xf] }
  0x26   : > { %v190_v31 = vld [vmem:[%s1437_s23 + $0xf8] sm:$0xf]  ;;  %187 = vst [vmem:[%s1441_s24 + $0x74] sm:$0xf] %v186_v29  ;;  %189 = vst [vmem:[%s1441_s24 + $0x78] sm:$0xf] %v188_v30 }
  0x27   : > { %191 = vst [vmem:[%s1441_s24 + $0x7c] sm:$0xf] %v190_v31  ;;  %v192_v32 = vld [vmem:[%s1437_s23 + $0x100] sm:$0xf]  ;;  %v194_v33 = vld [vmem:[%s1437_s23 + $0x108] sm:$0xf] }
  0x28   : > { %v196_v34 = vld [vmem:[%s1437_s23 + $0x110] sm:$0xf]  ;;  %193 = vst [vmem:[%s1441_s24 + $0x80] sm:$0xf] %v192_v32  ;;  %195 = vst [vmem:[%s1441_s24 + $0x84] sm:$0xf] %v194_v33 }
  0x29   : > { %197 = vst [vmem:[%s1441_s24 + $0x88] sm:$0xf] %v196_v34  ;;  %v198_v35 = vld [vmem:[%s1437_s23 + $0x118] sm:$0xf]  ;;  %v200_v36 = vld [vmem:[%s1437_s23 + $0x120] sm:$0xf] }
  0x2a   : > { %v202_v37 = vld [vmem:[%s1437_s23 + $0x128] sm:$0xf]  ;;  %199 = vst [vmem:[%s1441_s24 + $0x8c] sm:$0xf] %v198_v35  ;;  %201 = vst [vmem:[%s1441_s24 + $0x90] sm:$0xf] %v200_v36 }
  0x2b   : > { %203 = vst [vmem:[%s1441_s24 + $0x94] sm:$0xf] %v202_v37  ;;  %v204_v38 = vld [vmem:[%s1437_s23 + $0x130] sm:$0xf]  ;;  %v206_v39 = vld [vmem:[%s1437_s23 + $0x138] sm:$0xf] }
  0x2c   : > { %v208_v40 = vld [vmem:[%s1437_s23 + $0x140] sm:$0xf]  ;;  %205 = vst [vmem:[%s1441_s24 + $0x98] sm:$0xf] %v204_v38  ;;  %207 = vst [vmem:[%s1441_s24 + $0x9c] sm:$0xf] %v206_v39 }
  0x2d   : > { %209 = vst [vmem:[%s1441_s24 + $0xa0] sm:$0xf] %v208_v40  ;;  %v210_v41 = vld [vmem:[%s1437_s23 + $0x148] sm:$0xf]  ;;  %v212_v42 = vld [vmem:[%s1437_s23 + $0x150] sm:$0xf] }
  0x2e   : > { %v214_v43 = vld [vmem:[%s1437_s23 + $0x158] sm:$0xf]  ;;  %211 = vst [vmem:[%s1441_s24 + $0xa4] sm:$0xf] %v210_v41  ;;  %213 = vst [vmem:[%s1441_s24 + $0xa8] sm:$0xf] %v212_v42 }
  0x2f   : > { %215 = vst [vmem:[%s1441_s24 + $0xac] sm:$0xf] %v214_v43  ;;  %v216_v44 = vld [vmem:[%s1437_s23 + $0x160] sm:$0xf]  ;;  %v218_v45 = vld [vmem:[%s1437_s23 + $0x168] sm:$0xf] }
  0x30   : > { %v220_v46 = vld [vmem:[%s1437_s23 + $0x170] sm:$0xf]  ;;  %217 = vst [vmem:[%s1441_s24 + $0xb0] sm:$0xf] %v216_v44  ;;  %219 = vst [vmem:[%s1441_s24 + $0xb4] sm:$0xf] %v218_v45 }
  0x31   : > { %221 = vst [vmem:[%s1441_s24 + $0xb8] sm:$0xf] %v220_v46  ;;  %v222_v47 = vld [vmem:[%s1437_s23 + $0x178] sm:$0xf]  ;;  %v224_v48 = vld [vmem:[%s1437_s23 + $0x180] sm:$0xf] }
  0x32   : > { %v226_v49 = vld [vmem:[%s1437_s23 + $0x188] sm:$0xf]  ;;  %223 = vst [vmem:[%s1441_s24 + $0xbc] sm:$0xf] %v222_v47  ;;  %225 = vst [vmem:[%s1441_s24 + $0xc0] sm:$0xf] %v224_v48 }
  0x33   : > { %227 = vst [vmem:[%s1441_s24 + $0xc4] sm:$0xf] %v226_v49  ;;  %v228_v50 = vld [vmem:[%s1437_s23 + $0x190] sm:$0xf]  ;;  %v230_v51 = vld [vmem:[%s1437_s23 + $0x198] sm:$0xf] }
  0x34   : > { %v232_v52 = vld [vmem:[%s1437_s23 + $0x1a0] sm:$0xf]  ;;  %229 = vst [vmem:[%s1441_s24 + $0xc8] sm:$0xf] %v228_v50  ;;  %231 = vst [vmem:[%s1441_s24 + $0xcc] sm:$0xf] %v230_v51 }
  0x35   : > { %233 = vst [vmem:[%s1441_s24 + $0xd0] sm:$0xf] %v232_v52  ;;  %v234_v53 = vld [vmem:[%s1437_s23 + $0x1a8] sm:$0xf]  ;;  %v236_v54 = vld [vmem:[%s1437_s23 + $0x1b0] sm:$0xf] }
  0x36   : > { %v238_v55 = vld [vmem:[%s1437_s23 + $0x1b8] sm:$0xf]  ;;  %235 = vst [vmem:[%s1441_s24 + $0xd4] sm:$0xf] %v234_v53  ;;  %237 = vst [vmem:[%s1441_s24 + $0xd8] sm:$0xf] %v236_v54 }
  0x37   : > { %239 = vst [vmem:[%s1441_s24 + $0xdc] sm:$0xf] %v238_v55  ;;  %v240_v56 = vld [vmem:[%s1437_s23 + $0x1c0] sm:$0xf]  ;;  %v242_v57 = vld [vmem:[%s1437_s23 + $0x1c8] sm:$0xf] }
  0x38   : > { %v244_v58 = vld [vmem:[%s1437_s23 + $0x1d0] sm:$0xf]  ;;  %241 = vst [vmem:[%s1441_s24 + $0xe0] sm:$0xf] %v240_v56  ;;  %243 = vst [vmem:[%s1441_s24 + $0xe4] sm:$0xf] %v242_v57 }
  0x39   : > { %245 = vst [vmem:[%s1441_s24 + $0xe8] sm:$0xf] %v244_v58  ;;  %v246_v59 = vld [vmem:[%s1437_s23 + $0x1d8] sm:$0xf]  ;;  %v248_v60 = vld [vmem:[%s1437_s23 + $0x1e0] sm:$0xf] }
  0x3a   : > { %v250_v61 = vld [vmem:[%s1437_s23 + $0x1e8] sm:$0xf]  ;;  %247 = vst [vmem:[%s1441_s24 + $0xec] sm:$0xf] %v246_v59  ;;  %249 = vst [vmem:[%s1441_s24 + $0xf0] sm:$0xf] %v248_v60 }
  0x3b   : > { %251 = vst [vmem:[%s1441_s24 + $0xf4] sm:$0xf] %v250_v61  ;;  %v252_v62 = vld [vmem:[%s1437_s23 + $0x1f0] sm:$0xf]  ;;  %v254_v63 = vld [vmem:[%s1437_s23 + $0x1f8] sm:$0xf] }
  0x3c   : > { %253 = vst [vmem:[%s1441_s24 + $0xf8] sm:$0xf] %v252_v62  ;;  %255 = vst [vmem:[%s1441_s24 + $0xfc] sm:$0xf] %v254_v63 }
  0x3d PF: > { %p1104_p7 = scmp.ge.s32.totalorder %s1380_s11, 1  ;;  %p406_p8 = scmp.lt.s32.totalorder %s1380_s11, 3 }
  0x3f   : > { %p407_p9 = pnand %p1104_p7, %p406_p8 }
  0x40   : > { %s413_s25 = sand.u32 (!%p407_p9), 1, %s1372_s9  }
  0x41   : > { %410 = sbr.rel (%p407_p9) target bundleno = 346 (0x15a), region = 65  ;;  %s1105_s26 = sshll.u32 (!%p407_p9), %s413_s25, 8 }
  0x42   : > { %s1580_s3 = scalar_lea.vmem (!%p407_p9), [#allocation2], %s1105_s26  ;;  %s1106_s19 = sshll.u32 (!%p407_p9), %s413_s25, 5 }
  0x43   : > { %s1658_s20 = scalar_lea.vmem (!%p407_p9), [#allocation3], %s1106_s19 }
  0x46   : > { %v1336_v0 = vld [vmem:[%s1689_s0 + $0x4] ss:$16 sps:$4 sm:$0xff]   ;;  %v1339_v1 = vld [vmem:[%s1689_s0 + $0xc] ss:$16 sps:$4 sm:$0xff]   ;;  %v1334_v32 = vld [vmem:[%s1689_s0] ss:$16 sps:$4 sm:$0xff]  }
  0x47   : > { %v1302_v2 = vld [vmem:[%s1580_s3 + $0x78] sm:$0xff]   ;;  %818 = vmatprep.mubr.bf16.mxu0 %v1336_v0  ;;  %883 = vmatprep.mubr.bf16.mxu1 %v1339_v1  ;;  %v1306_v6 = vld [vmem:[%s1580_s3 + $0x70] sm:$0xff]   ;;  %v1310_v10 = vld [vmem:[%s1580_s3 + $0x68] sm:$0xff]   ;;  %s1164_s9 = sshll.u32 (%p1427_p5), %s1098_s12, 2 }
  0x48   : > { %v1303_v3 = vld [vmem:[%s1580_s3 + $0xf8] sm:$0xff]   ;;  %1198 = vmatprep.subr.bf16.mxu0 %v1302_v2  ;;  %v1307_v7 = vld [vmem:[%s1580_s3 + $0xf0] sm:$0xff]   ;;  %v1311_v11 = vld [vmem:[%s1580_s3 + $0xe8] sm:$0xff]   ;;  %s972_s22 = scalar_lea.vmem (%p1427_p5), %s1691_s2, %s1164_s9 }
  0x49   : > { %v1304_v4 = vld [vmem:[%s1580_s3 + $0x38] sm:$0xff]   ;;  %1238 = vmatprep.subr.bf16.mxu1 %v1303_v3  ;;  %v1308_v8 = vld [vmem:[%s1580_s3 + $0x30] sm:$0xff]   ;;  %v1312_v12 = vld [vmem:[%s1580_s3 + $0x28] sm:$0xff]  }
  0x4a   : > { %v1305_v5 = vld [vmem:[%s1580_s3 + $0xb8] sm:$0xff]   ;;  %1199 = vmatpush3.bf16.msra.mxu0 %v1304_v4  ;;  %v1309_v9 = vld [vmem:[%s1580_s3 + $0xb0] sm:$0xff]   ;;  %v1313_v13 = vld [vmem:[%s1580_s3 + $0xa8] sm:$0xff]  }
  0x4b   : > { %1239 = vmatpush3.bf16.msra.mxu1 %v1305_v5  ;;  %1200 = vmatprep.subr.bf16.mxu0 %v1306_v6  ;;  %v1314_v14 = vld [vmem:[%s1580_s3 + $0x60] sm:$0xff]   ;;  %v1318_v18 = vld [vmem:[%s1580_s3 + $0x58] sm:$0xff]   ;;  %v1322_v22 = vld [vmem:[%s1580_s3 + $0x50] sm:$0xff]  }
  0x4c   : > { %1240 = vmatprep.subr.bf16.mxu1 %v1307_v7  ;;  %v1315_v15 = vld [vmem:[%s1580_s3 + $0xe0] sm:$0xff]   ;;  %v1319_v19 = vld [vmem:[%s1580_s3 + $0xd8] sm:$0xff]   ;;  %v1323_v23 = vld [vmem:[%s1580_s3 + $0xd0] sm:$0xff]  }
  0x4d   : > { %v1316_v16 = vld [vmem:[%s1580_s3 + $0x20] sm:$0xff]   ;;  %v1320_v20 = vld [vmem:[%s1580_s3 + $0x18] sm:$0xff]   ;;  %v1324_v24 = vld [vmem:[%s1580_s3 + $0x10] sm:$0xff]  }
  0x4e   : > { %1201 = vmatpush3.bf16.msra.mxu0 %v1308_v8  ;;  %v1317_v17 = vld [vmem:[%s1580_s3 + $0xa0] sm:$0xff]   ;;  %v1321_v21 = vld [vmem:[%s1580_s3 + $0x98] sm:$0xff]   ;;  %v1325_v25 = vld [vmem:[%s1580_s3 + $0x90] sm:$0xff]  }
  0x4f   : > { %1241 = vmatpush3.bf16.msra.mxu1 %v1309_v9  ;;  %1202 = vmatprep.subr.bf16.mxu0 %v1310_v10  ;;  %v1326_v26 = vld [vmem:[%s1580_s3 + $0x48] sm:$0xff]   ;;  %v1330_v30 = vld [vmem:[%s1580_s3 + $0x40] sm:$0xff]  }
  0x50   : > { %1242 = vmatprep.subr.bf16.mxu1 %v1311_v11  ;;  %v1327_v27 = vld [vmem:[%s1580_s3 + $0xc8] sm:$0xff]   ;;  %v1331_v31 = vld [vmem:[%s1580_s3 + $0xc0] sm:$0xff]  }
  0x51   : > { %v1328_v28 = vld [vmem:[%s1580_s3 + $0x8] sm:$0xff]   ;;  %v1332_v33 = vld [vmem:[%s1580_s3] sm:$0xff]  }
  0x52   : > { %1203 = vmatpush3.bf16.msra.mxu0 %v1312_v12  ;;  %v1329_v29 = vld [vmem:[%s1580_s3 + $0x88] sm:$0xff]   ;;  %v1333_v35 = vld [vmem:[%s1580_s3 + $0x80] sm:$0xff]  }
  0x53   : > { %1243 = vmatpush3.bf16.msra.mxu1 %v1313_v13  ;;  %1204 = vmatprep.subr.bf16.mxu0 %v1314_v14  ;;  %v1337_v34 = vld [vmem:[%s1689_s0 + $0x8] ss:$16 sps:$4 sm:$0xff]   ;;  %v1340_v36 = vld [vmem:[%s1689_s0 + $0x24] ss:$16 sps:$4 sm:$0xff]   ;;  %v1342_v37 = vld [vmem:[%s1689_s0 + $0x2c] ss:$16 sps:$4 sm:$0xff]  }
  0x54   : > { %1244 = vmatprep.subr.bf16.mxu1 %v1315_v15  ;;  %v1344_v38 = vld [vmem:[%s1689_s0 + $0x20] ss:$16 sps:$4 sm:$0xff]   ;;  %v1345_v39 = vld [vmem:[%s1689_s0 + $0x28] ss:$16 sps:$4 sm:$0xff]   ;;  %v1346_v40 = vld [vmem:[%s1689_s0 + $0x44] ss:$16 sps:$4 sm:$0xff]  }
  0x55   : > { %v1348_v41 = vld [vmem:[%s1689_s0 + $0x4c] ss:$16 sps:$4 sm:$0xff]   ;;  %v1350_v42 = vld [vmem:[%s1689_s0 + $0x40] ss:$16 sps:$4 sm:$0xff]   ;;  %v1351_v43 = vld [vmem:[%s1689_s0 + $0x48] ss:$16 sps:$4 sm:$0xff]  }
  0x56   : > { %1205 = vmatpush3.bf16.msra.mxu0 %v1316_v16  ;;  %v1352_v44 = vld [vmem:[%s1689_s0 + $0x64] ss:$16 sps:$4 sm:$0xff]   ;;  %v1354_v45 = vld [vmem:[%s1689_s0 + $0x6c] ss:$16 sps:$4 sm:$0xff]   ;;  %v1356_v46 = vld [vmem:[%s1689_s0 + $0x60] ss:$16 sps:$4 sm:$0xff]  }
  0x57   : > { %1245 = vmatpush3.bf16.msra.mxu1 %v1317_v17  ;;  %1206 = vmatprep.subr.bf16.mxu0 %v1318_v18  ;;  %v1357_v47 = vld [vmem:[%s1689_s0 + $0x68] ss:$16 sps:$4 sm:$0xff]  }
  0x58   : > { %1246 = vmatprep.subr.bf16.mxu1 %v1319_v19 }
  0x5a   : > { %1207 = vmatpush3.bf16.msra.mxu0 %v1320_v20 }
  0x5b   : > { %1247 = vmatpush3.bf16.msra.mxu1 %v1321_v21  ;;  %1208 = vmatprep.subr.bf16.mxu0 %v1322_v22 }
  0x5c   : > { %1248 = vmatprep.subr.bf16.mxu1 %v1323_v23 }
  0x5e   : > { %1209 = vmatpush3.bf16.msra.mxu0 %v1324_v24 }
  0x5f   : > { %1249 = vmatpush3.bf16.msra.mxu1 %v1325_v25  ;;  %1210 = vmatprep.subr.bf16.mxu0 %v1326_v26 }
  0x60   : > { %1250 = vmatprep.subr.bf16.mxu1 %v1327_v27 }
  0x62   : > { %1211 = vmatpush3.bf16.msra.mxu0 %v1328_v28 }
  0x63   : > { %1251 = vmatpush3.bf16.msra.mxu1 %v1329_v29  ;;  %1212 = vmatprep.subr.bf16.mxu0 %v1330_v30 }
  0x64   : > { %1252 = vmatprep.subr.bf16.mxu1 %v1331_v31 }
  0x66   : > { %1213 = vmatpush3.bf16.msra.mxu0 %v1332_v33 }
  0x67   : > { %1253 = vmatpush3.bf16.msra.mxu1 %v1333_v35 }
  0x69   : > { %819 = vmatmul.mubr.bf16.vlgmr.msra.gmra.mxu0 %v1334_v32 }
  0x6a   : > { %884 = vmatmul.mubr.bf16.vlgmr.msra.gmra.mxu1 %v1337_v34  ;;  %826 = vmatprep.mubr.bf16.mxu0 %v1340_v36 }
  0x6b   : > { %891 = vmatprep.mubr.bf16.mxu1 %v1342_v37 }
  0x71   : > { %827 = vmatmul.mubr.bf16.gmra.mxu0 %v1344_v38 }
  0x72   : > { %892 = vmatmul.mubr.bf16.gmra.mxu1 %v1345_v39  ;;  %834 = vmatprep.mubr.bf16.mxu0 %v1346_v40 }
  0x73   : > { %899 = vmatprep.mubr.bf16.mxu1 %v1348_v41 }
  0x79   : > { %835 = vmatmul.mubr.bf16.gmra.mxu0 %v1350_v42 }
  0x7a   : > { %900 = vmatmul.mubr.bf16.gmra.mxu1 %v1351_v43  ;;  %842 = vmatprep.mubr.bf16.mxu0 %v1352_v44 }
  0x7b   : > { %907 = vmatprep.mubr.bf16.mxu1 %v1354_v45 }
  0x81   : > { %843 = vmatmul.mubr.bf16.gmra.mxu0 %v1356_v46 }
  0x82   : > { %908 = vmatmul.mubr.bf16.gmra.mxu1 %v1357_v47 }
 0x129   : > { %v1214_v48 = vpop.f32.mrf.mxu0 }
 0x12a   : > { %v1254_v49 = vpop.f32.mrf.mxu1 }
 0x12b   : > { %v1215_v50 = vpop.f32.mrf.mxu0 }
 0x12c   : > { %v1255_v51 = vpop.f32.mrf.mxu1  ;;  %v1216_v52 = vadd.f32 %v1215_v50, %v1214_v48 }
 0x12d   : > { %v1256_v53 = vadd.f32 %v1255_v51, %v1254_v49  ;;  %v1217_v54 = vpop.f32.mrf.mxu0 }
 0x12e   : > { %v1257_v55 = vpop.f32.mrf.mxu1 }
 0x12f   : > { %v1218_v56 = vpop.f32.mrf.mxu0  ;;  %v886_v59 = vadd.f32 %v1256_v53, %v1216_v52 }
 0x130   : > { %v1219_v57 = vadd.f32 %v1218_v56, %v1217_v54  ;;  %v1258_v58 = vpop.f32.mrf.mxu1 }
 0x131   : > { %v1259_v60 = vadd.f32 %v1258_v58, %v1257_v55  ;;  %v1220_v61 = vpop.f32.mrf.mxu0  ;;  %v916_v2 = vmax.f32 %v886_v59, 0.0 }
 0x132   : > { %v1260_v62 = vpop.f32.mrf.mxu1 }
 0x133   : > { %v889_v63 = vadd.f32 %v1259_v60, %v1219_v57  ;;  %v1221_v0 = vpop.f32.mrf.mxu0 }
 0x134   : > { %v1261_v1 = vpop.f32.mrf.mxu1  ;;  %v1222_v4 = vadd.f32 %v1221_v0, %v1220_v61 }
 0x135   : > { %v917_v3 = vmax.f32 %v889_v63, 0.0  ;;  %v1262_v5 = vadd.f32 %v1261_v1, %v1260_v62  ;;  %v1223_v6 = vpop.f32.mrf.mxu0 }
 0x136   : > { %v1263_v7 = vpop.f32.mrf.mxu1 }
 0x137   : > { %v1178_v8 = vpack.c.bf16 %v917_v3, %v916_v2  ;;  %v1224_v9 = vpop.f32.mrf.mxu0  ;;  %v894_v12 = vadd.f32 %v1262_v5, %v1222_v4 }
 0x138   : > { %v1225_v10 = vadd.f32 %v1224_v9, %v1223_v6  ;;  %v1264_v11 = vpop.f32.mrf.mxu1 }
 0x139   : > { %1179 = vst [vmem:[%s1658_s20] sm:$0xff] %v1178_v8   ;;  %v1265_v13 = vadd.f32 %v1264_v11, %v1263_v7  ;;  %v1226_v14 = vpop.f32.mrf.mxu0  ;;  %v918_v19 = vmax.f32 %v894_v12, 0.0 }
 0x13a   : > { %v1266_v15 = vpop.f32.mrf.mxu1 }
 0x13b   : > { %v897_v16 = vadd.f32 %v1265_v13, %v1225_v10  ;;  %v1227_v17 = vpop.f32.mrf.mxu0 }
 0x13c   : > { %v1267_v18 = vpop.f32.mrf.mxu1  ;;  %v1228_v21 = vadd.f32 %v1227_v17, %v1226_v14 }
 0x13d   : > { %v919_v20 = vmax.f32 %v897_v16, 0.0  ;;  %v1268_v22 = vadd.f32 %v1267_v18, %v1266_v15  ;;  %v1229_v23 = vpop.f32.mrf.mxu0 }
 0x13e   : > { %v1269_v24 = vpop.f32.mrf.mxu1 }
 0x13f   : > { %v1183_v25 = vpack.c.bf16 %v919_v20, %v918_v19  ;;  %v1230_v26 = vpop.f32.mrf.mxu0  ;;  %v902_v29 = vadd.f32 %v1268_v22, %v1228_v21 }
 0x140   : > { %v1231_v27 = vadd.f32 %v1230_v26, %v1229_v23  ;;  %v1270_v28 = vpop.f32.mrf.mxu1  ;;  %v989_v52 = vld [vmem:[%s1658_s20] sm:$0xf] (%p1427_p5)  ;;  %v991_v53 = vld [vmem:[%s1658_s20 + $0x4] sm:$0xf] (%p1427_p5) }
 0x141   : > { %1195 = vst [vmem:[%s1658_s20 + $0x8] sm:$0xff] %v1183_v25   ;;  %v1271_v30 = vadd.f32 %v1270_v28, %v1269_v24  ;;  %v1232_v31 = vpop.f32.mrf.mxu0  ;;  %v920_v36 = vmax.f32 %v902_v29, 0.0  ;;  %990 = vst [vmem:[%s972_s22] sm:$0xf] (%p1427_p5), %v989_v52 }
 0x142   : > { %v1272_v32 = vpop.f32.mrf.mxu1  ;;  %992 = vst [vmem:[%s972_s22 + $0x8] sm:$0xf] (%p1427_p5), %v991_v53 }
 0x143   : > { %v905_v33 = vadd.f32 %v1271_v30, %v1231_v27  ;;  %v1233_v34 = vpop.f32.mrf.mxu0 }
 0x144   : > { %v1273_v35 = vpop.f32.mrf.mxu1  ;;  %v1234_v38 = vadd.f32 %v1233_v34, %v1232_v31 }
 0x145   : > { %v921_v37 = vmax.f32 %v905_v33, 0.0  ;;  %v1274_v39 = vadd.f32 %v1273_v35, %v1272_v32  ;;  %v1235_v40 = vpop.f32.mrf.mxu0 }
 0x146   : > { %v1275_v41 = vpop.f32.mrf.mxu1 }
 0x147   : > { %v1188_v42 = vpack.c.bf16 %v921_v37, %v920_v36  ;;  %v1236_v43 = vpop.f32.mrf.mxu0  ;;  %v910_v46 = vadd.f32 %v1274_v39, %v1234_v38 }
 0x148   : > { %v1237_v44 = vadd.f32 %v1236_v43, %v1235_v40  ;;  %v1276_v45 = vpop.f32.mrf.mxu1  ;;  %v993_v54 = vld [vmem:[%s1658_s20 + $0x8] sm:$0xf] (%p1427_p5)  ;;  %v995_v55 = vld [vmem:[%s1658_s20 + $0xc] sm:$0xf] (%p1427_p5) }
 0x149   : > { %1196 = vst [vmem:[%s1658_s20 + $0x10] sm:$0xff] %v1188_v42   ;;  %v1277_v47 = vadd.f32 %v1276_v45, %v1275_v41  ;;  %v922_v49 = vmax.f32 %v910_v46, 0.0  ;;  %994 = vst [vmem:[%s972_s22 + $0x10] sm:$0xf] (%p1427_p5), %v993_v54 }
 0x14a   : > { %996 = vst [vmem:[%s972_s22 + $0x18] sm:$0xf] (%p1427_p5), %v995_v55 }
 0x14b   : > { %v913_v48 = vadd.f32 %v1277_v47, %v1237_v44 }
 0x14d   : > { %v923_v50 = vmax.f32 %v913_v48, 0.0  ;;  %970 = sbr.rel (!%p1427_p5) target bundleno = 346 (0x15a), region = 73 }
 0x14f   : > { %v1193_v51 = vpack.c.bf16 %v923_v50, %v922_v49 }
 0x150   : > { %v997_v56 = vld [vmem:[%s1658_s20 + $0x10] sm:$0xf] (%p1427_p5)  ;;  %v999_v57 = vld [vmem:[%s1658_s20 + $0x14] sm:$0xf] (%p1427_p5) }
 0x151   : > { %1197 = vst [vmem:[%s1658_s20 + $0x18] sm:$0xff] %v1193_v51   ;;  %998 = vst [vmem:[%s972_s22 + $0x20] sm:$0xf] (%p1427_p5), %v997_v56 }
 0x152   : > { %1000 = vst [vmem:[%s972_s22 + $0x28] sm:$0xf] %v999_v57 }
 0x158   : > { %v1001_v58 = vld [vmem:[%s1658_s20 + $0x18] sm:$0xf]  ;;  %v1003_v59 = vld [vmem:[%s1658_s20 + $0x1c] sm:$0xf] }
 0x159   : > { %1002 = vst [vmem:[%s972_s22 + $0x30] sm:$0xf] %v1001_v58  ;;  %1004 = vst [vmem:[%s972_s22 + $0x38] sm:$0xf] %v1003_v59 }
 0x15a PF: > { %p9_p10 = scmp.ge.s32.totalorder %s1414_s13, 4   ;;  %s1693_s9 = smov %s1376_s10 }
 0x15b   : > { %s1694_s10 = smov %s1425_s16  ;;  %s1695_s11 = smov %s1414_s13 }
 0x15c   :  { %11 = sbr.rel (!%p9_p10) target bundleno = 2 (0x2), region = 145 }

// kernel: dqn_forward.6
= control target key start
LH: loop header
LB: loop body
LE: loop exit
PB: predicated region body
PF: predicated region fallthrough
CT: control target
= control target key end

     0   :  { %vm424_vm0 = vcmask 523264   ;;  %s1154_s1 = inlined_call_operand.vmem [shape: bf16[576,128], index: 1, kind: input, shape index: {}]   ;;  %s1155_s0 = inlined_call_operand.vmem [shape: bf16[64,576], index: 0, kind: input, shape index: {}]   ;;  %s1156_s2 = inlined_call_operand.vmem [shape: bf16[64,128], index: 2, kind: output, shape index: {}]  }
   0x1   :  { %v895_v0 = vld [vmem:[%s1154_s1 + $0x78] sm:$0xff]   ;;  %v899_v4 = vld [vmem:[%s1154_s1 + $0x70] sm:$0xff]   ;;  %v903_v8 = vld [vmem:[%s1154_s1 + $0x68] sm:$0xff]  }
   0x2   :  { %v896_v1 = vld [vmem:[%s1154_s1 + $0xf8] sm:$0xff]   ;;  %783 = vmatprep.subr.bf16.mxu0 %v895_v0  ;;  %v900_v5 = vld [vmem:[%s1154_s1 + $0xf0] sm:$0xff]   ;;  %v904_v9 = vld [vmem:[%s1154_s1 + $0xe8] sm:$0xff]  }
   0x3   :  { %v897_v2 = vld [vmem:[%s1154_s1 + $0x38] sm:$0xff]   ;;  %823 = vmatprep.subr.bf16.mxu1 %v896_v1  ;;  %v901_v6 = vld [vmem:[%s1154_s1 + $0x30] sm:$0xff]   ;;  %v905_v10 = vld [vmem:[%s1154_s1 + $0x28] sm:$0xff]  }
   0x4   :  { %v898_v3 = vld [vmem:[%s1154_s1 + $0xb8] sm:$0xff]   ;;  %784 = vmatpush3.bf16.msra.mxu0 %v897_v2  ;;  %v902_v7 = vld [vmem:[%s1154_s1 + $0xb0] sm:$0xff]   ;;  %v906_v11 = vld [vmem:[%s1154_s1 + $0xa8] sm:$0xff]  }
   0x5   :  { %824 = vmatpush3.bf16.msra.mxu1 %v898_v3  ;;  %785 = vmatprep.subr.bf16.mxu0 %v899_v4  ;;  %v907_v12 = vld [vmem:[%s1154_s1 + $0x60] sm:$0xff]   ;;  %v911_v16 = vld [vmem:[%s1154_s1 + $0x58] sm:$0xff]   ;;  %v915_v20 = vld [vmem:[%s1154_s1 + $0x50] sm:$0xff]  }
   0x6   :  { %825 = vmatprep.subr.bf16.mxu1 %v900_v5  ;;  %v908_v13 = vld [vmem:[%s1154_s1 + $0xe0] sm:$0xff]   ;;  %v912_v17 = vld [vmem:[%s1154_s1 + $0xd8] sm:$0xff]   ;;  %v916_v21 = vld [vmem:[%s1154_s1 + $0xd0] sm:$0xff]  }
   0x7   :  { %v909_v14 = vld [vmem:[%s1154_s1 + $0x20] sm:$0xff]   ;;  %v913_v18 = vld [vmem:[%s1154_s1 + $0x18] sm:$0xff]   ;;  %v917_v22 = vld [vmem:[%s1154_s1 + $0x10] sm:$0xff]  }
   0x8   :  { %786 = vmatpush3.bf16.msra.mxu0 %v901_v6  ;;  %v910_v15 = vld [vmem:[%s1154_s1 + $0xa0] sm:$0xff]   ;;  %v914_v19 = vld [vmem:[%s1154_s1 + $0x98] sm:$0xff]   ;;  %v918_v23 = vld [vmem:[%s1154_s1 + $0x90] sm:$0xff]  }
   0x9   :  { %826 = vmatpush3.bf16.msra.mxu1 %v902_v7  ;;  %787 = vmatprep.subr.bf16.mxu0 %v903_v8  ;;  %v919_v24 = vld [vmem:[%s1154_s1 + $0x48] sm:$0xff]   ;;  %v923_v28 = vld [vmem:[%s1154_s1 + $0x40] sm:$0xff]   ;;  %v933_v36 = vld [vmem:[%s1154_s1 + $0x118] sm:$0xff]  }
   0xa   :  { %827 = vmatprep.subr.bf16.mxu1 %v904_v9  ;;  %v920_v25 = vld [vmem:[%s1154_s1 + $0xc8] sm:$0xff]   ;;  %v924_v29 = vld [vmem:[%s1154_s1 + $0xc0] sm:$0xff]   ;;  %v940_v39 = vld [vmem:[%s1154_s1 + $0x110] sm:$0xff]  }
   0xb   :  { %v921_v26 = vld [vmem:[%s1154_s1 + $0x8] sm:$0xff]   ;;  %v925_v30 = vld [vmem:[%s1154_s1] sm:$0xff]   ;;  %v943_v43 = vld [vmem:[%s1155_s0 + $0x5c] ss:$20 sps:$4 sm:$0xff]  }
   0xc   :  { %788 = vmatpush3.bf16.msra.mxu0 %v905_v10  ;;  %v922_v27 = vld [vmem:[%s1154_s1 + $0x88] sm:$0xff]   ;;  %v926_v31 = vld [vmem:[%s1154_s1 + $0x80] sm:$0xff]   ;;  %v948_v48 = vld [vmem:[%s1155_s0 + $0x7c] ss:$20 sps:$4 sm:$0xff]  }
   0xd   :  { %828 = vmatpush3.bf16.msra.mxu1 %v906_v11  ;;  %789 = vmatprep.subr.bf16.mxu0 %v907_v12  ;;  %v927_v32 = vld [vmem:[%s1155_s0] ss:$20 sps:$4 sm:$0xff]   ;;  %v929_v33 = vld [vmem:[%s1155_s0 + $0x4] ss:$20 sps:$4 sm:$0xff]   ;;  %v930_v34 = vld [vmem:[%s1155_s0 + $0x8] ss:$20 sps:$4 sm:$0xff]  }
   0xe   :  { %829 = vmatprep.subr.bf16.mxu1 %v908_v13  ;;  %v932_v35 = vld [vmem:[%s1155_s0 + $0xc] ss:$20 sps:$4 sm:$0xff]   ;;  %469 = vmatprep.mubr.bf16.mxu0 %v929_v33  ;;  %v936_v38 = vld [vmem:[%s1155_s0 + $0x34] ss:$20 sps:$4 sm:$0xff]   ;;  %v939_v41 = vld [vmem:[%s1155_s0 + $0x30] ss:$20 sps:$4 sm:$0xff]  }
   0xf   :  { %534 = vmatprep.mubr.bf16.mxu1 %v932_v35  ;;  %v934_v37 = vld [vmem:[%s1155_s0 + $0x2c] ss:$20 sps:$4 sm:$0xff]   ;;  %v938_v40 = vld [vmem:[%s1155_s0 + $0x28] ss:$20 sps:$4 sm:$0xff]   ;;  %v945_v46 = vld [vmem:[%s1155_s0 + $0x50] ss:$20 sps:$4 sm:$0xff]  }
  0x10   :  { %790 = vmatpush3.bf16.msra.mxu0 %v909_v14  ;;  %v941_v42 = vld [vmem:[%s1155_s0 + $0x54] ss:$20 sps:$4 sm:$0xff]   ;;  %v954_v45 = vld [vmem:[%s1154_s1 + $0x100] sm:$0xff]   ;;  %v946_v47 = vld [vmem:[%s1155_s0 + $0x58] ss:$20 sps:$4 sm:$0xff]  }
  0x11   :  { %830 = vmatpush3.bf16.msra.mxu1 %v910_v15  ;;  %791 = vmatprep.subr.bf16.mxu0 %v911_v16  ;;  %v947_v44 = vld [vmem:[%s1154_s1 + $0x108] sm:$0xff]   ;;  %v950_v49 = vld [vmem:[%s1155_s0 + $0x84] ss:$20 sps:$4 sm:$0xff]   ;;  %v953_v51 = vld [vmem:[%s1155_s0 + $0x80] ss:$20 sps:$4 sm:$0xff]  }
  0x12   :  { %831 = vmatprep.subr.bf16.mxu1 %v912_v17  ;;  %v952_v50 = vld [vmem:[%s1155_s0 + $0x78] ss:$20 sps:$4 sm:$0xff]   ;;  %v955_v52 = vld [vmem:[%s1155_s0 + $0x10] ss:$20 sps:$4 sm:$0xff]   ;;  %v956_v53 = vld [vmem:[%s1155_s0 + $0x60] ss:$20 sps:$4 sm:$0xff]  }
  0x13   :  { %v957_v54 = vld [vmem:[%s1155_s0 + $0x38] ss:$20 sps:$4 sm:$0xff]   ;;  %v958_v55 = vld [vmem:[%s1155_s0 + $0x88] ss:$20 sps:$4 sm:$0xff]  }
  0x14   :  { %792 = vmatpush3.bf16.msra.mxu0 %v913_v18 }
  0x15   :  { %832 = vmatpush3.bf16.msra.mxu1 %v914_v19  ;;  %793 = vmatprep.subr.bf16.mxu0 %v915_v20 }
  0x16   :  { %833 = vmatprep.subr.bf16.mxu1 %v916_v21 }
  0x18   :  { %794 = vmatpush3.bf16.msra.mxu0 %v917_v22 }
  0x19   :  { %834 = vmatpush3.bf16.msra.mxu1 %v918_v23  ;;  %795 = vmatprep.subr.bf16.mxu0 %v919_v24 }
  0x1a   :  { %835 = vmatprep.subr.bf16.mxu1 %v920_v25 }
  0x1c   :  { %796 = vmatpush3.bf16.msra.mxu0 %v921_v26 }
  0x1d   :  { %836 = vmatpush3.bf16.msra.mxu1 %v922_v27  ;;  %797 = vmatprep.subr.bf16.mxu0 %v923_v28 }
  0x1e   :  { %837 = vmatprep.subr.bf16.mxu1 %v924_v29 }
  0x20   :  { %798 = vmatpush3.bf16.msra.mxu0 %v925_v30 }
  0x21   :  { %838 = vmatpush3.bf16.msra.mxu1 %v926_v31  ;;  %871 = vmatprep.subr.bf16.mxu0 %v933_v36 }
  0x22   :  { %887 = vmatprep.subr.bf16.mxu1 %v933_v36 }
  0x23   :  { %470 = vmatmul.mubr.bf16.vlgmr.msra.gmra.mxu0 %v927_v32 }
  0x24   :  { %535 = vmatmul.mubr.bf16.vlgmr.msra.gmra.mxu1 %v930_v34  ;;  %872 = vmatpush3.bf16.msra.mxu0 %v933_v36 }
  0x25   :  { %891 = vmatpush3.bf16.msra.mxu1 %v933_v36  ;;  %477 = vmatprep.mubr.bf16.mxu0 %v934_v37 }
  0x26   :  { %542 = vmatprep.mubr.bf16.mxu1 %v936_v38  ;;  %873 = vmatprep.subr.bf16.mxu0 %v940_v39 }
  0x27   :  { %888 = vmatprep.subr.bf16.mxu1 %v940_v39 }
  0x28   :  { %874 = vmatpush3.bf16.msra.mxu0 %v940_v39 }
  0x29   :  { %892 = vmatpush3.bf16.msra.mxu1 %v940_v39  ;;  %875 = vmatprep.subr.bf16.mxu0 %v947_v44 }
  0x2a   :  { %889 = vmatprep.subr.bf16.mxu1 %v947_v44 }
  0x2b   :  { %478 = vmatmul.mubr.bf16.gmra.mxu0 %v938_v40 }
  0x2c   :  { %543 = vmatmul.mubr.bf16.gmra.mxu1 %v939_v41  ;;  %485 = vmatprep.mubr.bf16.mxu0 %v941_v42 }
  0x2d   :  { %550 = vmatprep.mubr.bf16.mxu1 %v943_v43  ;;  %876 = vmatpush3.bf16.msra.mxu0 %v947_v44 }
  0x2e   :  { %893 = vmatpush3.bf16.msra.mxu1 %v947_v44  ;;  %877 = vmatprep.subr.bf16.mxu0 %v954_v45 }
  0x2f   :  { %890 = vmatprep.subr.bf16.mxu1 %v954_v45 }
  0x31   :  { %878 = vmatpush3.bf16.msra.mxu0 %v954_v45 }
  0x32   :  { %894 = vmatpush3.bf16.msra.mxu1 %v954_v45 }
  0x33   :  { %486 = vmatmul.mubr.bf16.gmra.mxu0 %v945_v46 }
  0x34   :  { %551 = vmatmul.mubr.bf16.gmra.mxu1 %v946_v47  ;;  %493 = vmatprep.mubr.bf16.mxu0 %v948_v48 }
  0x35   :  { %558 = vmatprep.mubr.bf16.mxu1 %v950_v49 }
  0x3b   :  { %494 = vmatmul.mubr.bf16.gmra.mxu0 %v952_v50 }
  0x3c   :  { %559 = vmatmul.mubr.bf16.gmra.mxu1 %v953_v51  ;;  %879 = vmatprep.mubr.msk.bf16.mxu0 %vm424_vm0, %v955_v52 }
  0x3d   :  { %883 = vmatprep.mubr.msk.bf16.mxu1 %vm424_vm0, %v956_v53 }
  0x43   :  { %880 = vmatmul.mubr.msk.bf16.vlgmr.msra.gmra.mxu0 %vm424_vm0, %v957_v54 }
  0x44   :  { %884 = vmatmul.mubr.msk.bf16.vlgmr.msra.gmra.mxu1 %vm424_vm0, %v958_v55 }
  0xe3   :  { %v799_v56 = vpop.f32.mrf.mxu0 }
  0xe4   :  { %v839_v57 = vpop.f32.mrf.mxu1 }
  0xe5   :  { %v800_v58 = vpop.f32.mrf.mxu0 }
  0xe6   :  { %v840_v59 = vpop.f32.mrf.mxu1  ;;  %v801_v27 = vadd.f32 %v800_v58, %v799_v56 }
  0xe7   :  { %v802_v60 = vpop.f32.mrf.mxu0  ;;  %v841_v28 = vadd.f32 %v840_v59, %v839_v57 }
  0xe8   :  { %v842_v61 = vpop.f32.mrf.mxu1 }
  0xe9   :  { %v803_v62 = vpop.f32.mrf.mxu0  ;;  %v537_v46 = vadd.f32 %v841_v28, %v801_v27 }
  0xea   :  { %v843_v63 = vpop.f32.mrf.mxu1  ;;  %v804_v37 = vadd.f32 %v803_v62, %v802_v60 }
  0xeb   :  { %v805_v0 = vpop.f32.mrf.mxu0  ;;  %v844_v38 = vadd.f32 %v843_v63, %v842_v61 }
  0xec   :  { %v845_v1 = vpop.f32.mrf.mxu1 }
  0xed   :  { %v806_v2 = vpop.f32.mrf.mxu0  ;;  %v540_v56 = vadd.f32 %v844_v38, %v804_v37 }
  0xee   :  { %v846_v3 = vpop.f32.mrf.mxu1  ;;  %v807_v21 = vadd.f32 %v806_v2, %v805_v0 }
  0xef   :  { %v808_v4 = vpop.f32.mrf.mxu0  ;;  %v847_v22 = vadd.f32 %v846_v3, %v845_v1 }
  0xf0   :  { %v848_v5 = vpop.f32.mrf.mxu1 }
  0xf1   :  { %v809_v6 = vpop.f32.mrf.mxu0  ;;  %v545_v39 = vadd.f32 %v847_v22, %v807_v21 }
  0xf2   :  { %v849_v7 = vpop.f32.mrf.mxu1  ;;  %v810_v29 = vadd.f32 %v809_v6, %v808_v4 }
  0xf3   :  { %v811_v8 = vpop.f32.mrf.mxu0  ;;  %v850_v30 = vadd.f32 %v849_v7, %v848_v5 }
  0xf4   :  { %v851_v9 = vpop.f32.mrf.mxu1 }
  0xf5   :  { %v812_v10 = vpop.f32.mrf.mxu0  ;;  %v548_v48 = vadd.f32 %v850_v30, %v810_v29 }
  0xf6   :  { %v852_v11 = vpop.f32.mrf.mxu1  ;;  %v813_v32 = vadd.f32 %v812_v10, %v811_v8 }
  0xf7   :  { %v814_v12 = vpop.f32.mrf.mxu0  ;;  %v853_v33 = vadd.f32 %v852_v11, %v851_v9 }
  0xf8   :  { %v854_v13 = vpop.f32.mrf.mxu1 }
  0xf9   :  { %v815_v14 = vpop.f32.mrf.mxu0  ;;  %v553_v50 = vadd.f32 %v853_v33, %v813_v32 }
  0xfa   :  { %v855_v15 = vpop.f32.mrf.mxu1  ;;  %v816_v41 = vadd.f32 %v815_v14, %v814_v12 }
  0xfb   :  { %v817_v16 = vpop.f32.mrf.mxu0  ;;  %v856_v42 = vadd.f32 %v855_v15, %v854_v13 }
  0xfc   :  { %v857_v17 = vpop.f32.mrf.mxu1 }
  0xfd   :  { %v818_v18 = vpop.f32.mrf.mxu0  ;;  %v556_v60 = vadd.f32 %v856_v42, %v816_v41 }
  0xfe   :  { %v858_v19 = vpop.f32.mrf.mxu1  ;;  %v819_v24 = vadd.f32 %v818_v18, %v817_v16 }
  0xff   :  { %v820_v20 = vpop.f32.mrf.mxu0  ;;  %v859_v25 = vadd.f32 %v858_v19, %v857_v17 }
 0x100   :  { %v860_v23 = vpop.f32.mrf.mxu1 }
 0x101   :  { %v821_v26 = vpop.f32.mrf.mxu0  ;;  %v561_v43 = vadd.f32 %v859_v25, %v819_v24 }
 0x102   :  { %v861_v31 = vpop.f32.mrf.mxu1  ;;  %v822_v34 = vadd.f32 %v821_v26, %v820_v20 }
 0x103   :  { %v862_v35 = vadd.f32 %v861_v31, %v860_v23  ;;  %v881_v36 = vpop.f32.mrf.mxu0 }
 0x104   :  { %v885_v40 = vpop.f32.mrf.mxu1  ;;  %v610_v45 = vadd.f32 %v881_v36, %v545_v39 }
 0x105   :  { %v601_v44 = vpop.f32.mrf.mxu0  ;;  %v626_v49 = vadd.f32 %v885_v40, %v561_v43  ;;  %v564_v52 = vadd.f32 %v862_v35, %v822_v34 }
 0x106   :  { %v617_v47 = vpop.f32.mrf.mxu1  ;;  %v602_v53 = vadd.f32 %v601_v44, %v537_v46  ;;  %v634_v61 = vmax.f32 %v610_v45, 0.0 }
 0x107   :  { %v882_v51 = vpop.f32.mrf.mxu0  ;;  %v618_v57 = vadd.f32 %v617_v47, %v553_v50  ;;  %v638_v1 = vmax.f32 %v626_v49, 0.0 }
 0x108   :  { %v613_v54 = vadd.f32 %v882_v51, %v548_v48  ;;  %v886_v55 = vpop.f32.mrf.mxu1  ;;  %v632_v4 = vmax.f32 %v602_v53, 0.0 }
 0x109   :  { %v629_v58 = vadd.f32 %v886_v55, %v564_v52  ;;  %v604_v59 = vpop.f32.mrf.mxu0  ;;  %v636_v7 = vmax.f32 %v618_v57, 0.0 }
 0x10a   :  { %v635_v62 = vmax.f32 %v613_v54, 0.0  ;;  %v605_v63 = vadd.f32 %v604_v59, %v540_v56  ;;  %v620_v0 = vpop.f32.mrf.mxu1 }
 0x10b   :  { %v639_v2 = vmax.f32 %v629_v58, 0.0  ;;  %v621_v3 = vadd.f32 %v620_v0, %v556_v60 }
 0x10c   :  { %v768_v5 = vpack.c.bf16 %v635_v62, %v634_v61  ;;  %v633_v6 = vmax.f32 %v605_v63, 0.0 }
 0x10d   :  { %v778_v8 = vpack.c.bf16 %v639_v2, %v638_v1  ;;  %v637_v9 = vmax.f32 %v621_v3, 0.0 }
 0x10e   :  { %780 = vst [vmem:[%s1156_s2 + $0x8] sm:$0xff] %v768_v5   ;;  %v763_v10 = vpack.c.bf16 %v633_v6, %v632_v4 }
 0x10f   :  { %782 = vst [vmem:[%s1156_s2 + $0x18] sm:$0xff] %v778_v8   ;;  %v773_v11 = vpack.c.bf16 %v637_v9, %v636_v7 }
 0x110   :  { %764 = vst [vmem:[%s1156_s2] sm:$0xff] %v763_v10  }
 0x111   :  { %781 = vst [vmem:[%s1156_s2 + $0x10] sm:$0xff] %v773_v11  }

// kernel: dqn_forward.7
= control target key start
LH: loop header
LB: loop body
LE: loop exit
PB: predicated region body
PF: predicated region fallthrough
CT: control target
= control target key end

     0   :  { %v625_v0 = vmov 0.0   ;;  %s657_s18 = smov 0   ;;  %s890_s0 = inlined_call_operand.vmem [shape: bf16[64,8,49], index: 0, kind: input, shape index: {}]   ;;  %s891_s1 = inlined_call_operand.vmem [shape: bf16[64,49,512], index: 1, kind: input, shape index: {}]   ;;  %s892_s2 = inlined_call_operand.vmem [shape: f32[1,512], index: 2, kind: input, shape index: {}]   ;;  %s893_s3 = inlined_call_operand.vmem [shape: f32[512,128], index: 3, kind: input, shape index: {}]   ;;  %s894_s4 = inlined_call_operand.vmem [shape: f32[1,128], index: 4, kind: input, shape index: {}]   ;;  %s895_s5 = inlined_call_operand.vmem [shape: f32[8,128], index: 5, kind: output, shape index: {}]  }
   0x1   :  { %21 = vst [vmem:[#allocation2 + $0x10] sm:$0xff] %v625_v0  ;;  %22 = vst [vmem:[#allocation2] sm:$0xff] %v625_v0 }
   0x2   :  { %23 = vst [vmem:[#allocation2 + $0x18] sm:$0xff] %v625_v0  ;;  %24 = vst [vmem:[#allocation2 + $0x8] sm:$0xff] %v625_v0 }
   0x3 LB: > { %v626_v1 = vmov 0   ;;  %s514_s19 = smul.u32 112, %s623_s18  ;;  %vm129_vm0 = vcmask 1040384   ;;  %s493_s23 = sshll.u32 %s623_s18, 2  ;;  %vm125_vm1 = vcmask 400384   ;;  %s623_s18 = sphi %s657_s18, %s30_s18  }
   0x4   : > { %176 = vmatprep.mubr.bf16.mxu0 %v626_v1  ;;  %217 = vmatprep.mubr.bf16.mxu1 %v626_v1  ;;  %v131_v3 = vsel %vm129_vm0, 65535, %v626_v1  ;;  %s36_s26 = scalar_lea.vmem %s890_s0, %s493_s23  ;;  %s30_s18 = sadd.s32 1, %s623_s18  }
   0x5   : > { %s666_s22 = scalar_lea.vmem %s891_s1, %s514_s19  ;;  %v37_v25 = vld [vmem:[%s36_s26] sm:$0xf]  ;;  %p27_p0 = scmp.ge.s32.totalorder %s30_s18, 64  }
   0x6   : > { %v53_v2 = vld [vmem:[%s666_s22 + $0x60] sm:$0x11]  ;;  %v54_v4 = vld [vmem:[%s666_s22 + $0x68] sm:$0x11]  ;;  %v299_v42 = vld [vmem:[%s893_s3 + $0xf8] sm:$0xff] (%p27_p0) }
   0x7   : > { %v508_v5 = vcombine.high %v53_v2, %v53_v2  ;;  %v510_v6 = vcombine.high %v54_v4, %v54_v4  ;;  %v507_v7 = vcombine.low %v53_v2, %v53_v2  ;;  %v509_v8 = vcombine.low %v54_v4, %v54_v4  ;;  %v599_v9 = vld [vmem:[%s666_s22 + $0x44] ss:$16 sps:$4 sm:$0xff]   ;;  %v601_v14 = vld [vmem:[%s666_s22 + $0x4c] ss:$16 sps:$4 sm:$0xff]   ;;  %v603_v15 = vld [vmem:[%s666_s22 + $0x40] ss:$16 sps:$4 sm:$0xff]  }
   0x8   : > { %v604_v16 = vld [vmem:[%s666_s22 + $0x48] ss:$16 sps:$4 sm:$0xff]   ;;  %v605_v17 = vld [vmem:[%s666_s22 + $0x24] ss:$16 sps:$4 sm:$0xff]   ;;  %v607_v18 = vld [vmem:[%s666_s22 + $0x2c] ss:$16 sps:$4 sm:$0xff]   ;;  %v240_v4 = vlaneseq (%p27_p0) }
   0x9   : > { %v136_v10 = vand.u32 %v508_v5, %v131_v3  ;;  %v142_v11 = vand.u32 %v510_v6, %v131_v3  ;;  %v133_v12 = vand.u32 %v507_v7, %v131_v3  ;;  %v139_v13 = vand.u32 %v509_v8, %v131_v3  ;;  %v609_v19 = vld [vmem:[%s666_s22 + $0x20] ss:$16 sps:$4 sm:$0xff]   ;;  %v610_v20 = vld [vmem:[%s666_s22 + $0x28] ss:$16 sps:$4 sm:$0xff]   ;;  %v611_v21 = vld [vmem:[%s666_s22 + $0x4] ss:$16 sps:$4 sm:$0xff]  }
   0xa   : > { %v613_v22 = vld [vmem:[%s666_s22 + $0xc] ss:$16 sps:$4 sm:$0xff]   ;;  %v615_v23 = vld [vmem:[%s666_s22] ss:$16 sps:$4 sm:$0xff]   ;;  %v616_v24 = vld [vmem:[%s666_s22 + $0x8] ss:$16 sps:$4 sm:$0xff]  }
   0xb   : > { %152 = vmatprep.subr.bf16.mxu0 %v136_v10  ;;  %193 = vmatprep.subr.bf16.mxu1 %v142_v11  ;;  %v31_v26 = vld [vmem:[#allocation2 + $0x10] sm:$0xff]  ;;  %v33_v27 = vld [vmem:[#allocation2 + $0x18] sm:$0xff]  ;;  %v32_v30 = vld [vmem:[#allocation2] sm:$0xff] }
   0xc   : > { %153 = vmatpush1.bf16.msra.mxu0 %v133_v12  ;;  %194 = vmatpush1.bf16.msra.mxu1 %v139_v13  ;;  %v34_v31 = vld [vmem:[#allocation2 + $0x8] sm:$0xff]  ;;  %v331_v43 = vld [vmem:[%s893_s3 + $0x1f8] sm:$0xff] (%p27_p0)  ;;  %v298_v46 = vld [vmem:[%s893_s3 + $0xf0] sm:$0xff] (%p27_p0)  ;;  %v241_v13 = vshrl.u32 (%p27_p0), %v240_v4, 7 }
   0xd   : > { %154 = vmatprep.subr.bf16.mxu0 %v599_v9  ;;  %195 = vmatprep.subr.bf16.mxu1 %v601_v14  ;;  %v283_v44 = vld [vmem:[%s893_s3 + $0x78] sm:$0xff] (%p27_p0)  ;;  %v330_v47 = vld [vmem:[%s893_s3 + $0x1f0] sm:$0xff] (%p27_p0)  ;;  %v297_v50 = vld [vmem:[%s893_s3 + $0xe8] sm:$0xff] (%p27_p0) }
   0xe   :  { %v315_v45 = vld [vmem:[%s893_s3 + $0x178] sm:$0xff] (%p27_p0)  ;;  %v282_v48 = vld [vmem:[%s893_s3 + $0x70] sm:$0xff] (%p27_p0)  ;;  %v329_v51 = vld [vmem:[%s893_s3 + $0x1e8] sm:$0xff] (%p27_p0) }
   0xf   :  { %v314_v49 = vld [vmem:[%s893_s3 + $0x170] sm:$0xff] (%p27_p0)  ;;  %v281_v52 = vld [vmem:[%s893_s3 + $0x68] sm:$0xff] (%p27_p0)  ;;  %v296_v54 = vld [vmem:[%s893_s3 + $0xe0] sm:$0xff] (%p27_p0) }
  0x10   : > { %155 = vmatpush1.bf16.msra.mxu0 %v603_v15  ;;  %196 = vmatpush1.bf16.msra.mxu1 %v604_v16  ;;  %v313_v53 = vld [vmem:[%s893_s3 + $0x168] sm:$0xff] (%p27_p0)  ;;  %v328_v55 = vld [vmem:[%s893_s3 + $0x1e0] sm:$0xff] (%p27_p0)  ;;  %v295_v58 = vld [vmem:[%s893_s3 + $0xd8] sm:$0xff] (%p27_p0) }
  0x11   : > { %156 = vmatprep.subr.bf16.mxu0 %v605_v17  ;;  %197 = vmatprep.subr.bf16.mxu1 %v607_v18  ;;  %v280_v56 = vld [vmem:[%s893_s3 + $0x60] sm:$0xff] (%p27_p0)  ;;  %v327_v59 = vld [vmem:[%s893_s3 + $0x1d8] sm:$0xff] (%p27_p0)  ;;  %v294_v62 = vld [vmem:[%s893_s3 + $0xd0] sm:$0xff] (%p27_p0) }
  0x12   :  { %v312_v57 = vld [vmem:[%s893_s3 + $0x160] sm:$0xff] (%p27_p0)  ;;  %v279_v60 = vld [vmem:[%s893_s3 + $0x58] sm:$0xff] (%p27_p0)  ;;  %v326_v63 = vld [vmem:[%s893_s3 + $0x1d0] sm:$0xff] (%p27_p0) }
  0x13   :  { %v311_v61 = vld [vmem:[%s893_s3 + $0x158] sm:$0xff] (%p27_p0)  ;;  %v278_v0 = vld [vmem:[%s893_s3 + $0x50] sm:$0xff] (%p27_p0)  ;;  %v293_v2 = vld [vmem:[%s893_s3 + $0xc8] sm:$0xff] (%p27_p0) }
  0x14   : > { %157 = vmatpush1.bf16.msra.mxu0 %v609_v19  ;;  %198 = vmatpush1.bf16.msra.mxu1 %v610_v20  ;;  %v310_v1 = vld [vmem:[%s893_s3 + $0x150] sm:$0xff] (%p27_p0)  ;;  %v325_v3 = vld [vmem:[%s893_s3 + $0x1c8] sm:$0xff] (%p27_p0)  ;;  %v292_v7 = vld [vmem:[%s893_s3 + $0xc0] sm:$0xff] (%p27_p0) }
  0x15   : > { %158 = vmatprep.subr.bf16.mxu0 %v611_v21  ;;  %199 = vmatprep.subr.bf16.mxu1 %v613_v22  ;;  %v277_v5 = vld [vmem:[%s893_s3 + $0x48] sm:$0xff] (%p27_p0)  ;;  %v324_v8 = vld [vmem:[%s893_s3 + $0x1c0] sm:$0xff] (%p27_p0)  ;;  %v291_v11 = vld [vmem:[%s893_s3 + $0xb8] sm:$0xff] (%p27_p0)  ;;  %v246_v22 = vsub.s32 (%p27_p0), 1, %v241_v13 }
  0x16   :  { %v309_v6 = vld [vmem:[%s893_s3 + $0x148] sm:$0xff] (%p27_p0)  ;;  %v276_v9 = vld [vmem:[%s893_s3 + $0x40] sm:$0xff] (%p27_p0)  ;;  %v323_v12 = vld [vmem:[%s893_s3 + $0x1b8] sm:$0xff] (%p27_p0) }
  0x17   :  { %v308_v10 = vld [vmem:[%s893_s3 + $0x140] sm:$0xff] (%p27_p0)  ;;  %v275_v14 = vld [vmem:[%s893_s3 + $0x38] sm:$0xff] (%p27_p0)  ;;  %v290_v16 = vld [vmem:[%s893_s3 + $0xb0] sm:$0xff] (%p27_p0) }
  0x18   : > { %159 = vmatpush1.bf16.msra.mxu0 %v615_v23  ;;  %200 = vmatpush1.bf16.msra.mxu1 %v616_v24  ;;  %v307_v15 = vld [vmem:[%s893_s3 + $0x138] sm:$0xff] (%p27_p0)  ;;  %v322_v17 = vld [vmem:[%s893_s3 + $0x1b0] sm:$0xff] (%p27_p0)  ;;  %v289_v20 = vld [vmem:[%s893_s3 + $0xa8] sm:$0xff] (%p27_p0)  ;;  %v254_v23 = vsub.s32 (%p27_p0), 3, %v241_v13  ;;  %v242_v24 = vsub.s32 (%p27_p0), 0, %v241_v13 }
  0x19   :  { %515 = vmatprep.subr.mxu0 (%p27_p0), %v299_v42  ;;  %550 = vmatprep.subr.mxu1 (%p27_p0), %v331_v43  ;;  %v274_v18 = vld [vmem:[%s893_s3 + $0x30] sm:$0xff] (%p27_p0)  ;;  %v321_v21 = vld [vmem:[%s893_s3 + $0x1a8] sm:$0xff] (%p27_p0) }
  0x1a   :  { %v306_v19 = vld [vmem:[%s893_s3 + $0x130] sm:$0xff] (%p27_p0) }
  0x1b   : > { %511 = vmatmul.mubr.msk.bf16.vlgmr.msra.gmra.mxu0 %vm125_vm1, %v37_v25  ;;  %512 = vmatmul.mubr.msk.bf16.vlgmr.msra.gmra.mxu1 %vm125_vm1, %v37_v25  ;;  %v273_v25 = vld [vmem:[%s893_s3 + $0x28] sm:$0xff] (%p27_p0) }
  0x1c   :  { %516 = vmatpush3.msra.mxu0 (%p27_p0), %v283_v44  ;;  %551 = vmatpush3.msra.mxu1 (%p27_p0), %v315_v45  ;;  %v286_v45 = vld [vmem:[%s893_s3 + $0x90] sm:$0xff] (%p27_p0) }
  0x1d   :  { %517 = vmatprep.subr.mxu0 (%p27_p0), %v298_v46  ;;  %552 = vmatprep.subr.mxu1 (%p27_p0), %v330_v47  ;;  %v318_v46 = vld [vmem:[%s893_s3 + $0x190] sm:$0xff] (%p27_p0) }
  0x1e   :  { %518 = vmatpush3.msra.mxu0 (%p27_p0), %v282_v48  ;;  %553 = vmatpush3.msra.mxu1 (%p27_p0), %v314_v49  ;;  %v270_v48 = vld [vmem:[%s893_s3 + $0x10] sm:$0xff] (%p27_p0) }
  0x1f   :  { %519 = vmatprep.subr.mxu0 (%p27_p0), %v297_v50  ;;  %554 = vmatprep.subr.mxu1 (%p27_p0), %v329_v51  ;;  %v302_v49 = vld [vmem:[%s893_s3 + $0x110] sm:$0xff] (%p27_p0)  ;;  %v285_v51 = vld [vmem:[%s893_s3 + $0x88] sm:$0xff] (%p27_p0) }
  0x20   :  { %520 = vmatpush3.msra.mxu0 (%p27_p0), %v281_v52  ;;  %555 = vmatpush3.msra.mxu1 (%p27_p0), %v313_v53  ;;  %v317_v52 = vld [vmem:[%s893_s3 + $0x188] sm:$0xff] (%p27_p0) }
  0x21   :  { %521 = vmatprep.subr.mxu0 (%p27_p0), %v296_v54  ;;  %556 = vmatprep.subr.mxu1 (%p27_p0), %v328_v55  ;;  %v269_v55 = vld [vmem:[%s893_s3 + $0x8] sm:$0xff] (%p27_p0) }
  0x22   :  { %522 = vmatpush3.msra.mxu0 (%p27_p0), %v280_v56  ;;  %557 = vmatpush3.msra.mxu1 (%p27_p0), %v312_v57  ;;  %v301_v56 = vld [vmem:[%s893_s3 + $0x108] sm:$0xff] (%p27_p0)  ;;  %v284_v57 = vld [vmem:[%s893_s3 + $0x80] sm:$0xff] (%p27_p0) }
  0x23   :  { %523 = vmatprep.subr.mxu0 (%p27_p0), %v295_v58  ;;  %558 = vmatprep.subr.mxu1 (%p27_p0), %v327_v59  ;;  %v316_v58 = vld [vmem:[%s893_s3 + $0x180] sm:$0xff] (%p27_p0) }
  0x24   :  { %524 = vmatpush3.msra.mxu0 (%p27_p0), %v279_v60  ;;  %559 = vmatpush3.msra.mxu1 (%p27_p0), %v311_v61  ;;  %v268_v60 = vld [vmem:[%s893_s3] sm:$0xff] (%p27_p0) }
  0x25   :  { %525 = vmatprep.subr.mxu0 (%p27_p0), %v294_v62  ;;  %560 = vmatprep.subr.mxu1 (%p27_p0), %v326_v63  ;;  %v300_v62 = vld [vmem:[%s893_s3 + $0x100] sm:$0xff] (%p27_p0) }
  0x26   :  { %526 = vmatpush3.msra.mxu0 (%p27_p0), %v278_v0  ;;  %561 = vmatpush3.msra.mxu1 (%p27_p0), %v310_v1 }
  0x27   :  { %527 = vmatprep.subr.mxu0 (%p27_p0), %v293_v2  ;;  %562 = vmatprep.subr.mxu1 (%p27_p0), %v325_v3  ;;  %v513_v3 = vld [vmem:[%s894_s4] ss:$0 sm:$0xff] (%p27_p0) }
  0x28   :  { %528 = vmatpush3.msra.mxu0 (%p27_p0), %v277_v5  ;;  %563 = vmatpush3.msra.mxu1 (%p27_p0), %v309_v6 }
  0x29   :  { %529 = vmatprep.subr.mxu0 (%p27_p0), %v292_v7  ;;  %564 = vmatprep.subr.mxu1 (%p27_p0), %v324_v8 }
  0x2a   :  { %530 = vmatpush3.msra.mxu0 (%p27_p0), %v276_v9  ;;  %565 = vmatpush3.msra.mxu1 (%p27_p0), %v308_v10 }
  0x2b   :  { %531 = vmatprep.subr.mxu0 (%p27_p0), %v291_v11  ;;  %566 = vmatprep.subr.mxu1 (%p27_p0), %v323_v12 }
  0x2c   :  { %532 = vmatpush3.msra.mxu0 (%p27_p0), %v275_v14  ;;  %567 = vmatpush3.msra.mxu1 (%p27_p0), %v307_v15 }
  0x2d   :  { %533 = vmatprep.subr.mxu0 (%p27_p0), %v290_v16  ;;  %568 = vmatprep.subr.mxu1 (%p27_p0), %v322_v17 }
  0x2e   :  { %534 = vmatpush3.msra.mxu0 (%p27_p0), %v274_v18  ;;  %569 = vmatpush3.msra.mxu1 (%p27_p0), %v306_v19 }
  0x2f   :  { %535 = vmatprep.subr.mxu0 (%p27_p0), %v289_v20  ;;  %570 = vmatprep.subr.mxu1 (%p27_p0), %v321_v21 }
  0x30   :  { %536 = vmatpush3.msra.mxu0 (%p27_p0), %v273_v25 }
  0xdb   : > { %v178_v28 = vpop.f32.mrf.mxu0  ;;  %v219_v29 = vpop.f32.mrf.mxu1 }
  0xdc   : > { %v226_v32 = vadd.f32 %v178_v28, %v31_v26  ;;  %v228_v33 = vadd.f32 %v219_v29, %v33_v27  ;;  %v305_v26 = vld [vmem:[%s893_s3 + $0x128] sm:$0xff] (%p27_p0)  ;;  %v288_v27 = vld [vmem:[%s893_s3 + $0xa0] sm:$0xff] (%p27_p0)  ;;  %v250_v28 = vsub.s32 (%p27_p0), 2, %v241_v13 }
  0xdd   : > { %v180_v34 = vpop.f32.mrf.mxu0  ;;  %v221_v35 = vpop.f32.mrf.mxu1  ;;  %29 = sbr.rel (!%p27_p0) target bundleno = 3 (0x3), region = 49  ;;  %v320_v29 = vld [vmem:[%s893_s3 + $0x1a0] sm:$0xff] (%p27_p0)  ;;  %571 = vmatpush3.msra.mxu1 (%p27_p0), %v305_v26  ;;  %537 = vmatprep.subr.mxu0 (%p27_p0), %v288_v27 }
  0xde   : > { %230 = vst [vmem:[#allocation2 + $0x10] sm:$0xff] %v226_v32  ;;  %232 = vst [vmem:[#allocation2 + $0x18] sm:$0xff] %v228_v33  ;;  %v227_v36 = vadd.f32 %v180_v34, %v32_v30  ;;  %v229_v37 = vadd.f32 %v221_v35, %v34_v31  ;;  %v272_v30 = vld [vmem:[%s893_s3 + $0x20] sm:$0xff] (%p27_p0)  ;;  %v287_v32 = vld [vmem:[%s893_s3 + $0x98] sm:$0xff] (%p27_p0)  ;;  %572 = vmatprep.subr.mxu1 (%p27_p0), %v320_v29 }
  0xdf   : > { %v182_v38 = vpop.f32.mrf.mxu0  ;;  %v223_v39 = vpop.f32.mrf.mxu1  ;;  %v304_v31 = vld [vmem:[%s893_s3 + $0x120] sm:$0xff] (%p27_p0)  ;;  %v319_v35 = vld [vmem:[%s893_s3 + $0x198] sm:$0xff] (%p27_p0)  ;;  %538 = vmatpush3.msra.mxu0 (%p27_p0), %v272_v30 }
  0xe0   : > { %231 = vst [vmem:[#allocation2] sm:$0xff] %v227_v36  ;;  %233 = vst [vmem:[#allocation2 + $0x8] sm:$0xff] %v229_v37  ;;  %v238_v34 = vld [vmem:[%s892_s2] sm:$0xf] (%p27_p0)  ;;  %v271_v36 = vld [vmem:[%s893_s3 + $0x18] sm:$0xff] (%p27_p0)  ;;  %573 = vmatpush3.msra.mxu1 (%p27_p0), %v304_v31  ;;  %539 = vmatprep.subr.mxu0 (%p27_p0), %v287_v32 }
  0xe1   : > { %v183_v40 = vpop.f32.mrf.mxu0  ;;  %v224_v41 = vpop.f32.mrf.mxu1  ;;  %v247_v37 = vrot.slane (%p27_p0), %v238_v34, %v246_v22  ;;  %v255_v39 = vrot.slane (%p27_p0), %v238_v34, %v254_v23  ;;  %v251_v44 = vrot.slane (%p27_p0), %v238_v34, %v250_v28  ;;  %574 = vmatprep.subr.mxu1 (%p27_p0), %v319_v35  ;;  %540 = vmatpush3.msra.mxu0 (%p27_p0), %v271_v36 }
  0xe2   :  { %v243_v40 = vrot.slane %v238_v34, %v242_v24  ;;  %v303_v41 = vld [vmem:[%s893_s3 + $0x118] sm:$0xff]  ;;  %541 = vmatprep.subr.mxu0 %v286_v45 }
  0xe3   :  { %575 = vmatpush3.msra.mxu1 %v303_v41  ;;  %542 = vmatpush3.msra.mxu0 %v270_v48 }
  0xe4   :  { %576 = vmatprep.subr.mxu1 %v318_v46  ;;  %543 = vmatprep.subr.mxu0 %v285_v51 }
  0xe5   :  { %v234_v42 = vld [vmem:[#allocation2 + $0x10] sm:$0xff]  ;;  %v236_v43 = vld [vmem:[#allocation2 + $0x18] sm:$0xff]  ;;  %577 = vmatpush3.msra.mxu1 %v302_v49  ;;  %544 = vmatpush3.msra.mxu0 %v269_v55 }
  0xe6   :  { %v260_v53 = vadd.f32 %v243_v40, %v234_v42  ;;  %v262_v54 = vadd.f32 %v251_v44, %v236_v43  ;;  %578 = vmatprep.subr.mxu1 %v317_v52  ;;  %545 = vmatprep.subr.mxu0 %v284_v57 }
  0xe7   :  { %v235_v33 = vld [vmem:[#allocation2] sm:$0xff]  ;;  %v237_v38 = vld [vmem:[#allocation2 + $0x8] sm:$0xff]  ;;  %579 = vmatpush3.msra.mxu1 %v301_v56  ;;  %546 = vmatpush3.msra.mxu0 %v268_v60 }
  0xe8   :  { %v261_v47 = vadd.f32 %v247_v37, %v235_v33  ;;  %v263_v50 = vadd.f32 %v255_v39, %v237_v38  ;;  %v264_v63 = vmax.f32 %v260_v53, 0.0  ;;  %v266_v0 = vmax.f32 %v262_v54, 0.0  ;;  %580 = vmatprep.subr.mxu1 %v316_v58 }
  0xe9   :  { %581 = vmatpush3.msra.mxu1 %v300_v62 }
  0xea   :  { %v265_v59 = vmax.f32 %v261_v47, 0.0  ;;  %v267_v61 = vmax.f32 %v263_v50, 0.0 }
  0xec   :  { %403 = vmatprep.mubr.f32.mxu0 %v265_v59  ;;  %473 = vmatprep.mubr.f32.mxu1 %v267_v61 }
  0xed   :  { %404 = vmatmul.mubr.f32.vlgmr.msra.gmra.mxu0 %v264_v63  ;;  %474 = vmatmul.mubr.f32.vlgmr.msra.gmra.mxu1 %v266_v0 }
 0x1ad   :  { %v547_v1 = vpop.f32.mrf.mxu0  ;;  %v582_v2 = vpop.f32.mrf.mxu1 }
 0x1af   :  { %v548_v4 = vpop.f32.mrf.mxu0  ;;  %v583_v5 = vpop.f32.mrf.mxu1 }
 0x1b0   :  { %v549_v6 = vadd.f32 %v548_v4, %v547_v1  ;;  %v584_v8 = vadd.f32 %v583_v5, %v582_v2 }
 0x1b2   :  { %v406_v7 = vadd.f32 %v549_v6, %v513_v3 }
 0x1b4   :  { %v476_v9 = vadd.f32 %v584_v8, %v406_v7 }
 0x1b6   :  { %479 = vst [vmem:[%s895_s5] sm:$0xff] %v476_v9 }

</bundles_post_ra>
